<compile_context>
chip_gen: v5e
topology: v5e:2x2
jax: 0.10.0
libtpu: 0.0.40
codegen_flags: <defaults>
</compile_context>

<pallas_src>
import functools

import jax
import jax.numpy as jnp
from jax.experimental import pallas as pl
from jax.experimental.pallas import tpu as pltpu


# --------------------------------------------------------------------------
# Fused Pallas kernel (channel-planar, VPU-only):
#   stage1: depthwise3x3 -> pointwise1x1 (+folded bias/BN) -> ReLU -> VMEM
#   stage2: depthwise3x3 -> pointwise1x1 (+folded bias/BN) -> ReLU -> HBM out
# --------------------------------------------------------------------------
def _fused_double_dsconv_kernel(x_ref, wd1_ref, wp1_ref, sh1_ref,
                                wd2_ref, wp2_ref, sh2_ref,
                                o_ref, mid_ref):
    # x_ref  : (Cin, Hp+4, Wp+4)  VMEM; upsample+pad+2px halo already folded
    # wd*/wp*/sh* : flat f32 SMEM scalar tables (depthwise w, folded pointwise
    #               w, folded bias+BN shift)
    # o_ref  : (Cout, Hp, Wp)     VMEM -> HBM
    # mid_ref: (Cmid, Hp+2, Wp+2) VMEM scratch, stage-1 activation w/ zero ring
    Cout, Hp, Wp = o_ref.shape
    Cmid = mid_ref.shape[0]
    Cin = x_ref.shape[0]
    Hp2, Wp2 = Hp + 2, Wp + 2

    # The 1-px ring of `mid` is the zero padding of the second conv.  Compute
    # stage 1 over the full halo'ed extent (so every scratch store is a whole
    # aligned plane, no scratch zeroing) and mask the ring to exactly zero.
    rows = jax.lax.broadcasted_iota(jnp.int32, (Hp2, Wp2), 0)
    cols = jax.lax.broadcasted_iota(jnp.int32, (Hp2, Wp2), 1)
    ring = (rows == 0) | (rows == Hp2 - 1) | (cols == 0) | (cols == Wp2 - 1)

    # ---- stage 1: depthwise 3x3 (taps as Ref slices = offset vector loads)
    #      + pointwise as scalar-weighted plane FMAs (no MXU at tiny channels)
    y1 = [None] * Cmid
    for ci in range(Cin):
        a = None
        for dh in range(3):
            for dw in range(3):
                w = wd1_ref[(dh * 3 + dw) * Cin + ci]
                t = x_ref[ci, dh:dh + Hp2, dw:dw + Wp2] * w
                a = t if a is None else a + t
        for cm in range(Cmid):
            t = a * wp1_ref[ci * Cmid + cm]
            y1[cm] = t if y1[cm] is None else y1[cm] + t
    for cm in range(Cmid):
        v = jnp.maximum(y1[cm] + sh1_ref[cm], 0.0)
        mid_ref[cm] = jnp.where(ring, 0.0, v)      # whole-plane aligned store

    # ---- stage 2: depthwise 3x3 from the on-chip stage-1 activation
    y2 = [None] * Cout
    for cm in range(Cmid):
        a = None
        for dh in range(3):
            for dw in range(3):
                w = wd2_ref[(dh * 3 + dw) * Cmid + cm]
                t = mid_ref[cm, dh:dh + Hp, dw:dw + Wp] * w
                a = t if a is None else a + t
        for co in range(Cout):
            t = a * wp2_ref[cm * Cout + co]
            y2[co] = t if y2[co] is None else y2[co] + t
    for co in range(Cout):
        o_ref[co] = jnp.maximum(y2[co] + sh2_ref[co], 0.0)


def fused_double_dsconv(x_halo, wd1, wp1, sh1, wd2, wp2, sh2):
    """x_halo: (N, Cin, Hp+4, Wp+4) planar input with 2-px halo -> (N, Cout, Hp, Wp)."""
    N, Cin, H4, W4 = x_halo.shape
    Hp, Wp = H4 - 4, W4 - 4
    Hp2, Wp2 = Hp + 2, Wp + 2
    Cmid = sh1.shape[0]
    Cout = sh2.shape[0]

    # VMEM budget: double-buffered I/O blocks + scratch + generous allowance
    # for in-kernel temporaries; cap well below physical VMEM (v7x: 64 MiB/TC).
    f32 = 4
    plane = Hp2 * Wp2 * f32
    in_blk = Cin * H4 * W4 * f32
    out_blk = Cout * Hp * Wp * f32
    mid_blk = Cmid * plane
    tmp_blk = (Cin + Cmid + Cout + 4) * plane
    need = 2 * (in_blk + out_blk) + mid_blk + tmp_blk + (8 << 20)
    try:
        cap = pltpu.get_tpu_info().vmem_capacity_bytes
    except Exception:
        cap = 64 << 20
    vmem_limit = int(min(need, int(0.75 * cap)))

    smem_spec = pl.BlockSpec(memory_space=pltpu.MemorySpace.SMEM)
    return pl.pallas_call(
        _fused_double_dsconv_kernel,
        out_shape=jax.ShapeDtypeStruct((N, Cout, Hp, Wp), jnp.float32),
        grid=(N,),
        in_specs=[
            pl.BlockSpec((None, Cin, H4, W4), lambda b: (b, 0, 0, 0)),
            smem_spec, smem_spec, smem_spec,      # stage-1 scalar tables
            smem_spec, smem_spec, smem_spec,      # stage-2 scalar tables
        ],
        out_specs=pl.BlockSpec((None, Cout, Hp, Wp), lambda b: (b, 0, 0, 0)),
        scratch_shapes=[pltpu.VMEM((Cmid, Hp2, Wp2), jnp.float32)],
        compiler_params=pltpu.CompilerParams(
            dimension_semantics=("parallel",),
            vmem_limit_bytes=vmem_limit),
    )(x_halo, wd1, wp1, sh1, wd2, wp2, sh2)


# --------------------------------------------------------------------------
# JAX glue: gather-free bilinear x2 upsample + pad-to-zsize + 2-px conv halo,
# expressed as dense interpolation matrices (two tiny matmuls), NCHW kept.
# --------------------------------------------------------------------------
def _interp_pad_matrix(in_size, up_size, pad_before, pad_after, halo):
    total = halo + pad_before + up_size + pad_after + halo
    j = jnp.arange(total, dtype=jnp.int32)
    r = j - (halo + pad_before)                       # position in upsampled img
    valid = (r >= 0) & (r < up_size)
    if in_size == 1:
        return jnp.where(valid[:, None], 1.0, 0.0).astype(jnp.float32)
    pos = r.astype(jnp.float32) * ((in_size - 1) / (up_size - 1))  # align_corners
    lo = jnp.clip(jnp.floor(pos).astype(jnp.int32), 0, in_size - 2)
    frac = pos - lo.astype(jnp.float32)
    m = ((1.0 - frac)[:, None] * jax.nn.one_hot(lo, in_size, dtype=jnp.float32)
         + frac[:, None] * jax.nn.one_hot(lo + 1, in_size, dtype=jnp.float32))
    return jnp.where(valid[:, None], m, 0.0)


def fold_bn(gamma, beta, mean, var, eps=1e-5):
    scale = gamma / jnp.sqrt(var + eps)
    shift = beta - mean * scale
    return scale.reshape(1, -1), shift.reshape(1, -1)


# --------------------------------------------------------------------------
# UpLastConv forward (bilinear=True branch)
# --------------------------------------------------------------------------
def up_last_conv_forward(x_nchw, params, zsize=64):
    p = params
    x = x_nchw.astype(jnp.float32)                    # stays NCHW (planar)
    N, Cin, H, W = x.shape
    Ho, Wo = 2 * H, 2 * W
    diffY, diffX = zsize - Ho, zsize - Wo
    assert diffY >= 0 and diffX >= 0, "zsize must be >= 2*H and 2*W"

    # bilinear x2 (align_corners=True) + F.pad-to-zsize + 2-px conv halo
    HALO = 2
    M_h = _interp_pad_matrix(H, Ho, diffY // 2, diffY - diffY // 2, HALO)
    M_w = _interp_pad_matrix(W, Wo, diffX // 2, diffX - diffX // 2, HALO)
    xin = jnp.einsum('ph,nchw->ncpw', M_h, x)
    xin = jnp.einsum('qw,ncpw->ncpq', M_w, xin)       # (N, Cin, zsize+4, zsize+4)

    Cmid = p['wp1'].shape[1]
    Cout = p['wp2'].shape[1]

    # fold depthwise bias + pointwise bias + BN into pointwise weights / shift:
    #   relu(((acc+bd)@wp + bp)*sc + sh) == relu(acc@(wp*sc) + ((bd@wp+bp)*sc+sh))
    sc1, sh1 = fold_bn(p['bn1_gamma'], p['bn1_beta'], p['bn1_mean'], p['bn1_var'])
    sc2, sh2 = fold_bn(p['bn2_gamma'], p['bn2_beta'], p['bn2_mean'], p['bn2_var'])
    wp1f = p['wp1'] * sc1
    sh1f = ((p['bd1'] @ p['wp1'] + p['bp1']) * sc1 + sh1).reshape(-1)
    wp2f = p['wp2'] * sc2
    sh2f = ((p['bd2'] @ p['wp2'] + p['bp2']) * sc2 + sh2).reshape(-1)

    out = fused_double_dsconv(
        xin,
        p['wd1'].reshape(-1), wp1f.reshape(-1), sh1f,
        p['wd2'].reshape(-1), wp2f.reshape(-1), sh2f)
    assert out.shape == (N, Cout, zsize, zsize)
    return out                                        # already NCHW


# --------------------------------------------------------------------------
# Pure-JAX reference (lax conv + gather bilinear) for correctness checking
# --------------------------------------------------------------------------
def bilinear_up2_align_corners(x):  # x: (N, H, W, C)
    N, H, W, C = x.shape
    Ho, Wo = 2 * H, 2 * W

    def coords(out_size, in_size):
        if in_size == 1:
            lo = jnp.zeros((out_size,), jnp.int32)
            return lo, lo, jnp.zeros((out_size,), jnp.float32)
        pos = jnp.arange(out_size, dtype=jnp.float32) * (
            (in_size - 1) / (out_size - 1))
        lo = jnp.clip(jnp.floor(pos).astype(jnp.int32), 0, in_size - 2)
        frac = pos - lo.astype(jnp.float32)
        return lo, lo + 1, frac

    h0, h1, fh = coords(Ho, H)
    w0, w1, fw = coords(Wo, W)
    top = x[:, h0, :, :]
    bot = x[:, h1, :, :]
    fh_ = fh[None, :, None, None]
    rows = top * (1.0 - fh_) + bot * fh_
    left = rows[:, :, w0, :]
    right = rows[:, :, w1, :]
    fw_ = fw[None, None, :, None]
    return left * (1.0 - fw_) + right * fw_


def _conv2d_ref(x, w, b, padding, groups=1):
    y = jax.lax.conv_general_dilated(
        x, w, (1, 1), [(padding, padding), (padding, padding)],
        dimension_numbers=('NCHW', 'OIHW', 'NCHW'),
        feature_group_count=groups)
    return y + b[None, :, None, None]


def _bn_relu_ref(x, gamma, beta, mean, var, eps=1e-5):
    y = (x - mean[None, :, None, None]) / jnp.sqrt(var[None, :, None, None] + eps)
    y = y * gamma[None, :, None, None] + beta[None, :, None, None]
    return jnp.maximum(y, 0.0)


def up_last_conv_reference(x_nchw, params, zsize=64):
    p = params
    x = x_nchw.astype(jnp.float32)
    x1 = jnp.transpose(
        bilinear_up2_align_corners(jnp.transpose(x, (0, 2, 3, 1))), (0, 3, 1, 2))
    diffY = zsize - x1.shape[2]
    diffX = zsize - x1.shape[3]
    x1 = jnp.pad(x1, ((0, 0), (0, 0),
                      (diffY // 2, diffY - diffY // 2),
                      (diffX // 2, diffX - diffX // 2)))
    cin = x1.shape[1]
    mid = p['wp1'].shape[1]
    # stage 1
    wd1_pt = jnp.transpose(p['wd1'], (2, 0, 1))[:, None, :, :]      # (Cin,1,3,3)
    wp1_pt = jnp.transpose(p['wp1'], (1, 0))[:, :, None, None]       # (mid,Cin,1,1)
    h = _conv2d_ref(x1, wd1_pt, p['bd1'][0], padding=1, groups=cin)
    h = _conv2d_ref(h, wp1_pt, p['bp1'][0], padding=0)
    h = _bn_relu_ref(h, p['bn1_gamma'], p['bn1_beta'], p['bn1_mean'], p['bn1_var'])
    # stage 2
    wd2_pt = jnp.transpose(p['wd2'], (2, 0, 1))[:, None, :, :]
    wp2_pt = jnp.transpose(p['wp2'], (1, 0))[:, :, None, None]
    h = _conv2d_ref(h, wd2_pt, p['bd2'][0], padding=1, groups=mid)
    h = _conv2d_ref(h, wp2_pt, p['bp2'][0], padding=0)
    h = _bn_relu_ref(h, p['bn2_gamma'], p['bn2_beta'], p['bn2_mean'], p['bn2_var'])
    return h


# --------------------------------------------------------------------------
# Deterministic parameter construction
# --------------------------------------------------------------------------
def make_params(key, in_channels, out_channels):
    mid = in_channels // 2  # DoubleConvDS(in, out, in//2) in the bilinear branch
    ks = jax.random.split(key, 16)

    def n(k, shape, s=0.2):
        return (s * jax.random.normal(k, shape)).astype(jnp.float32)

    return dict(
        # stage 1: in_channels -> mid
        wd1=n(ks[0], (3, 3, in_channels)),
        bd1=n(ks[1], (1, in_channels)),
        wp1=n(ks[2], (in_channels, mid)),
        bp1=n(ks[3], (1, mid)),
        bn1_gamma=1.0 + n(ks[4], (mid,), 0.1),
        bn1_beta=n(ks[5], (mid,), 0.1),
        bn1_mean=n(ks[6], (mid,), 0.1),
        bn1_var=jnp.abs(1.0 + n(ks[7], (mid,), 0.1)),
        # stage 2: mid -> out_channels
        wd2=n(ks[8], (3, 3, mid)),
        bd2=n(ks[9], (1, mid)),
        wp2=n(ks[10], (mid, out_channels)),
        bp2=n(ks[11], (1, out_channels)),
        bn2_gamma=1.0 + n(ks[12], (out_channels,), 0.1),
        bn2_beta=n(ks[13], (out_channels,), 0.1),
        bn2_mean=n(ks[14], (out_channels,), 0.1),
        bn2_var=jnp.abs(1.0 + n(ks[15], (out_channels,), 0.1)),
    )


if __name__ == "__main__":
    key = jax.random.PRNGKey(0)
    k_x, k_p = jax.random.split(key)

    # batch=2, in_channels=4, out_channels=3, spatial 16x16 -> upsample to 32,
    # padded to the default zsize=64.
    N, Cin, H, W = 2, 4, 16, 16
    Cout = 3
    zsize = 64

    x = jax.random.normal(k_x, (N, Cin, H, W), dtype=jnp.float32)
    params = make_params(k_p, Cin, Cout)

    fwd = jax.jit(functools.partial(up_last_conv_forward, zsize=zsize))
    out = jax.block_until_ready(fwd(x, params))

    ref = up_last_conv_reference(x, params, zsize=zsize)
    assert out.shape == (N, Cout, zsize, zsize), out.shape
    err = float(jnp.max(jnp.abs(out - ref)))
    assert jnp.allclose(out, ref, rtol=2e-4, atol=2e-4), err

    print("KERNEL_OK")
</pallas_src>

<mosaic_0001>
module attributes {stable_mosaic.version = 11 : i64} {
  func.func @_fused_double_dsconv_kernel(%arg0: i32, %arg1: memref<1x4x68x68xf32, #tpu.memory_space<vmem>>, %arg2: memref<36xf32, #tpu.memory_space<smem>>, %arg3: memref<8xf32, #tpu.memory_space<smem>>, %arg4: memref<2xf32, #tpu.memory_space<smem>>, %arg5: memref<18xf32, #tpu.memory_space<smem>>, %arg6: memref<6xf32, #tpu.memory_space<smem>>, %arg7: memref<3xf32, #tpu.memory_space<smem>>, %arg8: memref<1x3x64x64xf32, #tpu.memory_space<vmem>>, %arg9: memref<2x66x66xf32, #tpu.memory_space<vmem>>) attributes {dimension_semantics = [#tpu.dimension_semantics<parallel>], iteration_bounds = array<i64: 2>, scalar_prefetch = 0 : i64, scratch_operands = 1 : i64, tpu.core_type = #tpu.core_type<tc>, window_params = [{transform_indices = @transform_0, window_bounds = array<i64: 1, 4, 68, 68>}, {transform_indices = @transform_1, window_bounds = array<i64: 36>}, {transform_indices = @transform_2, window_bounds = array<i64: 8>}, {transform_indices = @transform_3, window_bounds = array<i64: 2>}, {transform_indices = @transform_4, window_bounds = array<i64: 18>}, {transform_indices = @transform_5, window_bounds = array<i64: 6>}, {transform_indices = @transform_6, window_bounds = array<i64: 3>}, {transform_indices = @transform_7, window_bounds = array<i64: 1, 3, 64, 64>}]} {
    %0 = tpu.iota {dimensions = array<i32: 0>} : vector<66x66xi32>
    %1 = tpu.iota {dimensions = array<i32: 1>} : vector<66x66xi32>
    %c0_i32 = arith.constant 0 : i32
    %2 = vector.broadcast %c0_i32 : i32 to vector<66x66xi32>
    %3 = arith.cmpi eq, %0, %2 : vector<66x66xi32>
    %c65_i32 = arith.constant 65 : i32
    %4 = vector.broadcast %c65_i32 : i32 to vector<66x66xi32>
    %5 = arith.cmpi eq, %0, %4 : vector<66x66xi32>
    %6 = arith.ori %3, %5 : vector<66x66xi1>
    %c0_i32_0 = arith.constant 0 : i32
    %7 = vector.broadcast %c0_i32_0 : i32 to vector<66x66xi32>
    %8 = arith.cmpi eq, %1, %7 : vector<66x66xi32>
    %9 = arith.ori %6, %8 : vector<66x66xi1>
    %c65_i32_1 = arith.constant 65 : i32
    %10 = vector.broadcast %c65_i32_1 : i32 to vector<66x66xi32>
    %11 = arith.cmpi eq, %1, %10 : vector<66x66xi32>
    %12 = arith.ori %9, %11 : vector<66x66xi1>
    %c0 = arith.constant 0 : index
    %13 = memref.load %arg2[%c0] : memref<36xf32, #tpu.memory_space<smem>>
    %c0_2 = arith.constant 0 : index
    %c0_3 = arith.constant 0 : index
    %c0_4 = arith.constant 0 : index
    %c0_5 = arith.constant 0 : index
    %14 = vector.load %arg1[%c0_2, %c0_3, %c0_4, %c0_5] : memref<1x4x68x68xf32, #tpu.memory_space<vmem>>, vector<1x1x66x66xf32>
    %15 = vector.shape_cast %14 : vector<1x1x66x66xf32> to vector<66x66xf32>
    %16 = vector.broadcast %13 : f32 to vector<66x66xf32>
    %17 = arith.mulf %15, %16 : vector<66x66xf32>
    %c4 = arith.constant 4 : index
    %18 = memref.load %arg2[%c4] : memref<36xf32, #tpu.memory_space<smem>>
    %c0_6 = arith.constant 0 : index
    %c0_7 = arith.constant 0 : index
    %c0_8 = arith.constant 0 : index
    %c1 = arith.constant 1 : index
    %19 = vector.load %arg1[%c0_6, %c0_7, %c0_8, %c1] : memref<1x4x68x68xf32, #tpu.memory_space<vmem>>, vector<1x1x66x66xf32>
    %20 = vector.shape_cast %19 : vector<1x1x66x66xf32> to vector<66x66xf32>
    %21 = vector.broadcast %18 : f32 to vector<66x66xf32>
    %22 = arith.mulf %20, %21 : vector<66x66xf32>
    %23 = arith.addf %17, %22 : vector<66x66xf32>
    %c8 = arith.constant 8 : index
    %24 = memref.load %arg2[%c8] : memref<36xf32, #tpu.memory_space<smem>>
    %c0_9 = arith.constant 0 : index
    %c0_10 = arith.constant 0 : index
    %c0_11 = arith.constant 0 : index
    %c2 = arith.constant 2 : index
    %25 = vector.load %arg1[%c0_9, %c0_10, %c0_11, %c2] : memref<1x4x68x68xf32, #tpu.memory_space<vmem>>, vector<1x1x66x66xf32>
    %26 = vector.shape_cast %25 : vector<1x1x66x66xf32> to vector<66x66xf32>
    %27 = vector.broadcast %24 : f32 to vector<66x66xf32>
    %28 = arith.mulf %26, %27 : vector<66x66xf32>
    %29 = arith.addf %23, %28 : vector<66x66xf32>
    %c12 = arith.constant 12 : index
    %30 = memref.load %arg2[%c12] : memref<36xf32, #tpu.memory_space<smem>>
    %c0_12 = arith.constant 0 : index
    %c0_13 = arith.constant 0 : index
    %c1_14 = arith.constant 1 : index
    %c0_15 = arith.constant 0 : index
    %31 = vector.load %arg1[%c0_12, %c0_13, %c1_14, %c0_15] : memref<1x4x68x68xf32, #tpu.memory_space<vmem>>, vector<1x1x66x66xf32>
    %32 = vector.shape_cast %31 : vector<1x1x66x66xf32> to vector<66x66xf32>
    %33 = vector.broadcast %30 : f32 to vector<66x66xf32>
    %34 = arith.mulf %32, %33 : vector<66x66xf32>
    %35 = arith.addf %29, %34 : vector<66x66xf32>
    %c16 = arith.constant 16 : index
    %36 = memref.load %arg2[%c16] : memref<36xf32, #tpu.memory_space<smem>>
    %c0_16 = arith.constant 0 : index
    %c0_17 = arith.constant 0 : index
    %c1_18 = arith.constant 1 : index
    %c1_19 = arith.constant 1 : index
    %37 = vector.load %arg1[%c0_16, %c0_17, %c1_18, %c1_19] : memref<1x4x68x68xf32, #tpu.memory_space<vmem>>, vector<1x1x66x66xf32>
    %38 = vector.shape_cast %37 : vector<1x1x66x66xf32> to vector<66x66xf32>
    %39 = vector.broadcast %36 : f32 to vector<66x66xf32>
    %40 = arith.mulf %38, %39 : vector<66x66xf32>
    %41 = arith.addf %35, %40 : vector<66x66xf32>
    %c20 = arith.constant 20 : index
    %42 = memref.load %arg2[%c20] : memref<36xf32, #tpu.memory_space<smem>>
    %c0_20 = arith.constant 0 : index
    %c0_21 = arith.constant 0 : index
    %c1_22 = arith.constant 1 : index
    %c2_23 = arith.constant 2 : index
    %43 = vector.load %arg1[%c0_20, %c0_21, %c1_22, %c2_23] : memref<1x4x68x68xf32, #tpu.memory_space<vmem>>, vector<1x1x66x66xf32>
    %44 = vector.shape_cast %43 : vector<1x1x66x66xf32> to vector<66x66xf32>
    %45 = vector.broadcast %42 : f32 to vector<66x66xf32>
    %46 = arith.mulf %44, %45 : vector<66x66xf32>
    %47 = arith.addf %41, %46 : vector<66x66xf32>
    %c24 = arith.constant 24 : index
    %48 = memref.load %arg2[%c24] : memref<36xf32, #tpu.memory_space<smem>>
    %c0_24 = arith.constant 0 : index
    %c0_25 = arith.constant 0 : index
    %c2_26 = arith.constant 2 : index
    %c0_27 = arith.constant 0 : index
    %49 = vector.load %arg1[%c0_24, %c0_25, %c2_26, %c0_27] : memref<1x4x68x68xf32, #tpu.memory_space<vmem>>, vector<1x1x66x66xf32>
    %50 = vector.shape_cast %49 : vector<1x1x66x66xf32> to vector<66x66xf32>
    %51 = vector.broadcast %48 : f32 to vector<66x66xf32>
    %52 = arith.mulf %50, %51 : vector<66x66xf32>
    %53 = arith.addf %47, %52 : vector<66x66xf32>
    %c28 = arith.constant 28 : index
    %54 = memref.load %arg2[%c28] : memref<36xf32, #tpu.memory_space<smem>>
    %c0_28 = arith.constant 0 : index
    %c0_29 = arith.constant 0 : index
    %c2_30 = arith.constant 2 : index
    %c1_31 = arith.constant 1 : index
    %55 = vector.load %arg1[%c0_28, %c0_29, %c2_30, %c1_31] : memref<1x4x68x68xf32, #tpu.memory_space<vmem>>, vector<1x1x66x66xf32>
    %56 = vector.shape_cast %55 : vector<1x1x66x66xf32> to vector<66x66xf32>
    %57 = vector.broadcast %54 : f32 to vector<66x66xf32>
    %58 = arith.mulf %56, %57 : vector<66x66xf32>
    %59 = arith.addf %53, %58 : vector<66x66xf32>
    %c32 = arith.constant 32 : index
    %60 = memref.load %arg2[%c32] : memref<36xf32, #tpu.memory_space<smem>>
    %c0_32 = arith.constant 0 : index
    %c0_33 = arith.constant 0 : index
    %c2_34 = arith.constant 2 : index
    %c2_35 = arith.constant 2 : index
    %61 = vector.load %arg1[%c0_32, %c0_33, %c2_34, %c2_35] : memref<1x4x68x68xf32, #tpu.memory_space<vmem>>, vector<1x1x66x66xf32>
    %62 = vector.shape_cast %61 : vector<1x1x66x66xf32> to vector<66x66xf32>
    %63 = vector.broadcast %60 : f32 to vector<66x66xf32>
    %64 = arith.mulf %62, %63 : vector<66x66xf32>
    %65 = arith.addf %59, %64 : vector<66x66xf32>
    %c0_36 = arith.constant 0 : index
    %66 = memref.load %arg3[%c0_36] : memref<8xf32, #tpu.memory_space<smem>>
    %67 = vector.broadcast %66 : f32 to vector<66x66xf32>
    %68 = arith.mulf %65, %67 : vector<66x66xf32>
    %c1_37 = arith.constant 1 : index
    %69 = memref.load %arg3[%c1_37] : memref<8xf32, #tpu.memory_space<smem>>
    %70 = vector.broadcast %69 : f32 to vector<66x66xf32>
    %71 = arith.mulf %65, %70 : vector<66x66xf32>
    %c1_38 = arith.constant 1 : index
    %72 = memref.load %arg2[%c1_38] : memref<36xf32, #tpu.memory_space<smem>>
    %c0_39 = arith.constant 0 : index
    %c1_40 = arith.constant 1 : index
    %c0_41 = arith.constant 0 : index
    %c0_42 = arith.constant 0 : index
    %73 = vector.load %arg1[%c0_39, %c1_40, %c0_41, %c0_42] : memref<1x4x68x68xf32, #tpu.memory_space<vmem>>, vector<1x1x66x66xf32>
    %74 = vector.shape_cast %73 : vector<1x1x66x66xf32> to vector<66x66xf32>
    %75 = vector.broadcast %72 : f32 to vector<66x66xf32>
    %76 = arith.mulf %74, %75 : vector<66x66xf32>
    %c5 = arith.constant 5 : index
    %77 = memref.load %arg2[%c5] : memref<36xf32, #tpu.memory_space<smem>>
    %c0_43 = arith.constant 0 : index
    %c1_44 = arith.constant 1 : index
    %c0_45 = arith.constant 0 : index
    %c1_46 = arith.constant 1 : index
    %78 = vector.load %arg1[%c0_43, %c1_44, %c0_45, %c1_46] : memref<1x4x68x68xf32, #tpu.memory_space<vmem>>, vector<1x1x66x66xf32>
    %79 = vector.shape_cast %78 : vector<1x1x66x66xf32> to vector<66x66xf32>
    %80 = vector.broadcast %77 : f32 to vector<66x66xf32>
    %81 = arith.mulf %79, %80 : vector<66x66xf32>
    %82 = arith.addf %76, %81 : vector<66x66xf32>
    %c9 = arith.constant 9 : index
    %83 = memref.load %arg2[%c9] : memref<36xf32, #tpu.memory_space<smem>>
    %c0_47 = arith.constant 0 : index
    %c1_48 = arith.constant 1 : index
    %c0_49 = arith.constant 0 : index
    %c2_50 = arith.constant 2 : index
    %84 = vector.load %arg1[%c0_47, %c1_48, %c0_49, %c2_50] : memref<1x4x68x68xf32, #tpu.memory_space<vmem>>, vector<1x1x66x66xf32>
    %85 = vector.shape_cast %84 : vector<1x1x66x66xf32> to vector<66x66xf32>
    %86 = vector.broadcast %83 : f32 to vector<66x66xf32>
    %87 = arith.mulf %85, %86 : vector<66x66xf32>
    %88 = arith.addf %82, %87 : vector<66x66xf32>
    %c13 = arith.constant 13 : index
    %89 = memref.load %arg2[%c13] : memref<36xf32, #tpu.memory_space<smem>>
    %c0_51 = arith.constant 0 : index
    %c1_52 = arith.constant 1 : index
    %c1_53 = arith.constant 1 : index
    %c0_54 = arith.constant 0 : index
    %90 = vector.load %arg1[%c0_51, %c1_52, %c1_53, %c0_54] : memref<1x4x68x68xf32, #tpu.memory_space<vmem>>, vector<1x1x66x66xf32>
    %91 = vector.shape_cast %90 : vector<1x1x66x66xf32> to vector<66x66xf32>
    %92 = vector.broadcast %89 : f32 to vector<66x66xf32>
    %93 = arith.mulf %91, %92 : vector<66x66xf32>
    %94 = arith.addf %88, %93 : vector<66x66xf32>
    %c17 = arith.constant 17 : index
    %95 = memref.load %arg2[%c17] : memref<36xf32, #tpu.memory_space<smem>>
    %c0_55 = arith.constant 0 : index
    %c1_56 = arith.constant 1 : index
    %c1_57 = arith.constant 1 : index
    %c1_58 = arith.constant 1 : index
    %96 = vector.load %arg1[%c0_55, %c1_56, %c1_57, %c1_58] : memref<1x4x68x68xf32, #tpu.memory_space<vmem>>, vector<1x1x66x66xf32>
    %97 = vector.shape_cast %96 : vector<1x1x66x66xf32> to vector<66x66xf32>
    %98 = vector.broadcast %95 : f32 to vector<66x66xf32>
    %99 = arith.mulf %97, %98 : vector<66x66xf32>
    %100 = arith.addf %94, %99 : vector<66x66xf32>
    %c21 = arith.constant 21 : index
    %101 = memref.load %arg2[%c21] : memref<36xf32, #tpu.memory_space<smem>>
    %c0_59 = arith.constant 0 : index
    %c1_60 = arith.constant 1 : index
    %c1_61 = arith.constant 1 : index
    %c2_62 = arith.constant 2 : index
    %102 = vector.load %arg1[%c0_59, %c1_60, %c1_61, %c2_62] : memref<1x4x68x68xf32, #tpu.memory_space<vmem>>, vector<1x1x66x66xf32>
    %103 = vector.shape_cast %102 : vector<1x1x66x66xf32> to vector<66x66xf32>
    %104 = vector.broadcast %101 : f32 to vector<66x66xf32>
    %105 = arith.mulf %103, %104 : vector<66x66xf32>
    %106 = arith.addf %100, %105 : vector<66x66xf32>
    %c25 = arith.constant 25 : index
    %107 = memref.load %arg2[%c25] : memref<36xf32, #tpu.memory_space<smem>>
    %c0_63 = arith.constant 0 : index
    %c1_64 = arith.constant 1 : index
    %c2_65 = arith.constant 2 : index
    %c0_66 = arith.constant 0 : index
    %108 = vector.load %arg1[%c0_63, %c1_64, %c2_65, %c0_66] : memref<1x4x68x68xf32, #tpu.memory_space<vmem>>, vector<1x1x66x66xf32>
    %109 = vector.shape_cast %108 : vector<1x1x66x66xf32> to vector<66x66xf32>
    %110 = vector.broadcast %107 : f32 to vector<66x66xf32>
    %111 = arith.mulf %109, %110 : vector<66x66xf32>
    %112 = arith.addf %106, %111 : vector<66x66xf32>
    %c29 = arith.constant 29 : index
    %113 = memref.load %arg2[%c29] : memref<36xf32, #tpu.memory_space<smem>>
    %c0_67 = arith.constant 0 : index
    %c1_68 = arith.constant 1 : index
    %c2_69 = arith.constant 2 : index
    %c1_70 = arith.constant 1 : index
    %114 = vector.load %arg1[%c0_67, %c1_68, %c2_69, %c1_70] : memref<1x4x68x68xf32, #tpu.memory_space<vmem>>, vector<1x1x66x66xf32>
    %115 = vector.shape_cast %114 : vector<1x1x66x66xf32> to vector<66x66xf32>
    %116 = vector.broadcast %113 : f32 to vector<66x66xf32>
    %117 = arith.mulf %115, %116 : vector<66x66xf32>
    %118 = arith.addf %112, %117 : vector<66x66xf32>
    %c33 = arith.constant 33 : index
    %119 = memref.load %arg2[%c33] : memref<36xf32, #tpu.memory_space<smem>>
    %c0_71 = arith.constant 0 : index
    %c1_72 = arith.constant 1 : index
    %c2_73 = arith.constant 2 : index
    %c2_74 = arith.constant 2 : index
    %120 = vector.load %arg1[%c0_71, %c1_72, %c2_73, %c2_74] : memref<1x4x68x68xf32, #tpu.memory_space<vmem>>, vector<1x1x66x66xf32>
    %121 = vector.shape_cast %120 : vector<1x1x66x66xf32> to vector<66x66xf32>
    %122 = vector.broadcast %119 : f32 to vector<66x66xf32>
    %123 = arith.mulf %121, %122 : vector<66x66xf32>
    %124 = arith.addf %118, %123 : vector<66x66xf32>
    %c2_75 = arith.constant 2 : index
    %125 = memref.load %arg3[%c2_75] : memref<8xf32, #tpu.memory_space<smem>>
    %126 = vector.broadcast %125 : f32 to vector<66x66xf32>
    %127 = arith.mulf %124, %126 : vector<66x66xf32>
    %128 = arith.addf %68, %127 : vector<66x66xf32>
    %c3 = arith.constant 3 : index
    %129 = memref.load %arg3[%c3] : memref<8xf32, #tpu.memory_space<smem>>
    %130 = vector.broadcast %129 : f32 to vector<66x66xf32>
    %131 = arith.mulf %124, %130 : vector<66x66xf32>
    %132 = arith.addf %71, %131 : vector<66x66xf32>
    %c2_76 = arith.constant 2 : index
    %133 = memref.load %arg2[%c2_76] : memref<36xf32, #tpu.memory_space<smem>>
    %c0_77 = arith.constant 0 : index
    %c2_78 = arith.constant 2 : index
    %c0_79 = arith.constant 0 : index
    %c0_80 = arith.constant 0 : index
    %134 = vector.load %arg1[%c0_77, %c2_78, %c0_79, %c0_80] : memref<1x4x68x68xf32, #tpu.memory_space<vmem>>, vector<1x1x66x66xf32>
    %135 = vector.shape_cast %134 : vector<1x1x66x66xf32> to vector<66x66xf32>
    %136 = vector.broadcast %133 : f32 to vector<66x66xf32>
    %137 = arith.mulf %135, %136 : vector<66x66xf32>
    %c6 = arith.constant 6 : index
    %138 = memref.load %arg2[%c6] : memref<36xf32, #tpu.memory_space<smem>>
    %c0_81 = arith.constant 0 : index
    %c2_82 = arith.constant 2 : index
    %c0_83 = arith.constant 0 : index
    %c1_84 = arith.constant 1 : index
    %139 = vector.load %arg1[%c0_81, %c2_82, %c0_83, %c1_84] : memref<1x4x68x68xf32, #tpu.memory_space<vmem>>, vector<1x1x66x66xf32>
    %140 = vector.shape_cast %139 : vector<1x1x66x66xf32> to vector<66x66xf32>
    %141 = vector.broadcast %138 : f32 to vector<66x66xf32>
    %142 = arith.mulf %140, %141 : vector<66x66xf32>
    %143 = arith.addf %137, %142 : vector<66x66xf32>
    %c10 = arith.constant 10 : index
    %144 = memref.load %arg2[%c10] : memref<36xf32, #tpu.memory_space<smem>>
    %c0_85 = arith.constant 0 : index
    %c2_86 = arith.constant 2 : index
    %c0_87 = arith.constant 0 : index
    %c2_88 = arith.constant 2 : index
    %145 = vector.load %arg1[%c0_85, %c2_86, %c0_87, %c2_88] : memref<1x4x68x68xf32, #tpu.memory_space<vmem>>, vector<1x1x66x66xf32>
    %146 = vector.shape_cast %145 : vector<1x1x66x66xf32> to vector<66x66xf32>
    %147 = vector.broadcast %144 : f32 to vector<66x66xf32>
    %148 = arith.mulf %146, %147 : vector<66x66xf32>
    %149 = arith.addf %143, %148 : vector<66x66xf32>
    %c14 = arith.constant 14 : index
    %150 = memref.load %arg2[%c14] : memref<36xf32, #tpu.memory_space<smem>>
    %c0_89 = arith.constant 0 : index
    %c2_90 = arith.constant 2 : index
    %c1_91 = arith.constant 1 : index
    %c0_92 = arith.constant 0 : index
    %151 = vector.load %arg1[%c0_89, %c2_90, %c1_91, %c0_92] : memref<1x4x68x68xf32, #tpu.memory_space<vmem>>, vector<1x1x66x66xf32>
    %152 = vector.shape_cast %151 : vector<1x1x66x66xf32> to vector<66x66xf32>
    %153 = vector.broadcast %150 : f32 to vector<66x66xf32>
    %154 = arith.mulf %152, %153 : vector<66x66xf32>
    %155 = arith.addf %149, %154 : vector<66x66xf32>
    %c18 = arith.constant 18 : index
    %156 = memref.load %arg2[%c18] : memref<36xf32, #tpu.memory_space<smem>>
    %c0_93 = arith.constant 0 : index
    %c2_94 = arith.constant 2 : index
    %c1_95 = arith.constant 1 : index
    %c1_96 = arith.constant 1 : index
    %157 = vector.load %arg1[%c0_93, %c2_94, %c1_95, %c1_96] : memref<1x4x68x68xf32, #tpu.memory_space<vmem>>, vector<1x1x66x66xf32>
    %158 = vector.shape_cast %157 : vector<1x1x66x66xf32> to vector<66x66xf32>
    %159 = vector.broadcast %156 : f32 to vector<66x66xf32>
    %160 = arith.mulf %158, %159 : vector<66x66xf32>
    %161 = arith.addf %155, %160 : vector<66x66xf32>
    %c22 = arith.constant 22 : index
    %162 = memref.load %arg2[%c22] : memref<36xf32, #tpu.memory_space<smem>>
    %c0_97 = arith.constant 0 : index
    %c2_98 = arith.constant 2 : index
    %c1_99 = arith.constant 1 : index
    %c2_100 = arith.constant 2 : index
    %163 = vector.load %arg1[%c0_97, %c2_98, %c1_99, %c2_100] : memref<1x4x68x68xf32, #tpu.memory_space<vmem>>, vector<1x1x66x66xf32>
    %164 = vector.shape_cast %163 : vector<1x1x66x66xf32> to vector<66x66xf32>
    %165 = vector.broadcast %162 : f32 to vector<66x66xf32>
    %166 = arith.mulf %164, %165 : vector<66x66xf32>
    %167 = arith.addf %161, %166 : vector<66x66xf32>
    %c26 = arith.constant 26 : index
    %168 = memref.load %arg2[%c26] : memref<36xf32, #tpu.memory_space<smem>>
    %c0_101 = arith.constant 0 : index
    %c2_102 = arith.constant 2 : index
    %c2_103 = arith.constant 2 : index
    %c0_104 = arith.constant 0 : index
    %169 = vector.load %arg1[%c0_101, %c2_102, %c2_103, %c0_104] : memref<1x4x68x68xf32, #tpu.memory_space<vmem>>, vector<1x1x66x66xf32>
    %170 = vector.shape_cast %169 : vector<1x1x66x66xf32> to vector<66x66xf32>
    %171 = vector.broadcast %168 : f32 to vector<66x66xf32>
    %172 = arith.mulf %170, %171 : vector<66x66xf32>
    %173 = arith.addf %167, %172 : vector<66x66xf32>
    %c30 = arith.constant 30 : index
    %174 = memref.load %arg2[%c30] : memref<36xf32, #tpu.memory_space<smem>>
    %c0_105 = arith.constant 0 : index
    %c2_106 = arith.constant 2 : index
    %c2_107 = arith.constant 2 : index
    %c1_108 = arith.constant 1 : index
    %175 = vector.load %arg1[%c0_105, %c2_106, %c2_107, %c1_108] : memref<1x4x68x68xf32, #tpu.memory_space<vmem>>, vector<1x1x66x66xf32>
    %176 = vector.shape_cast %175 : vector<1x1x66x66xf32> to vector<66x66xf32>
    %177 = vector.broadcast %174 : f32 to vector<66x66xf32>
    %178 = arith.mulf %176, %177 : vector<66x66xf32>
    %179 = arith.addf %173, %178 : vector<66x66xf32>
    %c34 = arith.constant 34 : index
    %180 = memref.load %arg2[%c34] : memref<36xf32, #tpu.memory_space<smem>>
    %c0_109 = arith.constant 0 : index
    %c2_110 = arith.constant 2 : index
    %c2_111 = arith.constant 2 : index
    %c2_112 = arith.constant 2 : index
    %181 = vector.load %arg1[%c0_109, %c2_110, %c2_111, %c2_112] : memref<1x4x68x68xf32, #tpu.memory_space<vmem>>, vector<1x1x66x66xf32>
    %182 = vector.shape_cast %181 : vector<1x1x66x66xf32> to vector<66x66xf32>
    %183 = vector.broadcast %180 : f32 to vector<66x66xf32>
    %184 = arith.mulf %182, %183 : vector<66x66xf32>
    %185 = arith.addf %179, %184 : vector<66x66xf32>
    %c4_113 = arith.constant 4 : index
    %186 = memref.load %arg3[%c4_113] : memref<8xf32, #tpu.memory_space<smem>>
    %187 = vector.broadcast %186 : f32 to vector<66x66xf32>
    %188 = arith.mulf %185, %187 : vector<66x66xf32>
    %189 = arith.addf %128, %188 : vector<66x66xf32>
    %c5_114 = arith.constant 5 : index
    %190 = memref.load %arg3[%c5_114] : memref<8xf32, #tpu.memory_space<smem>>
    %191 = vector.broadcast %190 : f32 to vector<66x66xf32>
    %192 = arith.mulf %185, %191 : vector<66x66xf32>
    %193 = arith.addf %132, %192 : vector<66x66xf32>
    %c3_115 = arith.constant 3 : index
    %194 = memref.load %arg2[%c3_115] : memref<36xf32, #tpu.memory_space<smem>>
    %c0_116 = arith.constant 0 : index
    %c3_117 = arith.constant 3 : index
    %c0_118 = arith.constant 0 : index
    %c0_119 = arith.constant 0 : index
    %195 = vector.load %arg1[%c0_116, %c3_117, %c0_118, %c0_119] : memref<1x4x68x68xf32, #tpu.memory_space<vmem>>, vector<1x1x66x66xf32>
    %196 = vector.shape_cast %195 : vector<1x1x66x66xf32> to vector<66x66xf32>
    %197 = vector.broadcast %194 : f32 to vector<66x66xf32>
    %198 = arith.mulf %196, %197 : vector<66x66xf32>
    %c7 = arith.constant 7 : index
    %199 = memref.load %arg2[%c7] : memref<36xf32, #tpu.memory_space<smem>>
    %c0_120 = arith.constant 0 : index
    %c3_121 = arith.constant 3 : index
    %c0_122 = arith.constant 0 : index
    %c1_123 = arith.constant 1 : index
    %200 = vector.load %arg1[%c0_120, %c3_121, %c0_122, %c1_123] : memref<1x4x68x68xf32, #tpu.memory_space<vmem>>, vector<1x1x66x66xf32>
    %201 = vector.shape_cast %200 : vector<1x1x66x66xf32> to vector<66x66xf32>
    %202 = vector.broadcast %199 : f32 to vector<66x66xf32>
    %203 = arith.mulf %201, %202 : vector<66x66xf32>
    %204 = arith.addf %198, %203 : vector<66x66xf32>
    %c11 = arith.constant 11 : index
    %205 = memref.load %arg2[%c11] : memref<36xf32, #tpu.memory_space<smem>>
    %c0_124 = arith.constant 0 : index
    %c3_125 = arith.constant 3 : index
    %c0_126 = arith.constant 0 : index
    %c2_127 = arith.constant 2 : index
    %206 = vector.load %arg1[%c0_124, %c3_125, %c0_126, %c2_127] : memref<1x4x68x68xf32, #tpu.memory_space<vmem>>, vector<1x1x66x66xf32>
    %207 = vector.shape_cast %206 : vector<1x1x66x66xf32> to vector<66x66xf32>
    %208 = vector.broadcast %205 : f32 to vector<66x66xf32>
    %209 = arith.mulf %207, %208 : vector<66x66xf32>
    %210 = arith.addf %204, %209 : vector<66x66xf32>
    %c15 = arith.constant 15 : index
    %211 = memref.load %arg2[%c15] : memref<36xf32, #tpu.memory_space<smem>>
    %c0_128 = arith.constant 0 : index
    %c3_129 = arith.constant 3 : index
    %c1_130 = arith.constant 1 : index
    %c0_131 = arith.constant 0 : index
    %212 = vector.load %arg1[%c0_128, %c3_129, %c1_130, %c0_131] : memref<1x4x68x68xf32, #tpu.memory_space<vmem>>, vector<1x1x66x66xf32>
    %213 = vector.shape_cast %212 : vector<1x1x66x66xf32> to vector<66x66xf32>
    %214 = vector.broadcast %211 : f32 to vector<66x66xf32>
    %215 = arith.mulf %213, %214 : vector<66x66xf32>
    %216 = arith.addf %210, %215 : vector<66x66xf32>
    %c19 = arith.constant 19 : index
    %217 = memref.load %arg2[%c19] : memref<36xf32, #tpu.memory_space<smem>>
    %c0_132 = arith.constant 0 : index
    %c3_133 = arith.constant 3 : index
    %c1_134 = arith.constant 1 : index
    %c1_135 = arith.constant 1 : index
    %218 = vector.load %arg1[%c0_132, %c3_133, %c1_134, %c1_135] : memref<1x4x68x68xf32, #tpu.memory_space<vmem>>, vector<1x1x66x66xf32>
    %219 = vector.shape_cast %218 : vector<1x1x66x66xf32> to vector<66x66xf32>
    %220 = vector.broadcast %217 : f32 to vector<66x66xf32>
    %221 = arith.mulf %219, %220 : vector<66x66xf32>
    %222 = arith.addf %216, %221 : vector<66x66xf32>
    %c23 = arith.constant 23 : index
    %223 = memref.load %arg2[%c23] : memref<36xf32, #tpu.memory_space<smem>>
    %c0_136 = arith.constant 0 : index
    %c3_137 = arith.constant 3 : index
    %c1_138 = arith.constant 1 : index
    %c2_139 = arith.constant 2 : index
    %224 = vector.load %arg1[%c0_136, %c3_137, %c1_138, %c2_139] : memref<1x4x68x68xf32, #tpu.memory_space<vmem>>, vector<1x1x66x66xf32>
    %225 = vector.shape_cast %224 : vector<1x1x66x66xf32> to vector<66x66xf32>
    %226 = vector.broadcast %223 : f32 to vector<66x66xf32>
    %227 = arith.mulf %225, %226 : vector<66x66xf32>
    %228 = arith.addf %222, %227 : vector<66x66xf32>
    %c27 = arith.constant 27 : index
    %229 = memref.load %arg2[%c27] : memref<36xf32, #tpu.memory_space<smem>>
    %c0_140 = arith.constant 0 : index
    %c3_141 = arith.constant 3 : index
    %c2_142 = arith.constant 2 : index
    %c0_143 = arith.constant 0 : index
    %230 = vector.load %arg1[%c0_140, %c3_141, %c2_142, %c0_143] : memref<1x4x68x68xf32, #tpu.memory_space<vmem>>, vector<1x1x66x66xf32>
    %231 = vector.shape_cast %230 : vector<1x1x66x66xf32> to vector<66x66xf32>
    %232 = vector.broadcast %229 : f32 to vector<66x66xf32>
    %233 = arith.mulf %231, %232 : vector<66x66xf32>
    %234 = arith.addf %228, %233 : vector<66x66xf32>
    %c31 = arith.constant 31 : index
    %235 = memref.load %arg2[%c31] : memref<36xf32, #tpu.memory_space<smem>>
    %c0_144 = arith.constant 0 : index
    %c3_145 = arith.constant 3 : index
    %c2_146 = arith.constant 2 : index
    %c1_147 = arith.constant 1 : index
    %236 = vector.load %arg1[%c0_144, %c3_145, %c2_146, %c1_147] : memref<1x4x68x68xf32, #tpu.memory_space<vmem>>, vector<1x1x66x66xf32>
    %237 = vector.shape_cast %236 : vector<1x1x66x66xf32> to vector<66x66xf32>
    %238 = vector.broadcast %235 : f32 to vector<66x66xf32>
    %239 = arith.mulf %237, %238 : vector<66x66xf32>
    %240 = arith.addf %234, %239 : vector<66x66xf32>
    %c35 = arith.constant 35 : index
    %241 = memref.load %arg2[%c35] : memref<36xf32, #tpu.memory_space<smem>>
    %c0_148 = arith.constant 0 : index
    %c3_149 = arith.constant 3 : index
    %c2_150 = arith.constant 2 : index
    %c2_151 = arith.constant 2 : index
    %242 = vector.load %arg1[%c0_148, %c3_149, %c2_150, %c2_151] : memref<1x4x68x68xf32, #tpu.memory_space<vmem>>, vector<1x1x66x66xf32>
    %243 = vector.shape_cast %242 : vector<1x1x66x66xf32> to vector<66x66xf32>
    %244 = vector.broadcast %241 : f32 to vector<66x66xf32>
    %245 = arith.mulf %243, %244 : vector<66x66xf32>
    %246 = arith.addf %240, %245 : vector<66x66xf32>
    %c6_152 = arith.constant 6 : index
    %247 = memref.load %arg3[%c6_152] : memref<8xf32, #tpu.memory_space<smem>>
    %248 = vector.broadcast %247 : f32 to vector<66x66xf32>
    %249 = arith.mulf %246, %248 : vector<66x66xf32>
    %250 = arith.addf %189, %249 : vector<66x66xf32>
    %c7_153 = arith.constant 7 : index
    %251 = memref.load %arg3[%c7_153] : memref<8xf32, #tpu.memory_space<smem>>
    %252 = vector.broadcast %251 : f32 to vector<66x66xf32>
    %253 = arith.mulf %246, %252 : vector<66x66xf32>
    %254 = arith.addf %193, %253 : vector<66x66xf32>
    %c0_154 = arith.constant 0 : index
    %255 = memref.load %arg4[%c0_154] : memref<2xf32, #tpu.memory_space<smem>>
    %256 = vector.broadcast %255 : f32 to vector<66x66xf32>
    %257 = arith.addf %250, %256 : vector<66x66xf32>
    %cst = arith.constant 0.000000e+00 : f32
    %258 = vector.broadcast %cst : f32 to vector<66x66xf32>
    %259 = arith.maximumf %257, %258 : vector<66x66xf32>
    %cst_155 = arith.constant 0.000000e+00 : f32
    %260 = vector.broadcast %cst_155 : f32 to vector<66x66xf32>
    %261 = arith.select %12, %260, %259 : vector<66x66xi1>, vector<66x66xf32>
    %c0_156 = arith.constant 0 : index
    %c0_157 = arith.constant 0 : index
    %c0_158 = arith.constant 0 : index
    %262 = vector.load %arg9[%c0_156, %c0_157, %c0_158] : memref<2x66x66xf32, #tpu.memory_space<vmem>>, vector<1x66x66xf32>
    %263 = vector.shape_cast %262 : vector<1x66x66xf32> to vector<66x66xf32>
    %264 = vector.shape_cast %261 : vector<66x66xf32> to vector<1x66x66xf32>
    tpu.vector_store %arg9[%c0_156, %c0_157, %c0_158], %264 {strides = array<i32>} : memref<2x66x66xf32, #tpu.memory_space<vmem>>, vector<1x66x66xf32>,
    %c1_159 = arith.constant 1 : index
    %265 = memref.load %arg4[%c1_159] : memref<2xf32, #tpu.memory_space<smem>>
    %266 = vector.broadcast %265 : f32 to vector<66x66xf32>
    %267 = arith.addf %254, %266 : vector<66x66xf32>
    %cst_160 = arith.constant 0.000000e+00 : f32
    %268 = vector.broadcast %cst_160 : f32 to vector<66x66xf32>
    %269 = arith.maximumf %267, %268 : vector<66x66xf32>
    %cst_161 = arith.constant 0.000000e+00 : f32
    %270 = vector.broadcast %cst_161 : f32 to vector<66x66xf32>
    %271 = arith.select %12, %270, %269 : vector<66x66xi1>, vector<66x66xf32>
    %c1_162 = arith.constant 1 : index
    %c0_163 = arith.constant 0 : index
    %c0_164 = arith.constant 0 : index
    %272 = vector.load %arg9[%c1_162, %c0_163, %c0_164] : memref<2x66x66xf32, #tpu.memory_space<vmem>>, vector<1x66x66xf32>
    %273 = vector.shape_cast %272 : vector<1x66x66xf32> to vector<66x66xf32>
    %274 = vector.shape_cast %271 : vector<66x66xf32> to vector<1x66x66xf32>
    tpu.vector_store %arg9[%c1_162, %c0_163, %c0_164], %274 {strides = array<i32>} : memref<2x66x66xf32, #tpu.memory_space<vmem>>, vector<1x66x66xf32>,
    %c0_165 = arith.constant 0 : index
    %275 = memref.load %arg5[%c0_165] : memref<18xf32, #tpu.memory_space<smem>>
    %c0_166 = arith.constant 0 : index
    %c0_167 = arith.constant 0 : index
    %c0_168 = arith.constant 0 : index
    %276 = vector.load %arg9[%c0_166, %c0_167, %c0_168] : memref<2x66x66xf32, #tpu.memory_space<vmem>>, vector<1x64x64xf32>
    %277 = vector.shape_cast %276 : vector<1x64x64xf32> to vector<64x64xf32>
    %278 = vector.broadcast %275 : f32 to vector<64x64xf32>
    %279 = arith.mulf %277, %278 : vector<64x64xf32>
    %c2_169 = arith.constant 2 : index
    %280 = memref.load %arg5[%c2_169] : memref<18xf32, #tpu.memory_space<smem>>
    %c0_170 = arith.constant 0 : index
    %c0_171 = arith.constant 0 : index
    %c1_172 = arith.constant 1 : index
    %281 = vector.load %arg9[%c0_170, %c0_171, %c1_172] : memref<2x66x66xf32, #tpu.memory_space<vmem>>, vector<1x64x64xf32>
    %282 = vector.shape_cast %281 : vector<1x64x64xf32> to vector<64x64xf32>
    %283 = vector.broadcast %280 : f32 to vector<64x64xf32>
    %284 = arith.mulf %282, %283 : vector<64x64xf32>
    %285 = arith.addf %279, %284 : vector<64x64xf32>
    %c4_173 = arith.constant 4 : index
    %286 = memref.load %arg5[%c4_173] : memref<18xf32, #tpu.memory_space<smem>>
    %c0_174 = arith.constant 0 : index
    %c0_175 = arith.constant 0 : index
    %c2_176 = arith.constant 2 : index
    %287 = vector.load %arg9[%c0_174, %c0_175, %c2_176] : memref<2x66x66xf32, #tpu.memory_space<vmem>>, vector<1x64x64xf32>
    %288 = vector.shape_cast %287 : vector<1x64x64xf32> to vector<64x64xf32>
    %289 = vector.broadcast %286 : f32 to vector<64x64xf32>
    %290 = arith.mulf %288, %289 : vector<64x64xf32>
    %291 = arith.addf %285, %290 : vector<64x64xf32>
    %c6_177 = arith.constant 6 : index
    %292 = memref.load %arg5[%c6_177] : memref<18xf32, #tpu.memory_space<smem>>
    %c0_178 = arith.constant 0 : index
    %c1_179 = arith.constant 1 : index
    %c0_180 = arith.constant 0 : index
    %293 = vector.load %arg9[%c0_178, %c1_179, %c0_180] : memref<2x66x66xf32, #tpu.memory_space<vmem>>, vector<1x64x64xf32>
    %294 = vector.shape_cast %293 : vector<1x64x64xf32> to vector<64x64xf32>
    %295 = vector.broadcast %292 : f32 to vector<64x64xf32>
    %296 = arith.mulf %294, %295 : vector<64x64xf32>
    %297 = arith.addf %291, %296 : vector<64x64xf32>
    %c8_181 = arith.constant 8 : index
    %298 = memref.load %arg5[%c8_181] : memref<18xf32, #tpu.memory_space<smem>>
    %c0_182 = arith.constant 0 : index
    %c1_183 = arith.constant 1 : index
    %c1_184 = arith.constant 1 : index
    %299 = vector.load %arg9[%c0_182, %c1_183, %c1_184] : memref<2x66x66xf32, #tpu.memory_space<vmem>>, vector<1x64x64xf32>
    %300 = vector.shape_cast %299 : vector<1x64x64xf32> to vector<64x64xf32>
    %301 = vector.broadcast %298 : f32 to vector<64x64xf32>
    %302 = arith.mulf %300, %301 : vector<64x64xf32>
    %303 = arith.addf %297, %302 : vector<64x64xf32>
    %c10_185 = arith.constant 10 : index
    %304 = memref.load %arg5[%c10_185] : memref<18xf32, #tpu.memory_space<smem>>
    %c0_186 = arith.constant 0 : index
    %c1_187 = arith.constant 1 : index
    %c2_188 = arith.constant 2 : index
    %305 = vector.load %arg9[%c0_186, %c1_187, %c2_188] : memref<2x66x66xf32, #tpu.memory_space<vmem>>, vector<1x64x64xf32>
    %306 = vector.shape_cast %305 : vector<1x64x64xf32> to vector<64x64xf32>
    %307 = vector.broadcast %304 : f32 to vector<64x64xf32>
    %308 = arith.mulf %306, %307 : vector<64x64xf32>
    %309 = arith.addf %303, %308 : vector<64x64xf32>
    %c12_189 = arith.constant 12 : index
    %310 = memref.load %arg5[%c12_189] : memref<18xf32, #tpu.memory_space<smem>>
    %c0_190 = arith.constant 0 : index
    %c2_191 = arith.constant 2 : index
    %c0_192 = arith.constant 0 : index
    %311 = vector.load %arg9[%c0_190, %c2_191, %c0_192] : memref<2x66x66xf32, #tpu.memory_space<vmem>>, vector<1x64x64xf32>
    %312 = vector.shape_cast %311 : vector<1x64x64xf32> to vector<64x64xf32>
    %313 = vector.broadcast %310 : f32 to vector<64x64xf32>
    %314 = arith.mulf %312, %313 : vector<64x64xf32>
    %315 = arith.addf %309, %314 : vector<64x64xf32>
    %c14_193 = arith.constant 14 : index
    %316 = memref.load %arg5[%c14_193] : memref<18xf32, #tpu.memory_space<smem>>
    %c0_194 = arith.constant 0 : index
    %c2_195 = arith.constant 2 : index
    %c1_196 = arith.constant 1 : index
    %317 = vector.load %arg9[%c0_194, %c2_195, %c1_196] : memref<2x66x66xf32, #tpu.memory_space<vmem>>, vector<1x64x64xf32>
    %318 = vector.shape_cast %317 : vector<1x64x64xf32> to vector<64x64xf32>
    %319 = vector.broadcast %316 : f32 to vector<64x64xf32>
    %320 = arith.mulf %318, %319 : vector<64x64xf32>
    %321 = arith.addf %315, %320 : vector<64x64xf32>
    %c16_197 = arith.constant 16 : index
    %322 = memref.load %arg5[%c16_197] : memref<18xf32, #tpu.memory_space<smem>>
    %c0_198 = arith.constant 0 : index
    %c2_199 = arith.constant 2 : index
    %c2_200 = arith.constant 2 : index
    %323 = vector.load %arg9[%c0_198, %c2_199, %c2_200] : memref<2x66x66xf32, #tpu.memory_space<vmem>>, vector<1x64x64xf32>
    %324 = vector.shape_cast %323 : vector<1x64x64xf32> to vector<64x64xf32>
    %325 = vector.broadcast %322 : f32 to vector<64x64xf32>
    %326 = arith.mulf %324, %325 : vector<64x64xf32>
    %327 = arith.addf %321, %326 : vector<64x64xf32>
    %c0_201 = arith.constant 0 : index
    %328 = memref.load %arg6[%c0_201] : memref<6xf32, #tpu.memory_space<smem>>
    %329 = vector.broadcast %328 : f32 to vector<64x64xf32>
    %330 = arith.mulf %327, %329 : vector<64x64xf32>
    %c1_202 = arith.constant 1 : index
    %331 = memref.load %arg6[%c1_202] : memref<6xf32, #tpu.memory_space<smem>>
    %332 = vector.broadcast %331 : f32 to vector<64x64xf32>
    %333 = arith.mulf %327, %332 : vector<64x64xf32>
    %c2_203 = arith.constant 2 : index
    %334 = memref.load %arg6[%c2_203] : memref<6xf32, #tpu.memory_space<smem>>
    %335 = vector.broadcast %334 : f32 to vector<64x64xf32>
    %336 = arith.mulf %327, %335 : vector<64x64xf32>
    %c1_204 = arith.constant 1 : index
    %337 = memref.load %arg5[%c1_204] : memref<18xf32, #tpu.memory_space<smem>>
    %c1_205 = arith.constant 1 : index
    %c0_206 = arith.constant 0 : index
    %c0_207 = arith.constant 0 : index
    %338 = vector.load %arg9[%c1_205, %c0_206, %c0_207] : memref<2x66x66xf32, #tpu.memory_space<vmem>>, vector<1x64x64xf32>
    %339 = vector.shape_cast %338 : vector<1x64x64xf32> to vector<64x64xf32>
    %340 = vector.broadcast %337 : f32 to vector<64x64xf32>
    %341 = arith.mulf %339, %340 : vector<64x64xf32>
    %c3_208 = arith.constant 3 : index
    %342 = memref.load %arg5[%c3_208] : memref<18xf32, #tpu.memory_space<smem>>
    %c1_209 = arith.constant 1 : index
    %c0_210 = arith.constant 0 : index
    %c1_211 = arith.constant 1 : index
    %343 = vector.load %arg9[%c1_209, %c0_210, %c1_211] : memref<2x66x66xf32, #tpu.memory_space<vmem>>, vector<1x64x64xf32>
    %344 = vector.shape_cast %343 : vector<1x64x64xf32> to vector<64x64xf32>
    %345 = vector.broadcast %342 : f32 to vector<64x64xf32>
    %346 = arith.mulf %344, %345 : vector<64x64xf32>
    %347 = arith.addf %341, %346 : vector<64x64xf32>
    %c5_212 = arith.constant 5 : index
    %348 = memref.load %arg5[%c5_212] : memref<18xf32, #tpu.memory_space<smem>>
    %c1_213 = arith.constant 1 : index
    %c0_214 = arith.constant 0 : index
    %c2_215 = arith.constant 2 : index
    %349 = vector.load %arg9[%c1_213, %c0_214, %c2_215] : memref<2x66x66xf32, #tpu.memory_space<vmem>>, vector<1x64x64xf32>
    %350 = vector.shape_cast %349 : vector<1x64x64xf32> to vector<64x64xf32>
    %351 = vector.broadcast %348 : f32 to vector<64x64xf32>
    %352 = arith.mulf %350, %351 : vector<64x64xf32>
    %353 = arith.addf %347, %352 : vector<64x64xf32>
    %c7_216 = arith.constant 7 : index
    %354 = memref.load %arg5[%c7_216] : memref<18xf32, #tpu.memory_space<smem>>
    %c1_217 = arith.constant 1 : index
    %c1_218 = arith.constant 1 : index
    %c0_219 = arith.constant 0 : index
    %355 = vector.load %arg9[%c1_217, %c1_218, %c0_219] : memref<2x66x66xf32, #tpu.memory_space<vmem>>, vector<1x64x64xf32>
    %356 = vector.shape_cast %355 : vector<1x64x64xf32> to vector<64x64xf32>
    %357 = vector.broadcast %354 : f32 to vector<64x64xf32>
    %358 = arith.mulf %356, %357 : vector<64x64xf32>
    %359 = arith.addf %353, %358 : vector<64x64xf32>
    %c9_220 = arith.constant 9 : index
    %360 = memref.load %arg5[%c9_220] : memref<18xf32, #tpu.memory_space<smem>>
    %c1_221 = arith.constant 1 : index
    %c1_222 = arith.constant 1 : index
    %c1_223 = arith.constant 1 : index
    %361 = vector.load %arg9[%c1_221, %c1_222, %c1_223] : memref<2x66x66xf32, #tpu.memory_space<vmem>>, vector<1x64x64xf32>
    %362 = vector.shape_cast %361 : vector<1x64x64xf32> to vector<64x64xf32>
    %363 = vector.broadcast %360 : f32 to vector<64x64xf32>
    %364 = arith.mulf %362, %363 : vector<64x64xf32>
    %365 = arith.addf %359, %364 : vector<64x64xf32>
    %c11_224 = arith.constant 11 : index
    %366 = memref.load %arg5[%c11_224] : memref<18xf32, #tpu.memory_space<smem>>
    %c1_225 = arith.constant 1 : index
    %c1_226 = arith.constant 1 : index
    %c2_227 = arith.constant 2 : index
    %367 = vector.load %arg9[%c1_225, %c1_226, %c2_227] : memref<2x66x66xf32, #tpu.memory_space<vmem>>, vector<1x64x64xf32>
    %368 = vector.shape_cast %367 : vector<1x64x64xf32> to vector<64x64xf32>
    %369 = vector.broadcast %366 : f32 to vector<64x64xf32>
    %370 = arith.mulf %368, %369 : vector<64x64xf32>
    %371 = arith.addf %365, %370 : vector<64x64xf32>
    %c13_228 = arith.constant 13 : index
    %372 = memref.load %arg5[%c13_228] : memref<18xf32, #tpu.memory_space<smem>>
    %c1_229 = arith.constant 1 : index
    %c2_230 = arith.constant 2 : index
    %c0_231 = arith.constant 0 : index
    %373 = vector.load %arg9[%c1_229, %c2_230, %c0_231] : memref<2x66x66xf32, #tpu.memory_space<vmem>>, vector<1x64x64xf32>
    %374 = vector.shape_cast %373 : vector<1x64x64xf32> to vector<64x64xf32>
    %375 = vector.broadcast %372 : f32 to vector<64x64xf32>
    %376 = arith.mulf %374, %375 : vector<64x64xf32>
    %377 = arith.addf %371, %376 : vector<64x64xf32>
    %c15_232 = arith.constant 15 : index
    %378 = memref.load %arg5[%c15_232] : memref<18xf32, #tpu.memory_space<smem>>
    %c1_233 = arith.constant 1 : index
    %c2_234 = arith.constant 2 : index
    %c1_235 = arith.constant 1 : index
    %379 = vector.load %arg9[%c1_233, %c2_234, %c1_235] : memref<2x66x66xf32, #tpu.memory_space<vmem>>, vector<1x64x64xf32>
    %380 = vector.shape_cast %379 : vector<1x64x64xf32> to vector<64x64xf32>
    %381 = vector.broadcast %378 : f32 to vector<64x64xf32>
    %382 = arith.mulf %380, %381 : vector<64x64xf32>
    %383 = arith.addf %377, %382 : vector<64x64xf32>
    %c17_236 = arith.constant 17 : index
    %384 = memref.load %arg5[%c17_236] : memref<18xf32, #tpu.memory_space<smem>>
    %c1_237 = arith.constant 1 : index
    %c2_238 = arith.constant 2 : index
    %c2_239 = arith.constant 2 : index
    %385 = vector.load %arg9[%c1_237, %c2_238, %c2_239] : memref<2x66x66xf32, #tpu.memory_space<vmem>>, vector<1x64x64xf32>
    %386 = vector.shape_cast %385 : vector<1x64x64xf32> to vector<64x64xf32>
    %387 = vector.broadcast %384 : f32 to vector<64x64xf32>
    %388 = arith.mulf %386, %387 : vector<64x64xf32>
    %389 = arith.addf %383, %388 : vector<64x64xf32>
    %c3_240 = arith.constant 3 : index
    %390 = memref.load %arg6[%c3_240] : memref<6xf32, #tpu.memory_space<smem>>
    %391 = vector.broadcast %390 : f32 to vector<64x64xf32>
    %392 = arith.mulf %389, %391 : vector<64x64xf32>
    %393 = arith.addf %330, %392 : vector<64x64xf32>
    %c4_241 = arith.constant 4 : index
    %394 = memref.load %arg6[%c4_241] : memref<6xf32, #tpu.memory_space<smem>>
    %395 = vector.broadcast %394 : f32 to vector<64x64xf32>
    %396 = arith.mulf %389, %395 : vector<64x64xf32>
    %397 = arith.addf %333, %396 : vector<64x64xf32>
    %c5_242 = arith.constant 5 : index
    %398 = memref.load %arg6[%c5_242] : memref<6xf32, #tpu.memory_space<smem>>
    %399 = vector.broadcast %398 : f32 to vector<64x64xf32>
    %400 = arith.mulf %389, %399 : vector<64x64xf32>
    %401 = arith.addf %336, %400 : vector<64x64xf32>
    %c0_243 = arith.constant 0 : index
    %402 = memref.load %arg7[%c0_243] : memref<3xf32, #tpu.memory_space<smem>>
    %403 = vector.broadcast %402 : f32 to vector<64x64xf32>
    %404 = arith.addf %393, %403 : vector<64x64xf32>
    %cst_244 = arith.constant 0.000000e+00 : f32
    %405 = vector.broadcast %cst_244 : f32 to vector<64x64xf32>
    %406 = arith.maximumf %404, %405 : vector<64x64xf32>
    %c0_245 = arith.constant 0 : index
    %c0_246 = arith.constant 0 : index
    %c0_247 = arith.constant 0 : index
    %c0_248 = arith.constant 0 : index
    %407 = vector.load %arg8[%c0_245, %c0_246, %c0_247, %c0_248] : memref<1x3x64x64xf32, #tpu.memory_space<vmem>>, vector<1x1x64x64xf32>
    %408 = vector.shape_cast %407 : vector<1x1x64x64xf32> to vector<64x64xf32>
    %409 = vector.shape_cast %406 : vector<64x64xf32> to vector<1x1x64x64xf32>
    tpu.vector_store %arg8[%c0_245, %c0_246, %c0_247, %c0_248], %409 {strides = array<i32>} : memref<1x3x64x64xf32, #tpu.memory_space<vmem>>, vector<1x1x64x64xf32>,
    %c1_249 = arith.constant 1 : index
    %410 = memref.load %arg7[%c1_249] : memref<3xf32, #tpu.memory_space<smem>>
    %411 = vector.broadcast %410 : f32 to vector<64x64xf32>
    %412 = arith.addf %397, %411 : vector<64x64xf32>
    %cst_250 = arith.constant 0.000000e+00 : f32
    %413 = vector.broadcast %cst_250 : f32 to vector<64x64xf32>
    %414 = arith.maximumf %412, %413 : vector<64x64xf32>
    %c0_251 = arith.constant 0 : index
    %c1_252 = arith.constant 1 : index
    %c0_253 = arith.constant 0 : index
    %c0_254 = arith.constant 0 : index
    %415 = vector.load %arg8[%c0_251, %c1_252, %c0_253, %c0_254] : memref<1x3x64x64xf32, #tpu.memory_space<vmem>>, vector<1x1x64x64xf32>
    %416 = vector.shape_cast %415 : vector<1x1x64x64xf32> to vector<64x64xf32>
    %417 = vector.shape_cast %414 : vector<64x64xf32> to vector<1x1x64x64xf32>
    tpu.vector_store %arg8[%c0_251, %c1_252, %c0_253, %c0_254], %417 {strides = array<i32>} : memref<1x3x64x64xf32, #tpu.memory_space<vmem>>, vector<1x1x64x64xf32>,
    %c2_255 = arith.constant 2 : index
    %418 = memref.load %arg7[%c2_255] : memref<3xf32, #tpu.memory_space<smem>>
    %419 = vector.broadcast %418 : f32 to vector<64x64xf32>
    %420 = arith.addf %401, %419 : vector<64x64xf32>
    %cst_256 = arith.constant 0.000000e+00 : f32
    %421 = vector.broadcast %cst_256 : f32 to vector<64x64xf32>
    %422 = arith.maximumf %420, %421 : vector<64x64xf32>
    %c0_257 = arith.constant 0 : index
    %c2_258 = arith.constant 2 : index
    %c0_259 = arith.constant 0 : index
    %c0_260 = arith.constant 0 : index
    %423 = vector.load %arg8[%c0_257, %c2_258, %c0_259, %c0_260] : memref<1x3x64x64xf32, #tpu.memory_space<vmem>>, vector<1x1x64x64xf32>
    %424 = vector.shape_cast %423 : vector<1x1x64x64xf32> to vector<64x64xf32>
    %425 = vector.shape_cast %422 : vector<64x64xf32> to vector<1x1x64x64xf32>
    tpu.vector_store %arg8[%c0_257, %c2_258, %c0_259, %c0_260], %425 {strides = array<i32>} : memref<1x3x64x64xf32, #tpu.memory_space<vmem>>, vector<1x1x64x64xf32>,
    return
  }
  func.func @transform_0(%arg0: i32) -> (i32, i32, i32, i32) {
    %c0_i32 = arith.constant 0 : i32
    %c0_i32_0 = arith.constant 0 : i32
    %c0_i32_1 = arith.constant 0 : i32
    %c0_i32_2 = arith.constant 0 : i32
    return %arg0, %c0_i32, %c0_i32_0, %c0_i32_1 : i32, i32, i32, i32
  }
  func.func @transform_1(%arg0: i32) -> i32 {
    %c0_i32 = arith.constant 0 : i32
    %c0_i32_0 = arith.constant 0 : i32
    return %c0_i32 : i32
  }
  func.func @transform_2(%arg0: i32) -> i32 {
    %c0_i32 = arith.constant 0 : i32
    %c0_i32_0 = arith.constant 0 : i32
    return %c0_i32 : i32
  }
  func.func @transform_3(%arg0: i32) -> i32 {
    %c0_i32 = arith.constant 0 : i32
    %c0_i32_0 = arith.constant 0 : i32
    return %c0_i32 : i32
  }
  func.func @transform_4(%arg0: i32) -> i32 {
    %c0_i32 = arith.constant 0 : i32
    %c0_i32_0 = arith.constant 0 : i32
    return %c0_i32 : i32
  }
  func.func @transform_5(%arg0: i32) -> i32 {
    %c0_i32 = arith.constant 0 : i32
    %c0_i32_0 = arith.constant 0 : i32
    return %c0_i32 : i32
  }
  func.func @transform_6(%arg0: i32) -> i32 {
    %c0_i32 = arith.constant 0 : i32
    %c0_i32_0 = arith.constant 0 : i32
    return %c0_i32 : i32
  }
  func.func @transform_7(%arg0: i32) -> (i32, i32, i32, i32) {
    %c0_i32 = arith.constant 0 : i32
    %c0_i32_0 = arith.constant 0 : i32
    %c0_i32_1 = arith.constant 0 : i32
    %c0_i32_2 = arith.constant 0 : i32
    return %arg0, %c0_i32, %c0_i32_0, %c0_i32_1 : i32, i32, i32, i32
  }
}

</mosaic_0001>

<bundles_post_ra>
// kernel: up_last_conv_forward.1
= control target key start
LH: loop header
LB: loop body
LE: loop exit
PB: predicated region body
PF: predicated region fallthrough
CT: control target
= control target key end

     0   :  { %s6478_s0 = inlined_call_operand.vmem [shape: f32[2,4,68,68], index: 0, kind: input, shape index: {}]   ;;  %s6479_s1 = inlined_call_operand.vmem [shape: f32[36], index: 1, kind: input, shape index: {}]   ;;  %s6480_s2 = inlined_call_operand.vmem [shape: f32[8], index: 2, kind: input, shape index: {}]   ;;  %s6481_s3 = inlined_call_operand.vmem [shape: f32[2], index: 3, kind: input, shape index: {}]   ;;  %s6482_s4 = inlined_call_operand.vmem [shape: f32[18], index: 4, kind: input, shape index: {}]   ;;  %s6483_s5 = inlined_call_operand.vmem [shape: f32[6], index: 5, kind: input, shape index: {}]   ;;  %s6484_s6 = inlined_call_operand.vmem [shape: f32[3], index: 6, kind: input, shape index: {}]   ;;  %s6485_s7 = inlined_call_operand.hbm [shape: f32[2,3,64,64], index: 7, kind: output, shape index: {}]  }
   0x1   :  { %6508 = sst [smem:[#allocation174_spill]] %s6479_s1 }
   0x2   :  { %6509 = sst [smem:[#allocation175_spill]] %s6480_s2 }
   0x3   :  { %12 = vsyncpa [#allocation5], 0 }
   0x4   :  { %13 = vsyncpa [#allocation7], 0 }
   0x5   :  { %14 = vsyncpa [#allocation10], 0 }
   0x6   :  { %15 = vsyncpa [#allocation13], 0 }
   0x7   :  { %16 = vsyncpa [#allocation4], 0 }
   0x8   :  { %18 = vsyncpa [#allocation4 + $0x1], 0  ;;  %s3936_s24 = smov 0   ;;  %s3938_s25 = smov 0  }
   0x9   :  { %s3940_s26 = smov 0   ;;  %s3942_s27 = smov 0  }
   0xa LB: > { %s3957_s28 = sadd.s32 4294967295, %s3884_s27   ;;  %s3336_s29 = sadd.s32 4294967294, %s3884_s27   ;;  %s3884_s27 = sphi %s3942_s27, %s6863_s27   ;;  %s3880_s26 = sphi %s3940_s26, %s6862_s26   ;;  %s3876_s25 = sphi %s3938_s25, %s6861_s25   ;;  %s3872_s24 = sphi %s3936_s24, %s6860_s24  }
   0xb   : > { %s3961_s30 = sadd.s32 1, %s3884_s27   ;;  %s183_s8 = sadd.s32 1, %s3880_s26 }
   0xc   : > { %s180_s9 = ssub.s32 %s3884_s27, %s3961_s30  ;;  %p193_p0 = scmp.ne.s32.totalorder %s3880_s26, %s3876_s25 }
   0xd   : > { %p181_p1 = scmp.eq.s32.totalorder %s180_s9, 0  ;;  %p194_p2 = scmp.eq.s32.totalorder %s3957_s28, 1 }
   0xe   : > { %p199_p3 = scmp.ne.s32.totalorder %s3876_s25, %s3872_s24  ;;  %p200_p4 = scmp.eq.s32.totalorder %s3336_s29, 1 }
   0xf   : > { %s3972_s10 = scalar_select %p181_p1, %s3880_s26, %s183_s8  }
  0x10   : > { %p3974_p5 = por %p194_p2, %p193_p0  ;;  %p3978_p6 = por %p200_p4, %p199_p3 }
  0x11   : > { %p3337_p7 = scmp.ge.s32.totalorder %s3884_s27, 1  ;;  %p207_p8 = scmp.lt.s32.totalorder %s3884_s27, 3 }
  0x12   : > { %p3572_p9 = scmp.eq.s32.totalorder %s3957_s28, 0  ;;  %s6513_s2 = sld [smem:[#allocation175_spill]] }
  0x13   : > { %p3985_p10 = pnand %p3337_p7, %p207_p8  ;;  %s249_s19 = sshll.u32 %s6482_s4, 4  ;;  %s250_s19 = int_to_ptr.vmem [resolvable:$true] %s249_s19 }
  0x14   : > { %s6515_s1 = sld [smem:[#allocation174_spill]]  ;;  %s239_s9 = sshll.u32 %s6481_s3, 4  ;;  %s240_s9 = int_to_ptr.vmem [resolvable:$true] %s239_s9 }
  0x15   : > { %p3549_p11 = pneg %p3985_p10  ;;  %s3886_s14 = smov [#allocation6]  }
  0x16   : > { %s3887_s15 = smov [#allocation9]   ;;  %s3888_s17 = smov [#allocation3]  }
  0x17   : > { %p3999_p12 = pnand %p3572_p9, %p3549_p11  ;;  %s3889_s18 = smov [#allocation8]  }
  0x18   : > { %s229_s16 = sshll.u32 %s6513_s2, 4  ;;  %s269_s2 = sshll.u32 %s6484_s6, 4  ;;  %s230_s16 = int_to_ptr.vmem [resolvable:$true] %s229_s16  ;;  %s270_s2 = int_to_ptr.vmem [resolvable:$true] %s269_s2 }
  0x19   : > { %3555 = dma.vmem_to_smem (!%p3999_p12), %s230_s16, 16, %s3886_s14, [#allocation7]  }
  0x1a   : > { %s219_s23 = sshll.u32 %s6515_s1, 4  ;;  %s259_s1 = sshll.u32 %s6483_s5, 4  ;;  %s220_s23 = int_to_ptr.vmem [resolvable:$true] %s219_s23  ;;  %s260_s1 = int_to_ptr.vmem [resolvable:$true] %s259_s1 }
  0x1b   : > { %3561 = dma.vmem_to_smem (!%p3999_p12), %s250_s19, 16, %s3887_s15, [#allocation10]  }
  0x1c   : > { %3552 = dma.vmem_to_smem (!%p3999_p12), %s220_s23, 16, %s3888_s17, [#allocation5]  }
  0x1d   : > { %3558 = dma.vmem_to_smem (!%p3999_p12), %s240_s9, 16, %s3889_s18, [#allocation7]  }
  0x1e   : > { %s3890_s16 = smov [#allocation11]   ;;  %s3891_s19 = smov [#allocation12]  }
  0x1f   : > { %3564 = dma.vmem_to_smem (!%p3999_p12), %s260_s1, 16, %s3890_s16, [#allocation10]  }
  0x20   : > { %3567 = dma.vmem_to_smem (!%p3999_p12), %s270_s2, 16, %s3891_s19, [#allocation13]  }
  0x21   : > { %290 = sbr.rel (%p3985_p10) target bundleno = 1129 (0x469), region = 48 }
  0x26   : > { %3851 = dma.done.wait (%p3572_p9), [#allocation5], 16  }
  0x27   : > { %3853 = vsyncadd (%p3572_p9), [#allocation5], 4294967280 }
  0x28   : > { %3855 = dma.done.wait (%p3572_p9), [#allocation7], 32  }
  0x29   : > { %3857 = vsyncadd (%p3572_p9), [#allocation7], 4294967264 }
  0x2a   : > { %3859 = dma.done.wait (%p3572_p9), [#allocation10], 32  }
  0x2b   : > { %3861 = vsyncadd (%p3572_p9), [#allocation10], 4294967264 }
  0x2c   : > { %3863 = dma.done.wait (%p3572_p9), [#allocation13], 16  }
  0x2d   : > { %3865 = vsyncadd (%p3572_p9), [#allocation13], 4294967280 }
  0x2e   : > { %322 = sfence }
  0x2f   : > { %p349_p13 = scmp.lt.s32.totalorder %s3957_s28, 1  ;;  %s3353_s1 = sld [smem:[#allocation3 + $0x4]]  ;;  %vm2243_vm3 = vcmask 539648   ;;  %vm2252_vm7 = vcmask 533504   ;;  %vm3135_vm11 = vcmask 523264  }
  0x30   : > { %s3892_s14 = smov 127   ;;  %s3354_s15 = sld [smem:[#allocation3 + $0x8]] }
  0x31   : > { %s350_s2 = scalar_select %p349_p13, %s3957_s28, 1 }
  0x32   : > { %s3893_s17 = smov 126   ;;  %s3356_s18 = sld [smem:[#allocation3 + $0x10]] }
  0x33   : > { %s3521_s13 = smul.u32 288, %s350_s2  ;;  %s3357_s21 = sld [smem:[#allocation3 + $0x14]] }
  0x34   : > { %s3359_s22 = sld [smem:[#allocation3 + $0x1c]] }
  0x35   : > { %s4050_s9 = scalar_lea.vmem %s6478_s0, %s3521_s13  ;;  %v434_v0 = vstv %s3353_s1  ;;  %s3360_s29 = sld [smem:[#allocation3 + $0x20]] }
  0x36   : > { %v418_v1 = vld [vmem:[%s4050_s9 + $0x20] sm:$0xff]  ;;  %v416_v2 = vld [vmem:[%s4050_s9 + $0x10] sm:$0xff]  ;;  %v419_v7 = vld [vmem:[%s4050_s9 + $0x28] sm:$0xff]  ;;  %v490_v19 = vstv %s3354_s15  ;;  %s3372_s8 = sld [smem:[#allocation3 + $0x5]] }
  0x37   : > { %v414_v3 = vld [vmem:[%s4050_s9] sm:$0xff]  ;;  %v439_v4 = vmul.f32 %v434_v0, %v418_v1  ;;  %v437_v5 = vmul.f32 %v434_v0, %v416_v2  ;;  %v417_v8 = vld [vmem:[%s4050_s9 + $0x18] sm:$0xff]  ;;  %v415_v9 = vld [vmem:[%s4050_s9 + $0x8] sm:$0xff]  ;;  %v440_v10 = vmul.f32 %v434_v0, %v419_v7  ;;  %v493_v20 = vmul.f32 %v490_v19, %v416_v2  ;;  %s3373_s16 = sld [smem:[#allocation3 + $0x9]] }
  0x38   : > { %v435_v6 = vmul.f32 %v434_v0, %v414_v3  ;;  %v438_v11 = vmul.f32 %v434_v0, %v417_v8  ;;  %v436_v12 = vmul.f32 %v434_v0, %v415_v9  ;;  %v422_v13 = vld [vmem:[%s4050_s9 + $0x40] sm:$0x3]  ;;  %v421_v14 = vld [vmem:[%s4050_s9 + $0x38] sm:$0xff]  ;;  %v420_v15 = vld [vmem:[%s4050_s9 + $0x30] sm:$0xff]  ;;  %v492_v21 = vmul.f32 %v490_v19, %v415_v9  ;;  %s3384_s19 = sld [smem:[#allocation3 + $0x11]] }
  0x39   : > { %461 = vrot.lane.b32.xlu2 %v439_v4, %s3892_s14  ;;  %457 = vrot.lane.b32.xlu1 %v437_v5, %s3892_s14  ;;  %v443_v16 = vmul.f32 %v434_v0, %v422_v13  ;;  %v442_v17 = vmul.f32 %v434_v0, %v421_v14  ;;  %v441_v18 = vmul.f32 %v434_v0, %v420_v15  ;;  %v548_v29 = vld [vmem:[%s4050_s9 + $0x11] sm:$0xff]  ;;  %v575_v30 = vstv %s3356_s18  ;;  %s3385_s1 = sld [smem:[#allocation3 + $0x15]] }
  0x3a   : > { %453 = vrot.lane.b32.xlu0 %v435_v6, %s3892_s14  ;;  %v491_v22 = vmul.f32 %v490_v19, %v414_v3  ;;  %v496_v23 = vmul.f32 %v490_v19, %v419_v7  ;;  %v495_v24 = vmul.f32 %v490_v19, %v418_v1  ;;  %v494_v25 = vmul.f32 %v490_v19, %v417_v8  ;;  %v547_v31 = vld [vmem:[%s4050_s9 + $0x9] sm:$0xff]  ;;  %v546_v32 = vld [vmem:[%s4050_s9 + $0x1] sm:$0xff]  ;;  %v549_v38 = vld [vmem:[%s4050_s9 + $0x19] sm:$0xff]  ;;  %s3396_s2 = sld [smem:[#allocation3 + $0x1d]] }
  0x3b   : > { %v499_v26 = vmul.f32 %v490_v19, %v422_v13  ;;  %v498_v27 = vmul.f32 %v490_v19, %v421_v14  ;;  %v497_v28 = vmul.f32 %v490_v19, %v420_v15  ;;  %v578_v33 = vmul.f32 %v575_v30, %v548_v29  ;;  %v551_v36 = vld [vmem:[%s4050_s9 + $0x29] sm:$0xff]  ;;  %v550_v37 = vld [vmem:[%s4050_s9 + $0x21] sm:$0xff]  ;;  %v553_v43 = vld [vmem:[%s4050_s9 + $0x39] sm:$0xff]  ;;  %s3397_s13 = sld [smem:[#allocation3 + $0x21]] }
  0x3c   : > { %v577_v34 = vmul.f32 %v575_v30, %v547_v31  ;;  %v576_v35 = vmul.f32 %v575_v30, %v546_v32  ;;  %v581_v39 = vmul.f32 %v575_v30, %v551_v36  ;;  %v580_v40 = vmul.f32 %v575_v30, %v550_v37  ;;  %v554_v42 = vld [vmem:[%s4050_s9 + $0x41] sm:$0x3]  ;;  %v552_v44 = vld [vmem:[%s4050_s9 + $0x31] sm:$0xff]  ;;  %s3410_s20 = sld [smem:[#allocation3 + $0x6]] }
  0x3d   : > { %v579_v41 = vmul.f32 %v575_v30, %v549_v38  ;;  %v584_v45 = vmul.f32 %v575_v30, %v554_v42  ;;  %v583_v46 = vmul.f32 %v575_v30, %v553_v43  ;;  %v582_v47 = vmul.f32 %v575_v30, %v552_v44  ;;  %v689_v58 = vld [vmem:[%s4050_s9 + $0x12] sm:$0xff]  ;;  %v688_v60 = vld [vmem:[%s4050_s9 + $0xa] sm:$0xff]  ;;  %v687_v62 = vld [vmem:[%s4050_s9 + $0x2] sm:$0xff]  ;;  %s3411_s23 = sld [smem:[#allocation3 + $0xa]] }
  0x3e   : > { %v631_v48 = vstv %s3357_s21  ;;  %v716_v59 = vstv %s3359_s22  ;;  %v692_v2 = vld [vmem:[%s4050_s9 + $0x2a] sm:$0xff]  ;;  %v691_v3 = vld [vmem:[%s4050_s9 + $0x22] sm:$0xff]  ;;  %s3422_s15 = sld [smem:[#allocation3 + $0x12]] }
  0x3f   : > { %v634_v49 = vmul.f32 %v631_v48, %v548_v29  ;;  %v633_v50 = vmul.f32 %v631_v48, %v547_v31  ;;  %v632_v51 = vmul.f32 %v631_v48, %v546_v32  ;;  %v637_v52 = vmul.f32 %v631_v48, %v551_v36  ;;  %v690_v5 = vld [vmem:[%s4050_s9 + $0x1a] sm:$0xff]  ;;  %v695_v9 = vld [vmem:[%s4050_s9 + $0x42] sm:$0x3]  ;;  %s3423_s18 = sld [smem:[#allocation3 + $0x16]] }
  0x40   : > { %v636_v53 = vmul.f32 %v631_v48, %v550_v37  ;;  %v635_v54 = vmul.f32 %v631_v48, %v549_v38  ;;  %v640_v55 = vmul.f32 %v631_v48, %v554_v42  ;;  %v639_v56 = vmul.f32 %v631_v48, %v553_v43  ;;  %v3364_v37 = vld [vmem:[%s4050_s9 + $0x50] sm:$0xff]  ;;  %s3434_s21 = sld [smem:[#allocation3 + $0x1e]] }
  0x41   : > { %463 = vrot.lane.b32.xlu2 %v440_v10, %s3892_s14  ;;  %459 = vrot.lane.b32.xlu1 %v438_v11, %s3892_s14  ;;  %v638_v57 = vmul.f32 %v631_v48, %v552_v44  ;;  %v719_v63 = vmul.f32 %v716_v59, %v689_v58  ;;  %v718_v0 = vmul.f32 %v716_v59, %v688_v60  ;;  %v694_v10 = vld [vmem:[%s4050_s9 + $0x3a] sm:$0xff]  ;;  %v871_v36 = vstv %s3372_s8  ;;  %s3435_s22 = sld [smem:[#allocation3 + $0x22]] }
  0x42   : > { %455 = vrot.lane.b32.xlu0 %v436_v12, %s3892_s14  ;;  %v717_v1 = vmul.f32 %v716_v59, %v687_v62  ;;  %v722_v6 = vmul.f32 %v716_v59, %v692_v2  ;;  %v721_v7 = vmul.f32 %v716_v59, %v691_v3  ;;  %v720_v8 = vmul.f32 %v716_v59, %v690_v5  ;;  %v693_v12 = vld [vmem:[%s4050_s9 + $0x32] sm:$0xff]  ;;  %s3449_s8 = sld [smem:[#allocation3 + $0xb]] }
  0x43   : > { %v725_v13 = vmul.f32 %v716_v59, %v695_v9  ;;  %v724_v14 = vmul.f32 %v716_v59, %v694_v10  ;;  %v723_v15 = vmul.f32 %v716_v59, %v693_v12  ;;  %v873_v43 = vmul.f32 %v3364_v37, %v871_v36 }
  0x49   : > { %469 = vrot.lane.b32.xlu2 %v443_v16, %s3892_s14  ;;  %467 = vrot.lane.b32.xlu1 %v442_v17, %s3892_s14  ;;  %v772_v16 = vstv %s3360_s29  ;;  %s3448_s29 = sld [smem:[#allocation3 + $0x7]] }
  0x4a   : > { %465 = vrot.lane.b32.xlu0 %v441_v18, %s3892_s14  ;;  %v781_v32 = vmul.f32 %v772_v16, %v695_v9 }
  0x51   : > { %513 = vrot.lane.b32.xlu2 %v493_v20, %s3893_s17  ;;  %511 = vrot.lane.b32.xlu1 %v492_v21, %s3893_s17  ;;  %v775_v20 = vmul.f32 %v772_v16, %v689_v58  ;;  %v774_v21 = vmul.f32 %v772_v16, %v688_v60  ;;  %v3369_v58 = vld [vmem:[%s4050_s9 + $0x78] sm:$0xff] }
  0x52   : > { %509 = vrot.lane.b32.xlu0 %v491_v22, %s3893_s17  ;;  %v773_v22 = vmul.f32 %v772_v16, %v687_v62 }
  0x59   : > { %519 = vrot.lane.b32.xlu2 %v496_v23, %s3893_s17  ;;  %517 = vrot.lane.b32.xlu1 %v495_v24, %s3893_s17 }
  0x5a   : > { %515 = vrot.lane.b32.xlu0 %v494_v25, %s3893_s17 }
  0x61   : > { %525 = vrot.lane.b32.xlu2 %v499_v26, %s3893_s17  ;;  %523 = vrot.lane.b32.xlu1 %v498_v27, %s3893_s17  ;;  %v778_v26 = vmul.f32 %v772_v16, %v692_v2  ;;  %v777_v27 = vmul.f32 %v772_v16, %v691_v3 }
  0x62   : > { %521 = vrot.lane.b32.xlu0 %v497_v28, %s3893_s17  ;;  %v776_v28 = vmul.f32 %v772_v16, %v690_v5 }
  0x69   : > { %598 = vrot.lane.b32.xlu2 %v578_v33, %s3892_s14  ;;  %596 = vrot.lane.b32.xlu1 %v577_v34, %s3892_s14  ;;  %v780_v33 = vmul.f32 %v772_v16, %v694_v10  ;;  %v779_v34 = vmul.f32 %v772_v16, %v693_v12 }
  0x6a   : > { %594 = vrot.lane.b32.xlu0 %v576_v35, %s3892_s14  ;;  %v3365_v35 = vld [vmem:[%s4050_s9 + $0x58] sm:$0xff] }
  0x6b   : > { %v874_v42 = vmul.f32 %v3365_v35, %v871_v36 }
  0x71   : > { %604 = vrot.lane.b32.xlu2 %v581_v39, %s3892_s14  ;;  %602 = vrot.lane.b32.xlu1 %v580_v40, %s3892_s14  ;;  %v3363_v40 = vld [vmem:[%s4050_s9 + $0x48] sm:$0xff] }
  0x72   : > { %600 = vrot.lane.b32.xlu0 %v579_v41, %s3892_s14  ;;  %v872_v44 = vmul.f32 %v3363_v40, %v871_v36 }
  0x79   : > { %610 = vrot.lane.b32.xlu2 %v584_v45, %s3892_s14  ;;  %608 = vrot.lane.b32.xlu1 %v583_v46, %s3892_s14  ;;  %v3368_v45 = vld [vmem:[%s4050_s9 + $0x70] sm:$0xff]  ;;  %v3367_v46 = vld [vmem:[%s4050_s9 + $0x68] sm:$0xff] }
  0x7a   : > { %606 = vrot.lane.b32.xlu0 %v582_v47, %s3892_s14 }
  0x81   : > { %654 = vrot.lane.b32.xlu2 %v634_v49, %s3893_s17  ;;  %652 = vrot.lane.b32.xlu1 %v633_v50, %s3893_s17  ;;  %v3366_v49 = vld [vmem:[%s4050_s9 + $0x60] sm:$0xff] }
  0x82   : > { %650 = vrot.lane.b32.xlu0 %v632_v51, %s3893_s17  ;;  %v877_v51 = vmul.f32 %v3368_v45, %v871_v36 }
  0x89   : > { %660 = vrot.lane.b32.xlu2 %v637_v52, %s3893_s17  ;;  %658 = vrot.lane.b32.xlu1 %v636_v53, %s3893_s17  ;;  %v876_v52 = vmul.f32 %v3367_v46, %v871_v36  ;;  %v875_v53 = vmul.f32 %v3366_v49, %v871_v36 }
  0x8a   : > { %656 = vrot.lane.b32.xlu0 %v635_v54, %s3893_s17  ;;  %v3371_v54 = vld [vmem:[%s4050_s9 + $0x88] sm:$0x3] }
  0x8b   : > { %v880_v60 = vmul.f32 %v3371_v54, %v871_v36 }
  0x91   : > { %666 = vrot.lane.b32.xlu2 %v640_v55, %s3893_s17  ;;  %664 = vrot.lane.b32.xlu1 %v639_v56, %s3893_s17  ;;  %v3370_v55 = vld [vmem:[%s4050_s9 + $0x80] sm:$0xff] }
  0x92   : > { %662 = vrot.lane.b32.xlu0 %v638_v57, %s3893_s17  ;;  %v879_v62 = vmul.f32 %v3370_v55, %v871_v36 }
  0x93   : > { %v4108_v61 = vpop.permute.xlu2 %461 }
  0x99   : > { %739 = vrot.lane.b32.xlu2 %v719_v63, %s3892_s14  ;;  %737 = vrot.lane.b32.xlu1 %v718_v0, %s3892_s14  ;;  %v878_v63 = vmul.f32 %v3369_v58, %v871_v36  ;;  %v927_v0 = vstv %s3373_s16  ;;  %s3460_s16 = sld [smem:[#allocation3 + $0x13]] }
  0x9a   : > { %735 = vrot.lane.b32.xlu0 %v717_v1, %s3892_s14  ;;  %v930_v5 = vmul.f32 %v3365_v35, %v927_v0  ;;  %v933_v12 = vmul.f32 %v3368_v45, %v927_v0  ;;  %v3375_v35 = vld [vmem:[%s4050_s9 + $0x49] sm:$0xff] }
  0x9b   : > { %v4116_v4 = vpop.permute.xlu2 %463 }
  0xa1   : > { %745 = vrot.lane.b32.xlu2 %v722_v6, %s3892_s14  ;;  %743 = vrot.lane.b32.xlu1 %v721_v7, %s3892_s14  ;;  %v929_v6 = vmul.f32 %v3364_v37, %v927_v0  ;;  %v928_v7 = vmul.f32 %v3363_v40, %v927_v0 }
  0xa2   : > { %741 = vrot.lane.b32.xlu0 %v720_v8, %s3892_s14 }
  0xa3   : > { %v4124_v11 = vpop.permute.xlu2 %469 }
  0xa9   : > { %751 = vrot.lane.b32.xlu2 %v725_v13, %s3892_s14  ;;  %749 = vrot.lane.b32.xlu1 %v724_v14, %s3892_s14  ;;  %v932_v13 = vmul.f32 %v3367_v46, %v927_v0  ;;  %v931_v14 = vmul.f32 %v3366_v49, %v927_v0  ;;  %v3378_v49 = vld [vmem:[%s4050_s9 + $0x61] sm:$0xff] }
  0xaa   : > { %747 = vrot.lane.b32.xlu0 %v723_v15, %s3892_s14 }
  0xab   : > { %v4130_v17 = vpop.permute.xlu2 %513  ;;  %v4132_v18 = vpop.permute.xlu1 %457 }
  0xac   : > { %v4134_v19 = vpop.permute.xlu0 %453 }
  0xb1   : > { %795 = vrot.lane.b32.xlu2 %v775_v20, %s3893_s17  ;;  %793 = vrot.lane.b32.xlu1 %v774_v21, %s3893_s17  ;;  %v936_v21 = vmul.f32 %v3371_v54, %v927_v0 }
  0xb2   : > { %791 = vrot.lane.b32.xlu0 %v773_v22, %s3893_s17  ;;  %v935_v22 = vmul.f32 %v3370_v55, %v927_v0  ;;  %v3383_v55 = vld [vmem:[%s4050_s9 + $0x89] sm:$0x3] }
  0xb3   : > { %v4139_v23 = vpop.permute.xlu2 %519  ;;  %v4141_v24 = vpop.permute.xlu1 %459 }
  0xb4   : > { %v4143_v25 = vpop.permute.xlu0 %455 }
  0xb9   : > { %801 = vrot.lane.b32.xlu2 %v778_v26, %s3893_s17  ;;  %799 = vrot.lane.b32.xlu1 %v777_v27, %s3893_s17  ;;  %v934_v26 = vmul.f32 %v3369_v58, %v927_v0  ;;  %v3377_v27 = vld [vmem:[%s4050_s9 + $0x59] sm:$0xff]  ;;  %v3382_v58 = vld [vmem:[%s4050_s9 + $0x81] sm:$0xff] }
  0xba   : > { %797 = vrot.lane.b32.xlu0 %v776_v28, %s3893_s17  ;;  %v1012_v28 = vstv %s3384_s19  ;;  %s3461_s19 = sld [smem:[#allocation3 + $0x17]] }
  0xbb   : > { %v4148_v29 = vpop.permute.xlu2 %525  ;;  %v4150_v30 = vpop.permute.xlu1 %467  ;;  %v1015_v37 = vmul.f32 %v3377_v27, %v1012_v28  ;;  %v1016_v54 = vmul.f32 %v3378_v49, %v1012_v28 }
  0xbc   : > { %v4152_v31 = vpop.permute.xlu0 %465 }
  0xc1   : > { %807 = vrot.lane.b32.xlu2 %v781_v32, %s3893_s17  ;;  %805 = vrot.lane.b32.xlu1 %v780_v33, %s3893_s17  ;;  %v3376_v32 = vld [vmem:[%s4050_s9 + $0x51] sm:$0xff] }
  0xc2   : > { %803 = vrot.lane.b32.xlu0 %v779_v34, %s3893_s17  ;;  %v1014_v40 = vmul.f32 %v3376_v32, %v1012_v28 }
  0xc3   : > { %v4159_v38 = vpop.permute.xlu2 %598  ;;  %v4161_v39 = vpop.permute.xlu1 %511 }
  0xc4   : > { %v4164_v41 = vpop.permute.xlu0 %509 }
  0xc9   : > { %894 = vrot.lane.b32.xlu2 %v874_v42, %s3892_s14  ;;  %892 = vrot.lane.b32.xlu1 %v873_v43, %s3892_s14  ;;  %v1013_v42 = vmul.f32 %v3375_v35, %v1012_v28  ;;  %v3380_v43 = vld [vmem:[%s4050_s9 + $0x71] sm:$0xff] }
  0xca   : > { %890 = vrot.lane.b32.xlu0 %v872_v44, %s3892_s14  ;;  %v3379_v44 = vld [vmem:[%s4050_s9 + $0x69] sm:$0xff] }
  0xcb   : > { %v4171_v47 = vpop.permute.xlu2 %604  ;;  %v4173_v48 = vpop.permute.xlu1 %517 }
  0xcc   : > { %v4176_v50 = vpop.permute.xlu0 %515 }
  0xd1   : > { %900 = vrot.lane.b32.xlu2 %v877_v51, %s3892_s14  ;;  %898 = vrot.lane.b32.xlu1 %v876_v52, %s3892_s14  ;;  %v1018_v52 = vmul.f32 %v3380_v43, %v1012_v28 }
  0xd2   : > { %896 = vrot.lane.b32.xlu0 %v875_v53, %s3892_s14  ;;  %v1017_v53 = vmul.f32 %v3379_v44, %v1012_v28 }
  0xd3   : > { %v4183_v56 = vpop.permute.xlu2 %610  ;;  %v4185_v57 = vpop.permute.xlu1 %523 }
  0xd4   : > { %v4188_v59 = vpop.permute.xlu0 %521 }
  0xd9   : > { %906 = vrot.lane.b32.xlu2 %v880_v60, %s3892_s14  ;;  %904 = vrot.lane.b32.xlu1 %v879_v62, %s3892_s14 }
  0xda   : > { %902 = vrot.lane.b32.xlu0 %v878_v63, %s3892_s14  ;;  %v3381_v63 = vld [vmem:[%s4050_s9 + $0x79] sm:$0xff] }
  0xdb   : > { %v4193_v1 = vpop.permute.xlu2 %654  ;;  %v4195_v2 = vpop.permute.xlu1 %596 }
  0xdc   : > { %v4197_v3 = vpop.permute.xlu0 %594 }
  0xe1   : > { %950 = vrot.lane.b32.xlu2 %v930_v5, %s3893_s17  ;;  %948 = vrot.lane.b32.xlu1 %v929_v6, %s3893_s17  ;;  %v1021_v5 = vmul.f32 %v3383_v55, %v1012_v28  ;;  %v1020_v6 = vmul.f32 %v3382_v58, %v1012_v28 }
  0xe2   : > { %946 = vrot.lane.b32.xlu0 %v928_v7, %s3893_s17  ;;  %v1019_v7 = vmul.f32 %v3381_v63, %v1012_v28 }
  0xe3   : > { %v4202_v8 = vpop.permute.xlu2 %660  ;;  %v4204_v9 = vpop.permute.xlu1 %602 }
  0xe4   : > { %v4206_v10 = vpop.permute.xlu0 %600 }
  0xe9   : > { %956 = vrot.lane.b32.xlu2 %v933_v12, %s3893_s17  ;;  %954 = vrot.lane.b32.xlu1 %v932_v13, %s3893_s17  ;;  %v1068_v12 = vstv %s3385_s1  ;;  %s3472_s1 = sld [smem:[#allocation3 + $0x1f]] }
  0xea   : > { %952 = vrot.lane.b32.xlu0 %v931_v14, %s3893_s17 }
  0xeb   : > { %v4211_v15 = vpop.permute.xlu2 %666  ;;  %v4213_v16 = vpop.permute.xlu1 %608 }
  0xec   : > { %v4215_v20 = vpop.permute.xlu0 %606 }
  0xf1   : > { %962 = vrot.lane.b32.xlu2 %v936_v21, %s3893_s17  ;;  %960 = vrot.lane.b32.xlu1 %v935_v22, %s3893_s17  ;;  %v1071_v22 = vmul.f32 %v3377_v27, %v1068_v12 }
  0xf2   : > { %958 = vrot.lane.b32.xlu0 %v934_v26, %s3893_s17  ;;  %v1070_v26 = vmul.f32 %v3376_v32, %v1068_v12 }
  0xf3   : > { %v4222_v33 = vpop.permute.xlu2 %739  ;;  %v4224_v34 = vpop.permute.xlu1 %652 }
  0xf4   : > { %6516 = vst [vmem:[#allocation20_spill] sm:$0xff] %v4222_v33  ;;  %v4227_v36 = vpop.permute.xlu0 %650  ;;  %v3635_v33 = vld [vmem:[%s4050_s9 + $0x11] sm:$0xff] }
  0xf9   : > { %1035 = vrot.lane.b32.xlu2 %v1015_v37, %s3892_s14  ;;  %1033 = vrot.lane.b32.xlu1 %v1014_v40, %s3892_s14  ;;  %v1069_v37 = vmul.f32 %v3375_v35, %v1068_v12 }
  0xfa   : > { %1031 = vrot.lane.b32.xlu0 %v1013_v42, %s3892_s14 }
  0xfb   : > { %v4234_v45 = vpop.permute.xlu2 %745  ;;  %v4236_v46 = vpop.permute.xlu1 %658 }
  0xfc   : > { %6517 = vst [vmem:[#allocation21_spill] sm:$0xff] %v4234_v45  ;;  %v4239_v51 = vpop.permute.xlu0 %656 }
  0xfd   : > { %6518 = vst [vmem:[#allocation22_spill] sm:$0xff] %v4236_v46 }
  0xfe   : > { %6519 = vst [vmem:[#allocation23_spill] sm:$0xff] %v4239_v51 }
 0x101   : > { %1041 = vrot.lane.b32.xlu2 %v1018_v52, %s3892_s14  ;;  %1039 = vrot.lane.b32.xlu1 %v1017_v53, %s3892_s14  ;;  %v1074_v52 = vmul.f32 %v3380_v43, %v1068_v12  ;;  %v1073_v53 = vmul.f32 %v3379_v44, %v1068_v12  ;;  %v1076_v43 = vmul.f32 %v3382_v58, %v1068_v12  ;;  %v3389_v44 = vld [vmem:[%s4050_s9 + $0x5a] sm:$0xff] }
 0x102   : > { %1037 = vrot.lane.b32.xlu0 %v1016_v54, %s3892_s14  ;;  %v1072_v54 = vmul.f32 %v3378_v49, %v1068_v12  ;;  %v1153_v49 = vstv %s3396_s2  ;;  %s413_s2 = sld [smem:[#allocation3]] }
 0x103   : > { %v4246_v60 = vpop.permute.xlu2 %751  ;;  %v4248_v62 = vpop.permute.xlu1 %664  ;;  %v1156_v58 = vmul.f32 %v3389_v44, %v1153_v49 }
 0x104   : > { %6520 = vst [vmem:[#allocation24_spill] sm:$0xff] %v4246_v60  ;;  %v4251_v0 = vpop.permute.xlu0 %662  ;;  %v3631_v60 = vld [vmem:[%s4050_s9] sm:$0xff] }
 0x105   : > { %6521 = vst [vmem:[#allocation25_spill] sm:$0xff] %v4248_v62 }
 0x106   : > { %6522 = vst [vmem:[#allocation26_spill] sm:$0xff] %v4251_v0 }
 0x109   : > { %1047 = vrot.lane.b32.xlu2 %v1021_v5, %s3892_s14  ;;  %1045 = vrot.lane.b32.xlu1 %v1020_v6, %s3892_s14  ;;  %v1077_v5 = vmul.f32 %v3383_v55, %v1068_v12  ;;  %v1075_v6 = vmul.f32 %v3381_v63, %v1068_v12 }
 0x10a   : > { %1043 = vrot.lane.b32.xlu0 %v1019_v7, %s3892_s14  ;;  %v3388_v7 = vld [vmem:[%s4050_s9 + $0x52] sm:$0xff] }
 0x10b   : > { %v4256_v13 = vpop.permute.xlu2 %795  ;;  %v4258_v14 = vpop.permute.xlu1 %737  ;;  %v1155_v63 = vmul.f32 %v3388_v7, %v1153_v49 }
 0x10c   : > { %6523 = vst [vmem:[#allocation27_spill] sm:$0xff] %v4256_v13  ;;  %v4260_v21 = vpop.permute.xlu0 %735 }
 0x10d   : > { %6524 = vst [vmem:[#allocation28_spill] sm:$0xff] %v4258_v14 }
 0x10e   : > { %6525 = vst [vmem:[#allocation29_spill] sm:$0xff] %v4260_v21 }
 0x111   : > { %1091 = vrot.lane.b32.xlu2 %v1071_v22, %s3893_s17  ;;  %1089 = vrot.lane.b32.xlu1 %v1070_v26, %s3893_s17 }
 0x112   : > { %1087 = vrot.lane.b32.xlu0 %v1069_v37, %s3893_s17  ;;  %v3387_v37 = vld [vmem:[%s4050_s9 + $0x4a] sm:$0xff] }
 0x113   : > { %v4265_v28 = vpop.permute.xlu2 %801  ;;  %v4267_v40 = vpop.permute.xlu1 %743  ;;  %v1154_v12 = vmul.f32 %v3387_v37, %v1153_v49 }
 0x114   : > { %6526 = vst [vmem:[#allocation30_spill] sm:$0xff] %v4265_v28  ;;  %v4269_v42 = vpop.permute.xlu0 %741 }
 0x115   : > { %6527 = vst [vmem:[#allocation31_spill] sm:$0xff] %v4267_v40 }
 0x116   : > { %6528 = vst [vmem:[#allocation32_spill] sm:$0xff] %v4269_v42 }
 0x119   : > { %1097 = vrot.lane.b32.xlu2 %v1074_v52, %s3893_s17  ;;  %1095 = vrot.lane.b32.xlu1 %v1073_v53, %s3893_s17  ;;  %v3392_v52 = vld [vmem:[%s4050_s9 + $0x72] sm:$0xff]  ;;  %v3391_v53 = vld [vmem:[%s4050_s9 + $0x6a] sm:$0xff] }
 0x11a   : > { %1093 = vrot.lane.b32.xlu0 %v1072_v54, %s3893_s17 }
 0x11b   : > { %v4274_v27 = vpop.permute.xlu2 %807  ;;  %v4276_v32 = vpop.permute.xlu1 %749 }
 0x11c   : > { %6529 = vst [vmem:[#allocation33_spill] sm:$0xff] %v4274_v27  ;;  %v4278_v35 = vpop.permute.xlu0 %747 }
 0x11d   : > { %6530 = vst [vmem:[#allocation34_spill] sm:$0xff] %v4276_v32 }
 0x11e   : > { %6531 = vst [vmem:[#allocation35_spill] sm:$0xff] %v4278_v35  ;;  %v1158_v35 = vmul.f32 %v3391_v53, %v1153_v49 }
 0x121   : > { %1103 = vrot.lane.b32.xlu2 %v1077_v5, %s3893_s17  ;;  %1101 = vrot.lane.b32.xlu1 %v1076_v43, %s3893_s17  ;;  %v3390_v43 = vld [vmem:[%s4050_s9 + $0x62] sm:$0xff] }
 0x122   : > { %1099 = vrot.lane.b32.xlu0 %v1075_v6, %s3893_s17  ;;  %v1157_v32 = vmul.f32 %v3390_v43, %v1153_v49 }
 0x123   : > { %v4285_v22 = vpop.permute.xlu2 %894  ;;  %v4287_v26 = vpop.permute.xlu1 %793 }
 0x124   : > { %6532 = vst [vmem:[#allocation36_spill] sm:$0xff] %v4285_v22  ;;  %v4290_v55 = vpop.permute.xlu0 %791  ;;  %v1159_v22 = vmul.f32 %v3392_v52, %v1153_v49 }
 0x125   : > { %6533 = vst [vmem:[#allocation37_spill] sm:$0xff] %v4287_v26 }
 0x126   : > { %6534 = vst [vmem:[#allocation38_spill] sm:$0xff] %v4290_v55 }
 0x129   : > { %1176 = vrot.lane.b32.xlu2 %v1156_v58, %s3892_s14  ;;  %1174 = vrot.lane.b32.xlu1 %v1155_v63, %s3892_s14  ;;  %v3395_v58 = vld [vmem:[%s4050_s9 + $0x8a] sm:$0x3]  ;;  %v3394_v63 = vld [vmem:[%s4050_s9 + $0x82] sm:$0xff] }
 0x12a   : > { %1172 = vrot.lane.b32.xlu0 %v1154_v12, %s3892_s14  ;;  %v1161_v26 = vmul.f32 %v3394_v63, %v1153_v49 }
 0x12b   : > { %v4297_v54 = vpop.permute.xlu2 %900  ;;  %v4299_v5 = vpop.permute.xlu1 %799 }
 0x12c   : > { %6535 = vst [vmem:[#allocation39_spill] sm:$0xff] %v4297_v54  ;;  %v4302_v6 = vpop.permute.xlu0 %797 }
 0x12d   : > { %6536 = vst [vmem:[#allocation40_spill] sm:$0xff] %v4299_v5  ;;  %v3393_v5 = vld [vmem:[%s4050_s9 + $0x7a] sm:$0xff] }
 0x12e   : > { %6537 = vst [vmem:[#allocation41_spill] sm:$0xff] %v4302_v6  ;;  %v1162_v6 = vmul.f32 %v3395_v58, %v1153_v49  ;;  %v1160_v42 = vmul.f32 %v3393_v5, %v1153_v49 }
 0x131   : > { %1182 = vrot.lane.b32.xlu2 %v1159_v22, %s3892_s14  ;;  %1180 = vrot.lane.b32.xlu1 %v1158_v35, %s3892_s14 }
 0x132   : > { %1178 = vrot.lane.b32.xlu0 %v1157_v32, %s3892_s14  ;;  %v1209_v32 = vstv %s3397_s13  ;;  %s3355_s13 = sld [smem:[#allocation3 + $0xc]] }
 0x133   : > { %v4309_v12 = vpop.permute.xlu2 %906  ;;  %v4311_v54 = vpop.permute.xlu1 %805  ;;  %v1211_v40 = vmul.f32 %v3388_v7, %v1209_v32  ;;  %v1210_v27 = vmul.f32 %v3387_v37, %v1209_v32  ;;  %v1218_v7 = vmul.f32 %v3395_v58, %v1209_v32  ;;  %v1217_v37 = vmul.f32 %v3394_v63, %v1209_v32 }
 0x134   : > { %6538 = vst [vmem:[#allocation42_spill] sm:$0xff] %v4309_v12  ;;  %v4314_v55 = vpop.permute.xlu0 %803 }
 0x135   : > { %6539 = vst [vmem:[#allocation43_spill] sm:$0xff] %v4311_v54  ;;  %v1212_v54 = vmul.f32 %v3389_v44, %v1209_v32 }
 0x136   : > { %6540 = vst [vmem:[#allocation44_spill] sm:$0xff] %v4314_v55 }
 0x139   : > { %1188 = vrot.lane.b32.xlu2 %v1162_v6, %s3892_s14  ;;  %1186 = vrot.lane.b32.xlu1 %v1161_v26, %s3892_s14  ;;  %v1215_v6 = vmul.f32 %v3392_v52, %v1209_v32  ;;  %v1216_v52 = vmul.f32 %v3393_v5, %v1209_v32 }
 0x13a   : > { %1184 = vrot.lane.b32.xlu0 %v1160_v42, %s3892_s14 }
 0x13b   : > { %v4319_v35 = vpop.permute.xlu2 %950  ;;  %v4321_v22 = vpop.permute.xlu1 %892 }
 0x13c   : > { %6541 = vst [vmem:[#allocation45_spill] sm:$0xff] %v4319_v35  ;;  %v4323_v12 = vpop.permute.xlu0 %890  ;;  %v1213_v35 = vmul.f32 %v3390_v43, %v1209_v32  ;;  %v3402_v43 = vld [vmem:[%s4050_s9 + $0x98] sm:$0xff] }
 0x13d   : > { %6542 = vst [vmem:[#allocation46_spill] sm:$0xff] %v4321_v22  ;;  %v1214_v22 = vmul.f32 %v3391_v53, %v1209_v32  ;;  %v3403_v53 = vld [vmem:[%s4050_s9 + $0xa0] sm:$0xff] }
 0x13e   : > { %6543 = vst [vmem:[#allocation47_spill] sm:$0xff] %v4323_v12 }
 0x141   : > { %1232 = vrot.lane.b32.xlu2 %v1212_v54, %s3893_s17  ;;  %1230 = vrot.lane.b32.xlu1 %v1211_v40, %s3893_s17  ;;  %v1326_v54 = vstv %s3410_s20  ;;  %s4782_s20 = sld [smem:[#allocation3 + $0x18]] }
 0x142   : > { %1228 = vrot.lane.b32.xlu0 %v1210_v27, %s3893_s17  ;;  %v1329_v5 = vmul.f32 %v3403_v53, %v1326_v54  ;;  %v1328_v63 = vmul.f32 %v3402_v43, %v1326_v54 }
 0x143   : > { %v4328_v49 = vpop.permute.xlu2 %956  ;;  %v4330_v26 = vpop.permute.xlu1 %898 }
 0x144   : > { %6544 = vst [vmem:[#allocation48_spill] sm:$0xff] %v4328_v49  ;;  %v4332_v42 = vpop.permute.xlu0 %896 }
 0x145   : > { %6545 = vst [vmem:[#allocation49_spill] sm:$0xff] %v4330_v26 }
 0x146   : > { %6546 = vst [vmem:[#allocation50_spill] sm:$0xff] %v4332_v42 }
 0x149   : > { %1238 = vrot.lane.b32.xlu2 %v1215_v6, %s3893_s17  ;;  %1236 = vrot.lane.b32.xlu1 %v1214_v22, %s3893_s17  ;;  %v3401_v6 = vld [vmem:[%s4050_s9 + $0x90] sm:$0xff] }
 0x14a   : > { %1234 = vrot.lane.b32.xlu0 %v1213_v35, %s3893_s17  ;;  %v1327_v32 = vmul.f32 %v3401_v6, %v1326_v54 }
 0x14b   : > { %v4337_v40 = vpop.permute.xlu2 %962  ;;  %v4339_v27 = vpop.permute.xlu1 %904 }
 0x14c   : > { %6547 = vst [vmem:[#allocation51_spill] sm:$0xff] %v4337_v40  ;;  %v4341_v44 = vpop.permute.xlu0 %902 }
 0x14d   : > { %6548 = vst [vmem:[#allocation52_spill] sm:$0xff] %v4339_v27 }
 0x14e   : > { %6549 = vst [vmem:[#allocation53_spill] sm:$0xff] %v4341_v44 }
 0x151   : > { %1244 = vrot.lane.b32.xlu2 %v1218_v7, %s3893_s17  ;;  %1242 = vrot.lane.b32.xlu1 %v1217_v37, %s3893_s17  ;;  %v3406_v7 = vld [vmem:[%s4050_s9 + $0xb8] sm:$0xff]  ;;  %v3405_v37 = vld [vmem:[%s4050_s9 + $0xb0] sm:$0xff] }
 0x152   : > { %1240 = vrot.lane.b32.xlu0 %v1216_v52, %s3893_s17  ;;  %v1332_v44 = vmul.f32 %v3406_v7, %v1326_v54  ;;  %v1331_v27 = vmul.f32 %v3405_v37, %v1326_v54 }
 0x153   : > { %v4348_v35 = vpop.permute.xlu2 %1035  ;;  %v4350_v22 = vpop.permute.xlu1 %948 }
 0x154   : > { %6550 = vst [vmem:[#allocation54_spill] sm:$0xff] %v4348_v35  ;;  %v4353_v58 = vpop.permute.xlu0 %946 }
 0x155   : > { %6551 = vst [vmem:[#allocation55_spill] sm:$0xff] %v4350_v22  ;;  %v3404_v22 = vld [vmem:[%s4050_s9 + $0xa8] sm:$0xff] }
 0x156   : > { %6552 = vst [vmem:[#allocation56_spill] sm:$0xff] %v4353_v58  ;;  %v1330_v42 = vmul.f32 %v3404_v22, %v1326_v54 }
 0x159   : > { %1349 = vrot.lane.b32.xlu2 %v1329_v5, %s3892_s14  ;;  %1347 = vrot.lane.b32.xlu1 %v1328_v63, %s3892_s14  ;;  %v3409_v5 = vld [vmem:[%s4050_s9 + $0xd0] sm:$0x3]  ;;  %v3408_v63 = vld [vmem:[%s4050_s9 + $0xc8] sm:$0xff] }
 0x15a   : > { %1345 = vrot.lane.b32.xlu0 %v1327_v32, %s3892_s14  ;;  %v1334_v26 = vmul.f32 %v3408_v63, %v1326_v54 }
 0x15b   : > { %v4360_v52 = vpop.permute.xlu2 %1041  ;;  %v4362_v35 = vpop.permute.xlu1 %954 }
 0x15c   : > { %6553 = vst [vmem:[#allocation57_spill] sm:$0xff] %v4360_v52  ;;  %v4365_v58 = vpop.permute.xlu0 %952 }
 0x15d   : > { %6554 = vst [vmem:[#allocation58_spill] sm:$0xff] %v4362_v35  ;;  %v3407_v35 = vld [vmem:[%s4050_s9 + $0xc0] sm:$0xff] }
 0x15e   : > { %6555 = vst [vmem:[#allocation59_spill] sm:$0xff] %v4365_v58  ;;  %v1335_v58 = vmul.f32 %v3409_v5, %v1326_v54  ;;  %v1333_v49 = vmul.f32 %v3407_v35, %v1326_v54 }
 0x161   : > { %1355 = vrot.lane.b32.xlu2 %v1332_v44, %s3892_s14  ;;  %1353 = vrot.lane.b32.xlu1 %v1331_v27, %s3892_s14 }
 0x162   : > { %1351 = vrot.lane.b32.xlu0 %v1330_v42, %s3892_s14  ;;  %v1382_v42 = vstv %s3411_s23  ;;  %s4804_s23 = sld [smem:[#allocation3 + $0x23]] }
 0x163   : > { %v4372_v32 = vpop.permute.xlu2 %1047  ;;  %v4374_v52 = vpop.permute.xlu1 %960  ;;  %v1384_v12 = vmul.f32 %v3402_v43, %v1382_v42  ;;  %v1383_v55 = vmul.f32 %v3401_v6, %v1382_v42  ;;  %v1391_v43 = vmul.f32 %v3409_v5, %v1382_v42  ;;  %v1390_v6 = vmul.f32 %v3408_v63, %v1382_v42 }
 0x164   : > { %6556 = vst [vmem:[#allocation60_spill] sm:$0xff] %v4372_v32  ;;  %v4377_v40 = vpop.permute.xlu0 %958 }
 0x165   : > { %6557 = vst [vmem:[#allocation61_spill] sm:$0xff] %v4374_v52  ;;  %v1385_v52 = vmul.f32 %v3403_v53, %v1382_v42 }
 0x166   : > { %6558 = vst [vmem:[#allocation62_spill] sm:$0xff] %v4377_v40 }
 0x169   : > { %1361 = vrot.lane.b32.xlu2 %v1335_v58, %s3892_s14  ;;  %1359 = vrot.lane.b32.xlu1 %v1334_v26, %s3892_s14  ;;  %v1388_v58 = vmul.f32 %v3406_v7, %v1382_v42  ;;  %v1389_v7 = vmul.f32 %v3407_v35, %v1382_v42 }
 0x16a   : > { %1357 = vrot.lane.b32.xlu0 %v1333_v49, %s3892_s14 }
 0x16b   : > { %v4382_v27 = vpop.permute.xlu2 %1091  ;;  %v4384_v44 = vpop.permute.xlu1 %1033 }
 0x16c   : > { %6559 = vst [vmem:[#allocation63_spill] sm:$0xff] %v4382_v27  ;;  %v4386_v32 = vpop.permute.xlu0 %1031  ;;  %v1386_v27 = vmul.f32 %v3404_v22, %v1382_v42  ;;  %v3415_v22 = vld [vmem:[%s4050_s9 + $0xa1] sm:$0xff] }
 0x16d   : > { %6560 = vst [vmem:[#allocation64_spill] sm:$0xff] %v4384_v44  ;;  %v1387_v44 = vmul.f32 %v3405_v37, %v1382_v42  ;;  %v1467_v37 = vstv %s3422_s15  ;;  %s4810_s15 = sld [smem:[#allocation3 + $0x3]] }
 0x16e   : > { %6561 = vst [vmem:[#allocation65_spill] sm:$0xff] %v4386_v32  ;;  %v1470_v35 = vmul.f32 %v3415_v22, %v1467_v37 }
 0x171   : > { %1405 = vrot.lane.b32.xlu2 %v1385_v52, %s3893_s17  ;;  %1403 = vrot.lane.b32.xlu1 %v1384_v12, %s3893_s17  ;;  %v3414_v52 = vld [vmem:[%s4050_s9 + $0x99] sm:$0xff] }
 0x172   : > { %1401 = vrot.lane.b32.xlu0 %v1383_v55, %s3893_s17  ;;  %v1469_v63 = vmul.f32 %v3414_v52, %v1467_v37 }
 0x173   : > { %v4391_v54 = vpop.permute.xlu2 %1097  ;;  %v4393_v26 = vpop.permute.xlu1 %1039 }
 0x174   : > { %6562 = vst [vmem:[#allocation66_spill] sm:$0xff] %v4391_v54  ;;  %v4395_v49 = vpop.permute.xlu0 %1037 }
 0x175   : > { %6563 = vst [vmem:[#allocation67_spill] sm:$0xff] %v4393_v26 }
 0x176   : > { %6564 = vst [vmem:[#allocation68_spill] sm:$0xff] %v4395_v49 }
 0x179   : > { %1411 = vrot.lane.b32.xlu2 %v1388_v58, %s3893_s17  ;;  %1409 = vrot.lane.b32.xlu1 %v1387_v44, %s3893_s17  ;;  %v3413_v58 = vld [vmem:[%s4050_s9 + $0x91] sm:$0xff] }
 0x17a   : > { %1407 = vrot.lane.b32.xlu0 %v1386_v27, %s3893_s17  ;;  %v1468_v42 = vmul.f32 %v3413_v58, %v1467_v37 }
 0x17b   : > { %v4400_v55 = vpop.permute.xlu2 %1103  ;;  %v4402_v12 = vpop.permute.xlu1 %1045 }
 0x17c   : > { %6565 = vst [vmem:[#allocation69_spill] sm:$0xff] %v4400_v55  ;;  %v4404_v53 = vpop.permute.xlu0 %1043 }
 0x17d   : > { %6566 = vst [vmem:[#allocation70_spill] sm:$0xff] %v4402_v12  ;;  %v3416_v12 = vld [vmem:[%s4050_s9 + $0xa9] sm:$0xff] }
 0x17e   : > { %6567 = vst [vmem:[#allocation71_spill] sm:$0xff] %v4404_v53  ;;  %v1471_v55 = vmul.f32 %v3416_v12, %v1467_v37 }
 0x181   : > { %1417 = vrot.lane.b32.xlu2 %v1391_v43, %s3893_s17  ;;  %1415 = vrot.lane.b32.xlu1 %v1390_v6, %s3893_s17  ;;  %v3418_v43 = vld [vmem:[%s4050_s9 + $0xb9] sm:$0xff]  ;;  %v3417_v6 = vld [vmem:[%s4050_s9 + $0xb1] sm:$0xff] }
 0x182   : > { %1413 = vrot.lane.b32.xlu0 %v1389_v7, %s3893_s17 }
 0x183   : > { %v4411_v27 = vpop.permute.xlu2 %1176  ;;  %v4413_v44 = vpop.permute.xlu1 %1089 }
 0x184   : > { %6568 = vst [vmem:[#allocation72_spill] sm:$0xff] %v4411_v27  ;;  %v4416_v5 = vpop.permute.xlu0 %1087  ;;  %v1473_v27 = vmul.f32 %v3418_v43, %v1467_v37 }
 0x185   : > { %6569 = vst [vmem:[#allocation73_spill] sm:$0xff] %v4413_v44  ;;  %v1472_v44 = vmul.f32 %v3417_v6, %v1467_v37 }
 0x186   : > { %6570 = vst [vmem:[#allocation74_spill] sm:$0xff] %v4416_v5 }
 0x189   : > { %1490 = vrot.lane.b32.xlu2 %v1470_v35, %s3892_s14  ;;  %1488 = vrot.lane.b32.xlu1 %v1469_v63, %s3892_s14  ;;  %v3421_v35 = vld [vmem:[%s4050_s9 + $0xd1] sm:$0x3]  ;;  %v3420_v63 = vld [vmem:[%s4050_s9 + $0xc9] sm:$0xff] }
 0x18a   : > { %1486 = vrot.lane.b32.xlu0 %v1468_v42, %s3892_s14  ;;  %v1475_v26 = vmul.f32 %v3420_v63, %v1467_v37 }
 0x18b   : > { %v4423_v7 = vpop.permute.xlu2 %1182  ;;  %v4425_v53 = vpop.permute.xlu1 %1095 }
 0x18c   : > { %6571 = vst [vmem:[#allocation75_spill] sm:$0xff] %v4423_v7  ;;  %v4428_v5 = vpop.permute.xlu0 %1093 }
 0x18d   : > { %6572 = vst [vmem:[#allocation76_spill] sm:$0xff] %v4425_v53  ;;  %v3419_v53 = vld [vmem:[%s4050_s9 + $0xc1] sm:$0xff] }
 0x18e   : > { %6573 = vst [vmem:[#allocation77_spill] sm:$0xff] %v4428_v5  ;;  %v1476_v5 = vmul.f32 %v3421_v35, %v1467_v37  ;;  %v1474_v32 = vmul.f32 %v3419_v53, %v1467_v37 }
 0x191   : > { %1496 = vrot.lane.b32.xlu2 %v1473_v27, %s3892_s14  ;;  %1494 = vrot.lane.b32.xlu1 %v1472_v44, %s3892_s14 }
 0x192   : > { %1492 = vrot.lane.b32.xlu0 %v1471_v55, %s3892_s14  ;;  %v1523_v55 = vstv %s3423_s18  ;;  %s4880_s18 = sld [smem:[#allocation6]] }
 0x193   : > { %v4435_v42 = vpop.permute.xlu2 %1188  ;;  %v4437_v7 = vpop.permute.xlu1 %1101  ;;  %v1525_v54 = vmul.f32 %v3414_v52, %v1523_v55  ;;  %v1524_v40 = vmul.f32 %v3413_v58, %v1523_v55  ;;  %v1532_v52 = vmul.f32 %v3421_v35, %v1523_v55  ;;  %v1531_v58 = vmul.f32 %v3420_v63, %v1523_v55 }
 0x194   : > { %6574 = vst [vmem:[#allocation78_spill] sm:$0xff] %v4435_v42  ;;  %v4440_v49 = vpop.permute.xlu0 %1099 }
 0x195   : > { %6575 = vst [vmem:[#allocation79_spill] sm:$0xff] %v4437_v7  ;;  %v1526_v7 = vmul.f32 %v3415_v22, %v1523_v55 }
 0x196   : > { %6576 = vst [vmem:[#allocation80_spill] sm:$0xff] %v4440_v49  ;;  %v1527_v49 = vmul.f32 %v3416_v12, %v1523_v55  ;;  %v1608_v12 = vstv %s3434_s21  ;;  %s4885_s21 = sld [smem:[#allocation6 + $0x1]] }
 0x199   : > { %1502 = vrot.lane.b32.xlu2 %v1476_v5, %s3892_s14  ;;  %1500 = vrot.lane.b32.xlu1 %v1475_v26, %s3892_s14  ;;  %v1529_v5 = vmul.f32 %v3418_v43, %v1523_v55  ;;  %v1530_v43 = vmul.f32 %v3419_v53, %v1523_v55 }
 0x19a   : > { %1498 = vrot.lane.b32.xlu0 %v1474_v32, %s3892_s14 }
 0x19b   : > { %v4445_v27 = vpop.permute.xlu2 %1232  ;;  %v4447_v44 = vpop.permute.xlu1 %1174 }
 0x19c   : > { %6577 = vst [vmem:[#allocation81_spill] sm:$0xff] %v4445_v27  ;;  %v4449_v42 = vpop.permute.xlu0 %1172 }
 0x19d   : > { %6578 = vst [vmem:[#allocation82_spill] sm:$0xff] %v4447_v44  ;;  %v1528_v44 = vmul.f32 %v3417_v6, %v1523_v55  ;;  %v3426_v6 = vld [vmem:[%s4050_s9 + $0x9a] sm:$0xff] }
 0x19e   : > { %6579 = vst [vmem:[#allocation83_spill] sm:$0xff] %v4449_v42  ;;  %v1610_v63 = vmul.f32 %v3426_v6, %v1608_v12 }
 0x1a1   : > { %1546 = vrot.lane.b32.xlu2 %v1526_v7, %s3893_s17  ;;  %1544 = vrot.lane.b32.xlu1 %v1525_v54, %s3893_s17 }
 0x1a2   : > { %1542 = vrot.lane.b32.xlu0 %v1524_v40, %s3893_s17 }
 0x1a3   : > { %v4454_v37 = vpop.permute.xlu2 %1238  ;;  %v4456_v26 = vpop.permute.xlu1 %1180 }
 0x1a4   : > { %6580 = vst [vmem:[#allocation84_spill] sm:$0xff] %v4454_v37  ;;  %v4458_v32 = vpop.permute.xlu0 %1178 }
 0x1a5   : > { %6581 = vst [vmem:[#allocation85_spill] sm:$0xff] %v4456_v26 }
 0x1a6   : > { %6582 = vst [vmem:[#allocation86_spill] sm:$0xff] %v4458_v32 }
 0x1a9   : > { %1552 = vrot.lane.b32.xlu2 %v1529_v5, %s3893_s17  ;;  %1550 = vrot.lane.b32.xlu1 %v1528_v44, %s3893_s17  ;;  %v3425_v5 = vld [vmem:[%s4050_s9 + $0x92] sm:$0xff] }
 0x1aa   : > { %1548 = vrot.lane.b32.xlu0 %v1527_v49, %s3893_s17  ;;  %v3427_v49 = vld [vmem:[%s4050_s9 + $0xa2] sm:$0xff]  ;;  %v1609_v55 = vmul.f32 %v3425_v5, %v1608_v12 }
 0x1ab   : > { %v4463_v40 = vpop.permute.xlu2 %1244  ;;  %v4465_v54 = vpop.permute.xlu1 %1186  ;;  %v1611_v53 = vmul.f32 %v3427_v49, %v1608_v12 }
 0x1ac   : > { %6583 = vst [vmem:[#allocation87_spill] sm:$0xff] %v4463_v40  ;;  %v4467_v22 = vpop.permute.xlu0 %1184 }
 0x1ad   : > { %6584 = vst [vmem:[#allocation88_spill] sm:$0xff] %v4465_v54 }
 0x1ae   : > { %6585 = vst [vmem:[#allocation89_spill] sm:$0xff] %v4467_v22  ;;  %v3428_v22 = vld [vmem:[%s4050_s9 + $0xaa] sm:$0xff] }
 0x1af   : > { %v1612_v26 = vmul.f32 %v3428_v22, %v1608_v12 }
 0x1b1   : > { %1558 = vrot.lane.b32.xlu2 %v1532_v52, %s3893_s17  ;;  %1556 = vrot.lane.b32.xlu1 %v1531_v58, %s3893_s17  ;;  %v3430_v52 = vld [vmem:[%s4050_s9 + $0xba] sm:$0xff]  ;;  %v3429_v58 = vld [vmem:[%s4050_s9 + $0xb2] sm:$0xff] }
 0x1b2   : > { %1554 = vrot.lane.b32.xlu0 %v1530_v43, %s3893_s17  ;;  %v1613_v32 = vmul.f32 %v3429_v58, %v1608_v12 }
 0x1b3   : > { %v4474_v7 = vpop.permute.xlu2 %1349  ;;  %v4476_v44 = vpop.permute.xlu1 %1230 }
 0x1b4   : > { %6586 = vst [vmem:[#allocation90_spill] sm:$0xff] %v4474_v7  ;;  %v4479_v35 = vpop.permute.xlu0 %1228 }
 0x1b5   : > { %6587 = vst [vmem:[#allocation91_spill] sm:$0xff] %v4476_v44 }
 0x1b6   : > { %6588 = vst [vmem:[#allocation92_spill] sm:$0xff] %v4479_v35  ;;  %v1614_v35 = vmul.f32 %v3430_v52, %v1608_v12 }
 0x1b9   : > { %1631 = vrot.lane.b32.xlu2 %v1611_v53, %s3892_s14  ;;  %1629 = vrot.lane.b32.xlu1 %v1610_v63, %s3892_s14  ;;  %v3433_v53 = vld [vmem:[%s4050_s9 + $0xd2] sm:$0x3]  ;;  %v3432_v63 = vld [vmem:[%s4050_s9 + $0xca] sm:$0xff] }
 0x1ba   : > { %1627 = vrot.lane.b32.xlu0 %v1609_v55, %s3892_s14  ;;  %v1616_v42 = vmul.f32 %v3432_v63, %v1608_v12 }
 0x1bb   : > { %v4486_v43 = vpop.permute.xlu2 %1355  ;;  %v4488_v7 = vpop.permute.xlu1 %1236 }
 0x1bc   : > { %6589 = vst [vmem:[#allocation93_spill] sm:$0xff] %v4486_v43  ;;  %v4491_v54 = vpop.permute.xlu0 %1234 }
 0x1bd   : > { %6590 = vst [vmem:[#allocation94_spill] sm:$0xff] %v4488_v7  ;;  %v3431_v7 = vld [vmem:[%s4050_s9 + $0xc2] sm:$0xff] }
 0x1be   : > { %6591 = vst [vmem:[#allocation95_spill] sm:$0xff] %v4491_v54  ;;  %v1617_v54 = vmul.f32 %v3433_v53, %v1608_v12  ;;  %v1615_v40 = vmul.f32 %v3431_v7, %v1608_v12 }
 0x1c1   : > { %1637 = vrot.lane.b32.xlu2 %v1614_v35, %s3892_s14  ;;  %1635 = vrot.lane.b32.xlu1 %v1613_v32, %s3892_s14 }
 0x1c2   : > { %1633 = vrot.lane.b32.xlu0 %v1612_v26, %s3892_s14  ;;  %v1664_v26 = vstv %s3435_s22  ;;  %s4898_s22 = sld [smem:[#allocation3 + $0x1]] }
 0x1c3   : > { %v4498_v55 = vpop.permute.xlu2 %1361  ;;  %v4500_v43 = vpop.permute.xlu1 %1242  ;;  %v1666_v37 = vmul.f32 %v3426_v6, %v1664_v26  ;;  %v1665_v27 = vmul.f32 %v3425_v5, %v1664_v26  ;;  %v1670_v12 = vmul.f32 %v3430_v52, %v1664_v26  ;;  %v1673_v6 = vmul.f32 %v3433_v53, %v1664_v26  ;;  %v4546_v53 = vld [vmem:[%s4050_s9 + $0xd8] sm:$0xff] }
 0x1c4   : > { %6592 = vst [vmem:[#allocation96_spill] sm:$0xff] %v4498_v55  ;;  %v4503_v44 = vpop.permute.xlu0 %1240  ;;  %v1672_v5 = vmul.f32 %v3432_v63, %v1664_v26  ;;  %v1671_v52 = vmul.f32 %v3431_v7, %v1664_v26 }
 0x1c5   : > { %6593 = vst [vmem:[#allocation97_spill] sm:$0xff] %v4500_v43  ;;  %v1667_v43 = vmul.f32 %v3427_v49, %v1664_v26 }
 0x1c6   : > { %6594 = vst [vmem:[#allocation98_spill] sm:$0xff] %v4503_v44  ;;  %v4666_v44 = vld [vmem:[%s4050_s9 + $0xf1] sm:$0xff] }
 0x1c7   : > { %6607 = vst [vmem:[#allocation111_spill] sm:$0xff] %v4546_v53 }
 0x1c8   : > { %6638 = vst [vmem:[#allocation142_spill] sm:$0xff] %v4666_v44 }
 0x1c9   : > { %1643 = vrot.lane.b32.xlu2 %v1617_v54, %s3892_s14  ;;  %1641 = vrot.lane.b32.xlu1 %v1616_v42, %s3892_s14 }
 0x1ca   : > { %1639 = vrot.lane.b32.xlu0 %v1615_v40, %s3892_s14 }
 0x1cb   : > { %v4508_v32 = vpop.permute.xlu2 %1405  ;;  %v4510_v35 = vpop.permute.xlu1 %1347 }
 0x1cc   : > { %6595 = vst [vmem:[#allocation99_spill] sm:$0xff] %v4508_v32  ;;  %v4512_v55 = vpop.permute.xlu0 %1345  ;;  %v1668_v32 = vmul.f32 %v3428_v22, %v1664_v26  ;;  %v4536_v22 = vld [vmem:[%s4050_s9 + $0xe8] sm:$0xff] }
 0x1cd   : > { %6596 = vst [vmem:[#allocation100_spill] sm:$0xff] %v4510_v35  ;;  %v1669_v35 = vmul.f32 %v3429_v58, %v1664_v26  ;;  %v1781_v58 = vstv %s3448_s29  ;;  %s4914_s29 = sld [smem:[#allocation3 + $0xf]] }
 0x1ce   : > { %6597 = vst [vmem:[#allocation101_spill] sm:$0xff] %v4512_v55  ;;  %v1784_v63 = vmul.f32 %v4536_v22, %v1781_v58 }
 0x1d1   : > { %1687 = vrot.lane.b32.xlu2 %v1667_v43, %s3893_s17  ;;  %1685 = vrot.lane.b32.xlu1 %v1666_v37, %s3893_s17  ;;  %v4539_v43 = vld [vmem:[%s4050_s9 + $0xe0] sm:$0xff] }
 0x1d2   : > { %1683 = vrot.lane.b32.xlu0 %v1665_v27, %s3893_s17  ;;  %6604 = vst [vmem:[#allocation108_spill] sm:$0xff] %v4539_v43  ;;  %v1783_v26 = vmul.f32 %v4539_v43, %v1781_v58 }
 0x1d3   : > { %v4517_v54 = vpop.permute.xlu2 %1411  ;;  %v4519_v42 = vpop.permute.xlu1 %1353 }
 0x1d4   : > { %6598 = vst [vmem:[#allocation102_spill] sm:$0xff] %v4517_v54  ;;  %v4521_v40 = vpop.permute.xlu0 %1351 }
 0x1d5   : > { %6599 = vst [vmem:[#allocation103_spill] sm:$0xff] %v4519_v42 }
 0x1d6   : > { %6600 = vst [vmem:[#allocation104_spill] sm:$0xff] %v4521_v40 }
 0x1d9   : > { %1693 = vrot.lane.b32.xlu2 %v1670_v12, %s3893_s17  ;;  %1691 = vrot.lane.b32.xlu1 %v1669_v35, %s3893_s17  ;;  %v1782_v12 = vmul.f32 %v4546_v53, %v1781_v58 }
 0x1da   : > { %1689 = vrot.lane.b32.xlu0 %v1668_v32, %s3893_s17 }
 0x1db   : > { %v4526_v27 = vpop.permute.xlu2 %1417  ;;  %v4528_v37 = vpop.permute.xlu1 %1359 }
 0x1dc   : > { %6601 = vst [vmem:[#allocation105_spill] sm:$0xff] %v4526_v27  ;;  %v4530_v49 = vpop.permute.xlu0 %1357 }
 0x1dd   : > { %6602 = vst [vmem:[#allocation106_spill] sm:$0xff] %v4528_v37  ;;  %v4588_v37 = vld [vmem:[%s4050_s9 + $0x108] sm:$0xff] }
 0x1de   : > { %6603 = vst [vmem:[#allocation107_spill] sm:$0xff] %v4530_v49 }
 0x1df   : > { %6617 = vst [vmem:[#allocation121_spill] sm:$0xff] %v4588_v37 }
 0x1e1   : > { %1699 = vrot.lane.b32.xlu2 %v1673_v6, %s3893_s17  ;;  %1697 = vrot.lane.b32.xlu1 %v1672_v5, %s3893_s17  ;;  %v4557_v6 = vld [vmem:[%s4050_s9 + $0x100] sm:$0xff]  ;;  %v4560_v5 = vld [vmem:[%s4050_s9 + $0xf8] sm:$0xff] }
 0x1e2   : > { %1695 = vrot.lane.b32.xlu0 %v1671_v52, %s3893_s17  ;;  %6609 = vst [vmem:[#allocation113_spill] sm:$0xff] %v4560_v5  ;;  %v1786_v49 = vmul.f32 %v4560_v5, %v1781_v58 }
 0x1e3   : > { %v4541_v32 = vpop.permute.xlu2 %1490  ;;  %v4543_v35 = vpop.permute.xlu1 %1403 }
 0x1e4   : > { %6605 = vst [vmem:[#allocation109_spill] sm:$0xff] %v4541_v32  ;;  %v4548_v7 = vpop.permute.xlu0 %1401 }
 0x1e5   : > { %6606 = vst [vmem:[#allocation110_spill] sm:$0xff] %v4543_v35 }
 0x1e6   : > { %6608 = vst [vmem:[#allocation112_spill] sm:$0xff] %v4548_v7  ;;  %v4567_v7 = vld [vmem:[%s4050_s9 + $0xf0] sm:$0xff] }
 0x1e7   : > { %6612 = vst [vmem:[#allocation116_spill] sm:$0xff] %v4567_v7 }
 0x1e9   : > { %1804 = vrot.lane.b32.xlu2 %v1784_v63, %s3892_s14  ;;  %1802 = vrot.lane.b32.xlu1 %v1783_v26, %s3892_s14  ;;  %v1787_v63 = vmul.f32 %v4557_v6, %v1781_v58  ;;  %v1785_v26 = vmul.f32 %v4567_v7, %v1781_v58 }
 0x1ea   : > { %1800 = vrot.lane.b32.xlu0 %v1782_v12, %s3892_s14  ;;  %v4578_v12 = vld [vmem:[%s4050_s9 + $0x118] sm:$0x3] }
 0x1eb   : > { %v4562_v52 = vpop.permute.xlu2 %1496  ;;  %v4564_v32 = vpop.permute.xlu1 %1409  ;;  %v1790_v42 = vmul.f32 %v4578_v12, %v1781_v58 }
 0x1ec   : > { %6610 = vst [vmem:[#allocation114_spill] sm:$0xff] %v4562_v52  ;;  %v4569_v35 = vpop.permute.xlu0 %1407  ;;  %v4581_v52 = vld [vmem:[%s4050_s9 + $0x110] sm:$0xff] }
 0x1ed   : > { %6611 = vst [vmem:[#allocation115_spill] sm:$0xff] %v4564_v32 }
 0x1ee   : > { %6613 = vst [vmem:[#allocation117_spill] sm:$0xff] %v4569_v35 }
 0x1ef   : > { %6614 = vst [vmem:[#allocation118_spill] sm:$0xff] %v4581_v52 }
 0x1f1   : > { %1810 = vrot.lane.b32.xlu2 %v1787_v63, %s3892_s14  ;;  %1808 = vrot.lane.b32.xlu1 %v1786_v49, %s3892_s14  ;;  %v1789_v63 = vmul.f32 %v4581_v52, %v1781_v58  ;;  %v1788_v49 = vmul.f32 %v4588_v37, %v1781_v58 }
 0x1f2   : > { %1806 = vrot.lane.b32.xlu0 %v1785_v26, %s3892_s14  ;;  %v1837_v26 = vstv %s3449_s8  ;;  %s4986_s8 = sld [smem:[#allocation3 + $0xd]] }
 0x1f3   : > { %v4583_v32 = vpop.permute.xlu2 %1502  ;;  %v4585_v35 = vpop.permute.xlu1 %1415  ;;  %v1839_v27 = vmul.f32 %v4539_v43, %v1837_v26  ;;  %v1838_v54 = vmul.f32 %v4546_v53, %v1837_v26 }
 0x1f4   : > { %6615 = vst [vmem:[#allocation119_spill] sm:$0xff] %v4583_v32  ;;  %v4590_v40 = vpop.permute.xlu0 %1413 }
 0x1f5   : > { %6616 = vst [vmem:[#allocation120_spill] sm:$0xff] %v4585_v35 }
 0x1f6   : > { %6618 = vst [vmem:[#allocation122_spill] sm:$0xff] %v4590_v40  ;;  %v1840_v40 = vmul.f32 %v4536_v22, %v1837_v26 }
 0x1f9   : > { %1816 = vrot.lane.b32.xlu2 %v1790_v42, %s3892_s14  ;;  %1814 = vrot.lane.b32.xlu1 %v1789_v63, %s3892_s14 }
 0x1fa   : > { %1812 = vrot.lane.b32.xlu0 %v1788_v49, %s3892_s14  ;;  %v1843_v49 = vmul.f32 %v4557_v6, %v1837_v26 }
 0x1fb   : > { %v4598_v32 = vpop.permute.xlu2 %1546  ;;  %v4600_v35 = vpop.permute.xlu1 %1488 }
 0x1fc   : > { %6619 = vst [vmem:[#allocation123_spill] sm:$0xff] %v4598_v32  ;;  %v4602_v55 = vpop.permute.xlu0 %1486 }
 0x1fd   : > { %6620 = vst [vmem:[#allocation124_spill] sm:$0xff] %v4600_v35  ;;  %v1841_v35 = vmul.f32 %v4567_v7, %v1837_v26 }
 0x1fe   : > { %6621 = vst [vmem:[#allocation125_spill] sm:$0xff] %v4602_v55  ;;  %v1842_v55 = vmul.f32 %v4560_v5, %v1837_v26 }
 0x201   : > { %1860 = vrot.lane.b32.xlu2 %v1840_v40, %s3893_s17  ;;  %1858 = vrot.lane.b32.xlu1 %v1839_v27, %s3893_s17 }
 0x202   : > { %1856 = vrot.lane.b32.xlu0 %v1838_v54, %s3893_s17 }
 0x203   : > { %v4610_v42 = vpop.permute.xlu2 %1552  ;;  %v4612_v58 = vpop.permute.xlu1 %1494 }
 0x204   : > { %6622 = vst [vmem:[#allocation126_spill] sm:$0xff] %v4610_v42  ;;  %v4614_v63 = vpop.permute.xlu0 %1492  ;;  %v1844_v42 = vmul.f32 %v4588_v37, %v1837_v26  ;;  %v4687_v37 = vld [vmem:[%s4050_s9 + $0x109] sm:$0xff] }
 0x205   : > { %6623 = vst [vmem:[#allocation127_spill] sm:$0xff] %v4612_v58  ;;  %v1845_v58 = vmul.f32 %v4581_v52, %v1837_v26 }
 0x206   : > { %6624 = vst [vmem:[#allocation128_spill] sm:$0xff] %v4614_v63  ;;  %v1846_v63 = vmul.f32 %v4578_v12, %v1837_v26 }
 0x207   : > { %6644 = vst [vmem:[#allocation148_spill] sm:$0xff] %v4687_v37 }
 0x209   : > { %1866 = vrot.lane.b32.xlu2 %v1843_v49, %s3893_s17  ;;  %1864 = vrot.lane.b32.xlu1 %v1842_v55, %s3893_s17  ;;  %v4635_v55 = vld [vmem:[%s4050_s9 + $0xe9] sm:$0xff]  ;;  %v4638_v49 = vld [vmem:[%s4050_s9 + $0xe1] sm:$0xff] }
 0x20a   : > { %1862 = vrot.lane.b32.xlu0 %v1841_v35, %s3893_s17  ;;  %6628 = vst [vmem:[#allocation132_spill] sm:$0xff] %v4635_v55  ;;  %v1922_v35 = vstv %s3460_s16  ;;  %s5065_s16 = sld [smem:[#allocation3 + $0x19]] }
 0x20b   : > { %v4622_v54 = vpop.permute.xlu2 %1558  ;;  %v4624_v40 = vpop.permute.xlu1 %1500  ;;  %6629 = vst [vmem:[#allocation133_spill] sm:$0xff] %v4638_v49 }
 0x20c   : > { %6625 = vst [vmem:[#allocation129_spill] sm:$0xff] %v4622_v54  ;;  %v4626_v27 = vpop.permute.xlu0 %1498  ;;  %v4645_v54 = vld [vmem:[%s4050_s9 + $0xd9] sm:$0xff] }
 0x20d   : > { %6626 = vst [vmem:[#allocation130_spill] sm:$0xff] %v4624_v40 }
 0x20e   : > { %6627 = vst [vmem:[#allocation131_spill] sm:$0xff] %v4626_v27 }
 0x20f   : > { %6632 = vst [vmem:[#allocation136_spill] sm:$0xff] %v4645_v54 }
 0x211   : > { %1872 = vrot.lane.b32.xlu2 %v1846_v63, %s3893_s17  ;;  %1870 = vrot.lane.b32.xlu1 %v1845_v58, %s3893_s17  ;;  %v1925_v63 = vmul.f32 %v4635_v55, %v1922_v35  ;;  %v1924_v58 = vmul.f32 %v4638_v49, %v1922_v35 }
 0x212   : > { %1868 = vrot.lane.b32.xlu0 %v1844_v42, %s3893_s17  ;;  %v1923_v42 = vmul.f32 %v4645_v54, %v1922_v35 }
 0x213   : > { %v4640_v27 = vpop.permute.xlu2 %1631  ;;  %v4642_v40 = vpop.permute.xlu1 %1544 }
 0x214   : > { %6630 = vst [vmem:[#allocation134_spill] sm:$0xff] %v4640_v27  ;;  %v4647_v26 = vpop.permute.xlu0 %1542  ;;  %v4656_v27 = vld [vmem:[%s4050_s9 + $0x101] sm:$0xff] }
 0x215   : > { %6631 = vst [vmem:[#allocation135_spill] sm:$0xff] %v4642_v40  ;;  %v4659_v40 = vld [vmem:[%s4050_s9 + $0xf9] sm:$0xff] }
 0x216   : > { %6633 = vst [vmem:[#allocation137_spill] sm:$0xff] %v4647_v26  ;;  %v1927_v43 = vmul.f32 %v4659_v40, %v1922_v35 }
 0x217   : > { %6634 = vst [vmem:[#allocation138_spill] sm:$0xff] %v4656_v27 }
 0x218   : > { %6635 = vst [vmem:[#allocation139_spill] sm:$0xff] %v4659_v40 }
 0x219   : > { %1945 = vrot.lane.b32.xlu2 %v1925_v63, %s3892_s14  ;;  %1943 = vrot.lane.b32.xlu1 %v1924_v58, %s3892_s14  ;;  %v1928_v63 = vmul.f32 %v4656_v27, %v1922_v35  ;;  %v1926_v58 = vmul.f32 %v4666_v44, %v1922_v35 }
 0x21a   : > { %1941 = vrot.lane.b32.xlu0 %v1923_v42, %s3892_s14  ;;  %v4677_v42 = vld [vmem:[%s4050_s9 + $0x119] sm:$0x3] }
 0x21b   : > { %v4661_v26 = vpop.permute.xlu2 %1637  ;;  %v4663_v32 = vpop.permute.xlu1 %1550  ;;  %6640 = vst [vmem:[#allocation144_spill] sm:$0xff] %v4677_v42  ;;  %v1931_v7 = vmul.f32 %v4677_v42, %v1922_v35 }
 0x21c   : > { %6636 = vst [vmem:[#allocation140_spill] sm:$0xff] %v4661_v26  ;;  %v4668_v53 = vpop.permute.xlu0 %1548  ;;  %v4680_v26 = vld [vmem:[%s4050_s9 + $0x111] sm:$0xff] }
 0x21d   : > { %6637 = vst [vmem:[#allocation141_spill] sm:$0xff] %v4663_v32 }
 0x21e   : > { %6639 = vst [vmem:[#allocation143_spill] sm:$0xff] %v4668_v53 }
 0x21f   : > { %6641 = vst [vmem:[#allocation145_spill] sm:$0xff] %v4680_v26 }
 0x221   : > { %1951 = vrot.lane.b32.xlu2 %v1928_v63, %s3892_s14  ;;  %1949 = vrot.lane.b32.xlu1 %v1927_v43, %s3892_s14  ;;  %v1930_v63 = vmul.f32 %v4680_v26, %v1922_v35  ;;  %v1929_v43 = vmul.f32 %v4687_v37, %v1922_v35 }
 0x222   : > { %1947 = vrot.lane.b32.xlu0 %v1926_v58, %s3892_s14  ;;  %v1978_v58 = vstv %s3461_s19  ;;  %s5157_s19 = sld [smem:[#allocation6 + $0x2]] }
 0x223   : > { %v4682_v32 = vpop.permute.xlu2 %1643  ;;  %v4684_v53 = vpop.permute.xlu1 %1556  ;;  %v1980_v21 = vmul.f32 %v4638_v49, %v1978_v58  ;;  %v1979_v14 = vmul.f32 %v4645_v54, %v1978_v58  ;;  %v4771_v54 = vld [vmem:[%s4050_s9 + $0xf2] sm:$0xff]  ;;  %v3628_v49 = vld [vmem:[%s4050_s9 + $0x28] sm:$0xff] }
 0x224   : > { %6642 = vst [vmem:[#allocation146_spill] sm:$0xff] %v4682_v32  ;;  %v4689_v52 = vpop.permute.xlu0 %1554 }
 0x225   : > { %6643 = vst [vmem:[#allocation147_spill] sm:$0xff] %v4684_v53 }
 0x226   : > { %6645 = vst [vmem:[#allocation149_spill] sm:$0xff] %v4689_v52  ;;  %v1981_v52 = vmul.f32 %v4635_v55, %v1978_v58  ;;  %v3630_v55 = vld [vmem:[%s4050_s9 + $0x20] sm:$0xff] }
 0x227   : > { %6662 = vst [vmem:[#allocation166_spill] sm:$0xff] %v4771_v54 }
 0x229   : > { %1957 = vrot.lane.b32.xlu2 %v1931_v7, %s3892_s14  ;;  %1955 = vrot.lane.b32.xlu1 %v1930_v63, %s3892_s14 }
 0x22a   : > { %1953 = vrot.lane.b32.xlu0 %v1929_v43, %s3892_s14  ;;  %v1984_v43 = vmul.f32 %v4656_v27, %v1978_v58 }
 0x22b   : > { %v4697_v32 = vpop.permute.xlu2 %1687  ;;  %v4699_v53 = vpop.permute.xlu1 %1629 }
 0x22c   : > { %6646 = vst [vmem:[#allocation150_spill] sm:$0xff] %v4697_v32  ;;  %v4701_v5 = vpop.permute.xlu0 %1627  ;;  %v423_v32 = vstv %s413_s2  ;;  %s5178_s2 = sld [smem:[#allocation3 + $0x2]] }
 0x22d   : > { %6647 = vst [vmem:[#allocation151_spill] sm:$0xff] %v4699_v53  ;;  %v1982_v53 = vmul.f32 %v4666_v44, %v1978_v58  ;;  %v428_v28 = vmul.f32 %v3630_v55, %v423_v32  ;;  %v424_v13 = vmul.f32 %v3631_v60, %v423_v32 }
 0x22e   : > { %6648 = vst [vmem:[#allocation152_spill] sm:$0xff] %v4701_v5  ;;  %v1983_v5 = vmul.f32 %v4659_v40, %v1978_v58 }
 0x22f   : > { %v484_v0 = vadd.f32 %v4108_v61, %v428_v28  ;;  %v3636_v28 = vld [vmem:[%s4050_s9 + $0x30] sm:$0xff]  ;;  %v480_v62 = vadd.f32 %v4134_v19, %v424_v13  ;;  %v3641_v13 = vld [vmem:[%s4050_s9 + $0x21] sm:$0xff] }
 0x231   : > { %2001 = vrot.lane.b32.xlu2 %v1981_v52, %s3893_s17  ;;  %1999 = vrot.lane.b32.xlu1 %v1980_v21, %s3893_s17 }
 0x232   : > { %1997 = vrot.lane.b32.xlu0 %v1979_v14, %s3893_s17 }
 0x233   : > { %v4709_v7 = vpop.permute.xlu2 %1693  ;;  %v4711_v35 = vpop.permute.xlu1 %1635 }
 0x234   : > { %6649 = vst [vmem:[#allocation153_spill] sm:$0xff] %v4709_v7  ;;  %v4713_v63 = vpop.permute.xlu0 %1633  ;;  %v1985_v7 = vmul.f32 %v4687_v37, %v1978_v58  ;;  %v3627_v37 = vld [vmem:[%s4050_s9 + $0x10] sm:$0xff] }
 0x235   : > { %6650 = vst [vmem:[#allocation154_spill] sm:$0xff] %v4711_v35  ;;  %v1986_v35 = vmul.f32 %v4680_v26, %v1978_v58  ;;  %v426_v26 = vmul.f32 %v3627_v37, %v423_v32 }
 0x236   : > { %6651 = vst [vmem:[#allocation155_spill] sm:$0xff] %v4713_v63  ;;  %v1987_v63 = vmul.f32 %v4677_v42, %v1978_v58  ;;  %v4746_v58 = vld [vmem:[%s4050_s9 + $0xda] sm:$0xff] }
 0x237   : > { %v3629_v42 = vld [vmem:[%s4050_s9 + $0x40] sm:$0x3] }
 0x239   : > { %2007 = vrot.lane.b32.xlu2 %v1984_v43, %s3893_s17  ;;  %2005 = vrot.lane.b32.xlu1 %v1983_v5, %s3893_s17  ;;  %v4736_v5 = vstv %s3472_s1  ;;  %v4739_v43 = vld [vmem:[%s4050_s9 + $0xe2] sm:$0xff]  ;;  %s5165_s1 = sld [smem:[#allocation6 + $0x3]] }
 0x23a   : > { %2003 = vrot.lane.b32.xlu0 %v1982_v53, %s3893_s17  ;;  %v4734_v53 = vld [vmem:[%s4050_s9 + $0xea] sm:$0xff] }
 0x23b   : > { %v4721_v14 = vpop.permute.xlu2 %1699  ;;  %v4723_v21 = vpop.permute.xlu1 %1641  ;;  %6655 = vst [vmem:[#allocation159_spill] sm:$0xff] %v4734_v53 }
 0x23c   : > { %6652 = vst [vmem:[#allocation156_spill] sm:$0xff] %v4721_v14  ;;  %v4725_v52 = vpop.permute.xlu0 %1639  ;;  %v2064_v14 = vmul.f32 %v4746_v58, %v4736_v5 }
 0x23d   : > { %6653 = vst [vmem:[#allocation157_spill] sm:$0xff] %v4723_v21 }
 0x23e   : > { %6654 = vst [vmem:[#allocation158_spill] sm:$0xff] %v4725_v52 }
 0x241   : > { %2013 = vrot.lane.b32.xlu2 %v1987_v63, %s3893_s17  ;;  %2011 = vrot.lane.b32.xlu1 %v1986_v35, %s3893_s17  ;;  %v2065_v35 = vmul.f32 %v4739_v43, %v4736_v5 }
 0x242   : > { %2009 = vrot.lane.b32.xlu0 %v1985_v7, %s3893_s17  ;;  %v2066_v7 = vmul.f32 %v4734_v53, %v4736_v5 }
 0x243   : > { %v4741_v52 = vpop.permute.xlu2 %1804  ;;  %v4743_v21 = vpop.permute.xlu1 %1685 }
 0x244   : > { %6656 = vst [vmem:[#allocation160_spill] sm:$0xff] %v4741_v52  ;;  %v4748_v63 = vpop.permute.xlu0 %1683  ;;  %v3632_v52 = vld [vmem:[%s4050_s9 + $0x8] sm:$0xff] }
 0x245   : > { %6657 = vst [vmem:[#allocation161_spill] sm:$0xff] %v4743_v21  ;;  %v4763_v21 = vld [vmem:[%s4050_s9 + $0xfa] sm:$0xff]  ;;  %v425_v55 = vmul.f32 %v3632_v52, %v423_v32  ;;  %v4802_v52 = vld [vmem:[%s4050_s9 + $0x112] sm:$0xff] }
 0x246   : > { %6658 = vst [vmem:[#allocation162_spill] sm:$0xff] %v4748_v63  ;;  %v4760_v63 = vld [vmem:[%s4050_s9 + $0x102] sm:$0xff]  ;;  %v2068_v37 = vmul.f32 %v4763_v21, %v4736_v5  ;;  %v2071_v19 = vmul.f32 %v4802_v52, %v4736_v5 }
 0x247   : > { %6659 = vst [vmem:[#allocation163_spill] sm:$0xff] %v4760_v63  ;;  %v2069_v27 = vmul.f32 %v4760_v63, %v4736_v5  ;;  %v481_v51 = vadd.f32 %v4143_v25, %v425_v55  ;;  %v3643_v55 = vld [vmem:[%s4050_s9 + $0x39] sm:$0xff] }
 0x248   : > { %6660 = vst [vmem:[#allocation164_spill] sm:$0xff] %v4763_v21  ;;  %v4834_v21 = vstv %s4782_s20  ;;  %s5320_s20 = sld [smem:[#allocation3 + $0x1a]] }
 0x249   : > { %2086 = vrot.lane.b32.xlu2 %v2066_v7, %s3892_s14  ;;  %2084 = vrot.lane.b32.xlu1 %v2065_v35, %s3892_s14  ;;  %v429_v7 = vmul.f32 %v3628_v49, %v423_v32  ;;  %v2067_v49 = vmul.f32 %v4771_v54, %v4736_v5  ;;  %6665 = vst [vmem:[#allocation169_spill] sm:$0xff] %v4802_v52  ;;  %v4817_v54 = vld [vmem:[%s4050_s9 + $0x10a] sm:$0xff] }
 0x24a   : > { %2082 = vrot.lane.b32.xlu0 %v2064_v14, %s3892_s14  ;;  %v432_v14 = vmul.f32 %v3629_v42, %v423_v32  ;;  %6668 = vst [vmem:[#allocation172_spill] sm:$0xff] %v4817_v54 }
 0x24b   : > { %v4766_v44 = vpop.permute.xlu2 %1810  ;;  %v4768_v40 = vpop.permute.xlu1 %1691  ;;  %v485_v42 = vadd.f32 %v4116_v4, %v429_v7  ;;  %v3634_v4 = vld [vmem:[%s4050_s9 + $0x38] sm:$0xff] }
 0x24c   : > { %6661 = vst [vmem:[#allocation165_spill] sm:$0xff] %v4768_v40  ;;  %v4774_v35 = vpop.permute.xlu0 %1689  ;;  %v555_v40 = vstv %s3355_s13  ;;  %v488_v45 = vadd.f32 %v4124_v11, %v432_v14  ;;  %v431_v7 = vmul.f32 %v3634_v4, %v423_v32  ;;  %v4799_v11 = vld [vmem:[%s4050_s9 + $0x11a] sm:$0x3]  ;;  %v3637_v14 = vld [vmem:[%s4050_s9 + $0x9] sm:$0xff]  ;;  %s5262_s13 = sld [smem:[#allocation3 + $0xe]] }
 0x24d   : > { %6663 = vst [vmem:[#allocation167_spill] sm:$0xff] %v4774_v35  ;;  %v482_v35 = vadd.f32 %v4132_v18, %v426_v26  ;;  %v3633_v18 = vld [vmem:[%s4050_s9 + $0x18] sm:$0xff]  ;;  %v558_v60 = vmul.f32 %v3635_v33, %v555_v40 }
 0x24e   : > { %v427_v26 = vmul.f32 %v3633_v18, %v423_v32  ;;  %6664 = vst [vmem:[#allocation168_spill] sm:$0xff] %v4799_v11  ;;  %v3638_v18 = vld [vmem:[%s4050_s9 + $0x1] sm:$0xff]  ;;  %v487_v52 = vadd.f32 %v4150_v30, %v431_v7  ;;  %v540_v30 = vadd.f32 %v4173_v48, %v484_v0 }
 0x24f   : > { %v538_v61 = vadd.f32 %v4130_v17, %v482_v35  ;;  %v556_v4 = vmul.f32 %v3638_v18, %v555_v40  ;;  %v541_v17 = vadd.f32 %v4139_v23, %v485_v42  ;;  %v560_v23 = vmul.f32 %v3641_v13, %v555_v40  ;;  %v3642_v42 = vld [vmem:[%s4050_s9 + $0x19] sm:$0xff] }
 0x250   : > { %v483_v25 = vadd.f32 %v4141_v24, %v427_v26  ;;  %v536_v13 = vadd.f32 %v4164_v41, %v480_v62  ;;  %v4860_v26 = vstv %s4810_s15  ;;  %s5397_s15 = sld [smem:[#allocation6 + $0x4]] }
 0x251   : > { %2092 = vrot.lane.b32.xlu2 %v2069_v27, %s3892_s14  ;;  %2090 = vrot.lane.b32.xlu1 %v2068_v37, %s3892_s14  ;;  %v430_v27 = vmul.f32 %v3636_v28, %v423_v32  ;;  %v557_v37 = vmul.f32 %v3637_v14, %v555_v40  ;;  %v3639_v32 = vld [vmem:[%s4050_s9 + $0x29] sm:$0xff]  ;;  %v3640_v28 = vld [vmem:[%s4050_s9 + $0x41] sm:$0x3] }
 0x252   : > { %2088 = vrot.lane.b32.xlu0 %v2067_v49, %s3892_s14  ;;  %v561_v35 = vmul.f32 %v3639_v32, %v555_v40  ;;  %v564_v14 = vmul.f32 %v3640_v28, %v555_v40  ;;  %v559_v32 = vmul.f32 %v3642_v42, %v555_v40  ;;  %v2070_v28 = vmul.f32 %v4817_v54, %v4736_v5  ;;  %v3644_v42 = vld [vmem:[%s4050_s9 + $0x31] sm:$0xff] }
 0x253   : > { %v4812_v33 = vpop.permute.xlu2 %1816  ;;  %v4814_v49 = vpop.permute.xlu1 %1697  ;;  %v562_v63 = vmul.f32 %v3644_v42, %v555_v40  ;;  %v486_v46 = vadd.f32 %v4152_v31, %v430_v27  ;;  %v3645_v54 = vld [vmem:[%s4050_s9 + $0x12] sm:$0xff]  ;;  %v539_v41 = vadd.f32 %v4176_v50, %v483_v25  ;;  %v543_v31 = vadd.f32 %v4185_v57, %v487_v52 }
 0x254   : > { %6666 = vst [vmem:[#allocation170_spill] sm:$0xff] %v4812_v33  ;;  %v4823_v18 = vpop.permute.xlu0 %1695  ;;  %v544_v33 = vadd.f32 %v4148_v29, %v488_v45  ;;  %v567_v29 = vadd.f32 %v558_v60, %v538_v61  ;;  %v537_v45 = vadd.f32 %v4161_v39, %v481_v51  ;;  %v699_v24 = vmul.f32 %v3645_v54, %v4834_v21  ;;  %v3647_v61 = vld [vmem:[%s4050_s9 + $0x42] sm:$0x3] }
 0x255   : > { %6667 = vst [vmem:[#allocation171_spill] sm:$0xff] %v4814_v49  ;;  %v2072_v49 = vmul.f32 %v4799_v11, %v4736_v5  ;;  %v570_v11 = vadd.f32 %v561_v35, %v541_v17  ;;  %v4854_v51 = vstv %s4804_s23  ;;  %v542_v50 = vadd.f32 %v4188_v59, %v486_v46  ;;  %s5368_s23 = sld [smem:[#allocation3 + $0x1b]] }
 0x256   : > { %6669 = vst [vmem:[#allocation173_spill] sm:$0xff] %v4823_v18  ;;  %v563_v18 = vmul.f32 %v3643_v55, %v555_v40  ;;  %v573_v5 = vadd.f32 %v564_v14, %v544_v33  ;;  %v623_v39 = vadd.f32 %v4159_v38, %v567_v29  ;;  %v566_v62 = vadd.f32 %v557_v37, %v537_v45  ;;  %v3646_v40 = vld [vmem:[%s4050_s9 + $0x2a] sm:$0xff] }
 0x257   : > { %v702_v54 = vmul.f32 %v3646_v40, %v4834_v21  ;;  %v626_v48 = vadd.f32 %v4171_v47, %v570_v11  ;;  %v565_v0 = vadd.f32 %v556_v4, %v536_v13  ;;  %v1776_v60 = vmul.f32 %v4557_v6, %v4860_v26  ;;  %v3648_v33 = vld [vmem:[%s4050_s9 + $0xa] sm:$0xff]  ;;  %v6674_v40 = vld [vmem:[#allocation25_spill] sm:$0xff] }
 0x258   : > { %v679_v52 = vadd.f32 %v4193_v1, %v623_v39  ;;  %v705_v27 = vmul.f32 %v3647_v61, %v4834_v21  ;;  %v2122_v37 = vmul.f32 %v4734_v53, %v4854_v51  ;;  %v2121_v47 = vmul.f32 %v4739_v43, %v4854_v51  ;;  %v3649_v43 = vld [vmem:[%s4050_s9 + $0x2] sm:$0xff] }
 0x259   : > { %2098 = vrot.lane.b32.xlu2 %v2072_v49, %s3892_s14  ;;  %2096 = vrot.lane.b32.xlu1 %v2071_v19, %s3892_s14  ;;  %v629_v59 = vadd.f32 %v4183_v56, %v573_v5  ;;  %v569_v46 = vadd.f32 %v560_v23, %v540_v30  ;;  %v568_v11 = vadd.f32 %v559_v32, %v539_v41  ;;  %v3651_v23 = vld [vmem:[%s4050_s9 + $0x1a] sm:$0xff]  ;;  %v6671_v30 = vld [vmem:[#allocation163_spill] sm:$0xff] }
 0x25a   : > { %2094 = vrot.lane.b32.xlu0 %v2070_v28, %s3892_s14  ;;  %v2120_v1 = vmul.f32 %v4746_v58, %v4854_v51  ;;  %v682_v6 = vadd.f32 %v4202_v8, %v626_v48  ;;  %v572_v4 = vadd.f32 %v563_v18, %v543_v31  ;;  %v698_v49 = vmul.f32 %v3648_v33, %v4834_v21  ;;  %v3650_v8 = vld [vmem:[%s4050_s9 + $0x22] sm:$0xff]  ;;  %v3653_v28 = vld [vmem:[%s4050_s9 + $0x32] sm:$0xff] }
 0x25b   : > { %v4862_v7 = vpop.permute.xlu2 %1860  ;;  %v4864_v38 = vpop.permute.xlu1 %1802  ;;  %v697_v56 = vmul.f32 %v3649_v43, %v4834_v21  ;;  %v622_v17 = vadd.f32 %v4195_v2, %v566_v62  ;;  %v621_v35 = vadd.f32 %v4197_v3, %v565_v0  ;;  %v571_v14 = vadd.f32 %v562_v63, %v542_v50  ;;  %v3652_v63 = vld [vmem:[%s4050_s9 + $0x3a] sm:$0xff]  ;;  %v6673_v62 = vld [vmem:[#allocation23_spill] sm:$0xff]  ;;  %v6676_v0 = vld [vmem:[#allocation20_spill] sm:$0xff] }
 0x25c   : > { %v4870_v57 = vpop.permute.xlu0 %1800  ;;  %v1832_v58 = vadd.f32 %v4766_v44, %v1776_v60  ;;  %v708_v19 = vadd.f32 %v699_v24, %v679_v52  ;;  %v701_v18 = vmul.f32 %v3650_v8, %v4834_v21  ;;  %v700_v32 = vmul.f32 %v3651_v23, %v4834_v21  ;;  %v6670_v24 = vld [vmem:[#allocation22_spill] sm:$0xff]  ;;  %v6681_v43 = vld [vmem:[#allocation27_spill] sm:$0xff] }
 0x25d   : > { %v625_v2 = vadd.f32 %v4204_v9, %v569_v46  ;;  %v624_v3 = vadd.f32 %v4206_v10, %v568_v11  ;;  %v704_v44 = vmul.f32 %v3652_v63, %v4834_v21  ;;  %v703_v25 = vmul.f32 %v3653_v28, %v4834_v21  ;;  %v6675_v48 = vld [vmem:[#allocation166_spill] sm:$0xff]  ;;  %v6678_v46 = vld [vmem:[#allocation160_spill] sm:$0xff]  ;;  %v6725_v53 = vld [vmem:[#allocation55_spill] sm:$0xff] }
 0x25e   : > { %v685_v29 = vadd.f32 %v4211_v15, %v629_v59  ;;  %v628_v45 = vadd.f32 %v4213_v16, %v572_v4  ;;  %v678_v55 = vadd.f32 %v4224_v34, %v622_v17  ;;  %v711_v13 = vadd.f32 %v702_v54, %v682_v6  ;;  %v6677_v52 = vld [vmem:[#allocation26_spill] sm:$0xff]  ;;  %v6680_v4 = vld [vmem:[#allocation21_spill] sm:$0xff] }
 0x25f   : > { %v677_v10 = vadd.f32 %v4227_v36, %v621_v35  ;;  %v1773_v21 = vmul.f32 %v4536_v22, %v4860_v26  ;;  %v1779_v15 = vmul.f32 %v4578_v12, %v4860_v26  ;;  %v627_v34 = vadd.f32 %v4215_v20, %v571_v14  ;;  %v6672_v36 = vld [vmem:[#allocation164_spill] sm:$0xff]  ;;  %v6683_v23 = vld [vmem:[#allocation30_spill] sm:$0xff] }
 0x260   : > { %v681_v39 = vadd.f32 %v6670_v24, %v625_v2  ;;  %v2125_v41 = vmul.f32 %v6671_v30, %v4854_v51  ;;  %v2124_v31 = vmul.f32 %v6672_v36, %v4854_v51  ;;  %v680_v22 = vadd.f32 %v6673_v62, %v624_v3  ;;  %v6687_v24 = vld [vmem:[#allocation168_spill] sm:$0xff]  ;;  %v6688_v30 = vld [vmem:[#allocation169_spill] sm:$0xff]  ;;  %v3656_v62 = vld [vmem:[%s4050_s9 + $0x88] sm:$0x3] }
 0x261   : > { %2142 = vrot.lane.b32.xlu2 %v2122_v37, %s3893_s17  ;;  %2140 = vrot.lane.b32.xlu1 %v2121_v47, %s3893_s17  ;;  %v684_v54 = vadd.f32 %v6674_v40, %v628_v45  ;;  %v4934_v12 = vstv %s4880_s18  ;;  %v2123_v50 = vmul.f32 %v6675_v48, %v4854_v51  ;;  %v764_v20 = vadd.f32 %v6676_v0, %v708_v19  ;;  %v3654_v19 = vld [vmem:[%s4050_s9 + $0x58] sm:$0xff]  ;;  %v6690_v40 = vld [vmem:[#allocation172_spill] sm:$0xff]  ;;  %s5401_s18 = sld [smem:[#allocation6 + $0x5]] }
 0x262   : > { %2138 = vrot.lane.b32.xlu0 %v2120_v1, %s3893_s17  ;;  %v714_v60 = vadd.f32 %v705_v27, %v685_v29  ;;  %v683_v61 = vadd.f32 %v6677_v52, %v627_v34  ;;  %v4941_v37 = vstv %s4885_s21  ;;  %v707_v47 = vadd.f32 %v698_v49, %v678_v55  ;;  %v6679_v1 = vld [vmem:[#allocation170_spill] sm:$0xff]  ;;  %v6682_v27 = vld [vmem:[#allocation24_spill] sm:$0xff]  ;;  %v6689_v36 = vld [vmem:[#allocation33_spill] sm:$0xff]  ;;  %s5414_s21 = sld [smem:[#allocation6 + $0x6]] }
 0x263   : > { %v1867_v42 = vpop.permute.xlu2 %1866  ;;  %v4912_v9 = vpop.permute.xlu1 %1808  ;;  %v706_v59 = vadd.f32 %v697_v56, %v677_v10  ;;  %v1829_v11 = vadd.f32 %v6678_v46, %v1773_v21  ;;  %v1835_v6 = vadd.f32 %v6679_v1, %v1779_v15  ;;  %v767_v33 = vadd.f32 %v6680_v4, %v711_v13  ;;  %v6684_v55 = vld [vmem:[#allocation28_spill] sm:$0xff]  ;;  %v6686_v15 = vld [vmem:[#allocation29_spill] sm:$0xff] }
 0x264   : > { %v4921_v5 = vadd.f32 %v1867_v42, %v1832_v58  ;;  %v4923_v16 = vpop.permute.xlu0 %1806  ;;  %v820_v17 = vadd.f32 %v6681_v43, %v764_v20  ;;  %v710_v35 = vadd.f32 %v701_v18, %v681_v39  ;;  %v4948_v14 = vstv %s4898_s22  ;;  %v3655_v18 = vld [vmem:[%s4050_s9 + $0x70] sm:$0xff]  ;;  %v6693_v52 = vld [vmem:[#allocation37_spill] sm:$0xff]  ;;  %s5424_s22 = sld [smem:[#allocation6 + $0x7]] }
 0x265   : > { %v770_v49 = vadd.f32 %v6682_v27, %v714_v60  ;;  %v709_v56 = vadd.f32 %v700_v32, %v680_v22  ;;  %v713_v58 = vadd.f32 %v704_v44, %v684_v54  ;;  %v863_v8 = vmul.f32 %v3654_v19, %v4948_v14  ;;  %v6685_v10 = vld [vmem:[#allocation132_spill] sm:$0xff] }
 0x266   : > { %v823_v2 = vadd.f32 %v6683_v23, %v767_v33  ;;  %v712_v3 = vadd.f32 %v703_v25, %v683_v61  ;;  %v866_v63 = vmul.f32 %v3655_v18, %v4948_v14  ;;  %v4962_v45 = vstv %s4914_s29  ;;  %v6692_v20 = vld [vmem:[#allocation32_spill] sm:$0xff]  ;;  %v6696_v33 = vld [vmem:[#allocation35_spill] sm:$0xff]  ;;  %s5443_s29 = sld [smem:[#allocation8]] }
 0x267   : > { %v763_v32 = vadd.f32 %v6684_v55, %v707_v47  ;;  %v1885_v44 = vadd.f32 %v4862_v7, %v1829_v11  ;;  %v1905_v25 = vmul.f32 %v6685_v10, %v4962_v45  ;;  %v4973_v21 = vmul.f32 %v4934_v12, %v820_v17  ;;  %v3657_v11 = vld [vmem:[%s4050_s9 + $0x50] sm:$0xff] }
 0x268   : > { %v762_v34 = vadd.f32 %v6686_v15, %v706_v59  ;;  %v2128_v39 = vmul.f32 %v6687_v24, %v4854_v51  ;;  %v4981_v7 = vmul.f32 %v4941_v37, %v820_v17  ;;  %v869_v22 = vmul.f32 %v3656_v62, %v4948_v14  ;;  %v6694_v59 = vld [vmem:[#allocation38_spill] sm:$0xff]  ;;  %v3658_v17 = vld [vmem:[%s4050_s9 + $0x48] sm:$0xff] }
 0x269   : > { %2148 = vrot.lane.b32.xlu2 %v2125_v41, %s3893_s17  ;;  %2146 = vrot.lane.b32.xlu1 %v2124_v31, %s3893_s17  ;;  %v2127_v41 = vmul.f32 %v6688_v30, %v4854_v51  ;;  %v826_v31 = vadd.f32 %v6689_v36, %v770_v49  ;;  %v2126_v54 = vmul.f32 %v6690_v40, %v4854_v51  ;;  %v6702_v36 = vld [vmem:[#allocation43_spill] sm:$0xff]  ;;  %v3661_v62 = vld [vmem:[%s4050_s9 + $0x80] sm:$0xff] }
 0x26a   : > { %2144 = vrot.lane.b32.xlu0 %v2123_v50, %s3893_s17  ;;  %v4991_v48 = vmul.f32 %v4934_v12, %v823_v2  ;;  %v6691_v50 = vld [vmem:[#allocation31_spill] sm:$0xff]  ;;  %v765_v60 = vadd.f32 %v6692_v20, %v709_v56  ;;  %v819_v61 = vadd.f32 %v6693_v52, %v763_v32  ;;  %v4997_v47 = vmul.f32 %v4941_v37, %v823_v2  ;;  %v6697_v2 = vld [vmem:[#allocation36_spill] sm:$0xff]  ;;  %v6699_v32 = vld [vmem:[#allocation41_spill] sm:$0xff] }
 0x26b   : > { %v1873_v28 = vpop.permute.xlu2 %1872  ;;  %v4959_v29 = vpop.permute.xlu1 %1814  ;;  %v766_v0 = vadd.f32 %v6691_v50, %v710_v35  ;;  %v818_v46 = vadd.f32 %v6694_v59, %v762_v34  ;;  %v862_v1 = vmul.f32 %v3657_v11, %v4948_v14  ;;  %v1914_v51 = vadd.f32 %v1905_v25, %v1885_v44  ;;  %v3659_v56 = vld [vmem:[%s4050_s9 + $0x68] sm:$0xff]  ;;  %v6705_v59 = vld [vmem:[#allocation113_spill] sm:$0xff] }
 0x26c   : > { %v4966_v13 = vadd.f32 %v1873_v28, %v1835_v6  ;;  %v4968_v42 = vpop.permute.xlu0 %1812  ;;  %v6695_v6 = vld [vmem:[#allocation34_spill] sm:$0xff]  ;;  %v768_v43 = vadd.f32 %v6696_v33, %v712_v3  ;;  %v861_v35 = vmul.f32 %v3658_v17, %v4948_v14  ;;  %v5009_v27 = vmul.f32 %v4934_v12, %v826_v31  ;;  %v6698_v28 = vld [vmem:[#allocation40_spill] sm:$0xff] }
 0x26d   : > { %v769_v4 = vadd.f32 %v6695_v6, %v713_v58  ;;  %v5012_v49 = vmul.f32 %v4941_v37, %v826_v31  ;;  %v5016_v19 = vmul.f32 %v3659_v56, %v4948_v14  ;;  %v3660_v58 = vld [vmem:[%s4050_s9 + $0x60] sm:$0xff]  ;;  %v919_v3 = vadd.f32 %v6697_v2, %v863_v8 }
 0x26e   : > { %v5020_v23 = vmul.f32 %v3660_v58, %v4948_v14  ;;  %v5025_v18 = vmul.f32 %v4934_v12, %v819_v61  ;;  %v822_v55 = vadd.f32 %v6698_v28, %v766_v0  ;;  %v821_v44 = vadd.f32 %v6699_v32, %v765_v60  ;;  %v6703_v0 = vld [vmem:[#allocation39_spill] sm:$0xff]  ;;  %v6704_v60 = vld [vmem:[#allocation44_spill] sm:$0xff]  ;;  %v6707_v33 = vld [vmem:[#allocation42_spill] sm:$0xff] }
 0x26f   : > { %v5032_v15 = vmul.f32 %v4941_v37, %v819_v61  ;;  %v5035_v34 = vmul.f32 %v4934_v12, %v818_v46  ;;  %v825_v31 = vadd.f32 %v6702_v36, %v769_v4  ;;  %v868_v40 = vmul.f32 %v3661_v62, %v4948_v14  ;;  %v3663_v17 = vld [vmem:[%s4050_s9 + $0x59] sm:$0xff]  ;;  %v3664_v32 = vld [vmem:[%s4050_s9 + $0x51] sm:$0xff] }
 0x270   : > { %v922_v20 = vadd.f32 %v6703_v0, %v866_v63  ;;  %v824_v52 = vadd.f32 %v6704_v60, %v768_v43  ;;  %v992_v61 = vstv %s4986_s8  ;;  %v5057_v11 = vmul.f32 %v4934_v12, %v822_v55  ;;  %v6708_v28 = vld [vmem:[#allocation45_spill] sm:$0xff]  ;;  %s5449_s8 = sld [smem:[#allocation8 + $0x1]] }
 0x271   : > { %2154 = vrot.lane.b32.xlu2 %v2128_v39, %s3893_s17  ;;  %2152 = vrot.lane.b32.xlu1 %v2127_v41, %s3893_s17  ;;  %v6701_v39 = vld [vmem:[#allocation138_spill] sm:$0xff]  ;;  %v5044_v41 = vmul.f32 %v4941_v37, %v818_v46  ;;  %v1775_v46 = vmul.f32 %v6705_v59, %v4860_v26  ;;  %v5063_v6 = vmul.f32 %v4934_v12, %v821_v44  ;;  %v3666_v60 = vld [vmem:[%s4050_s9 + $0x71] sm:$0xff] }
 0x272   : > { %2150 = vrot.lane.b32.xlu0 %v2126_v54, %s3893_s17  ;;  %v1908_v30 = vmul.f32 %v6701_v39, %v4962_v45  ;;  %v3662_v54 = vld [vmem:[%s4050_s9 + $0x78] sm:$0xff]  ;;  %v5070_v4 = vmul.f32 %v4941_v37, %v821_v44  ;;  %v925_v43 = vadd.f32 %v6707_v33, %v869_v22  ;;  %v995_v56 = vmul.f32 %v3663_v17, %v992_v61  ;;  %v3665_v39 = vld [vmem:[%s4050_s9 + $0x49] sm:$0xff] }
 0x273   : > { %v1946_v10 = vpop.permute.xlu2 %1945  ;;  %v5029_v25 = vpop.permute.xlu1 %1858  ;;  %v867_v50 = vmul.f32 %v3662_v54, %v4948_v14  ;;  %v6706_v14 = vld [vmem:[#allocation116_spill] sm:$0xff]  ;;  %v5076_v2 = vmul.f32 %v4934_v12, %v825_v31  ;;  %v5081_v36 = vmul.f32 %v3665_v39, %v992_v61  ;;  %v5084_v44 = vmul.f32 %v4941_v37, %v825_v31  ;;  %v6713_v54 = vld [vmem:[#allocation47_spill] sm:$0xff] }
 0x274   : > { %v5037_v24 = vadd.f32 %v1946_v10, %v1914_v51  ;;  %v5039_v8 = vpop.permute.xlu0 %1856  ;;  %v5060_v51 = vmul.f32 %v4941_v37, %v822_v55  ;;  %v1774_v63 = vmul.f32 %v6706_v14, %v4860_v26  ;;  %v1917_v58 = vadd.f32 %v1908_v30, %v4921_v5  ;;  %v6712_v30 = vld [vmem:[#allocation46_spill] sm:$0xff] }
 0x275   : > { %v975_v55 = vadd.f32 %v6708_v28, %v919_v3  ;;  %v994_v10 = vmul.f32 %v3664_v32, %v992_v61  ;;  %6709 = vst [vmem:[#allocation163_spill] sm:$0xff] %v5084_v44  ;;  %v5087_v22 = vmul.f32 %v4934_v12, %v824_v52  ;;  %v5090_v62 = vmul.f32 %v4941_v37, %v824_v52  ;;  %v6714_v12 = vld [vmem:[#allocation48_spill] sm:$0xff] }
 0x276   : > { %6700 = vst [vmem:[#allocation22_spill] sm:$0xff] %v5037_v24  ;;  %v1831_v5 = vadd.f32 %v4912_v9, %v1775_v46  ;;  %v918_v3 = vadd.f32 %v6712_v30, %v862_v1  ;;  %v917_v0 = vadd.f32 %v6713_v54, %v861_v35  ;;  %v998_v59 = vmul.f32 %v3666_v60, %v992_v61  ;;  %v6716_v52 = vld [vmem:[#allocation144_spill] sm:$0xff]  ;;  %v6718_v30 = vld [vmem:[#allocation51_spill] sm:$0xff] }
 0x277   : > { %6710 = vst [vmem:[#allocation164_spill] sm:$0xff] %v5087_v22  ;;  %v1830_v14 = vadd.f32 %v4923_v16, %v1774_v63  ;;  %v978_v17 = vadd.f32 %v6714_v12, %v922_v20  ;;  %v1911_v1 = vmul.f32 %v6716_v52, %v4962_v45  ;;  %v1004_v35 = vadd.f32 %v995_v56, %v975_v55  ;;  %v3667_v46 = vld [vmem:[%s4050_s9 + $0x69] sm:$0xff]  ;;  %v3668_v16 = vld [vmem:[%s4050_s9 + $0x61] sm:$0xff]  ;;  %v6717_v20 = vld [vmem:[#allocation49_spill] sm:$0xff] }
 0x278   : > { %6711 = vst [vmem:[#allocation23_spill] sm:$0xff] %v5090_v62  ;;  %v997_v32 = vmul.f32 %v3667_v46, %v992_v61  ;;  %v996_v63 = vmul.f32 %v3668_v16, %v992_v61  ;;  %v981_v54 = vadd.f32 %v6718_v30, %v925_v43  ;;  %v6720_v12 = vld [vmem:[#allocation50_spill] sm:$0xff]  ;;  %v5118_v46 = vstv %s5065_s16  ;;  %v6726_v24 = vld [vmem:[#allocation111_spill] sm:$0xff]  ;;  %v6727_v22 = vld [vmem:[#allocation56_spill] sm:$0xff]  ;;  %s5517_s16 = sld [smem:[#allocation9 + $0x2]] }
 0x279   : > { %v920_v56 = vadd.f32 %v6720_v12, %v5020_v23  ;;  %v3670_v55 = vld [vmem:[%s4050_s9 + $0x81] sm:$0xff]  ;;  %v1007_v16 = vadd.f32 %v998_v59, %v978_v17  ;;  %v6724_v23 = vld [vmem:[#allocation53_spill] sm:$0xff]  ;;  %v1771_v62 = vmul.f32 %v6726_v24, %v4860_v26 }
 0x27a   : > { %v1000_v52 = vmul.f32 %v3670_v55, %v992_v61  ;;  %v923_v12 = vadd.f32 %v6724_v23, %v867_v50  ;;  %v974_v55 = vadd.f32 %v6725_v53, %v918_v3  ;;  %v3672_v17 = vld [vmem:[%s4050_s9 + $0x5a] sm:$0xff] }
 0x27b   : > { %v1952_v31 = vpop.permute.xlu2 %1951  ;;  %v1865_v33 = vpop.permute.xlu1 %1864 }
 0x27c   : > { %v5098_v28 = vadd.f32 %v1952_v31, %v1917_v58  ;;  %v5100_v37 = vadd.f32 %v1865_v33, %v1831_v5  ;;  %v1863_v9 = vpop.permute.xlu0 %1862  ;;  %v921_v58 = vadd.f32 %v6717_v20, %v5016_v19  ;;  %v3669_v5 = vld [vmem:[%s4050_s9 + $0x89] sm:$0x3]  ;;  %v6719_v31 = vld [vmem:[#allocation118_spill] sm:$0xff]  ;;  %v6722_v20 = vld [vmem:[#allocation108_spill] sm:$0xff] }
 0x27d   : > { %v5106_v39 = vadd.f32 %v1863_v9, %v1830_v14  ;;  %v1001_v60 = vmul.f32 %v3669_v5, %v992_v61  ;;  %v1778_v33 = vmul.f32 %v6719_v31, %v4860_v26  ;;  %v6721_v14 = vld [vmem:[#allocation121_spill] sm:$0xff]  ;;  %v1772_v30 = vmul.f32 %v6722_v20, %v4860_v26  ;;  %v6723_v31 = vld [vmem:[#allocation52_spill] sm:$0xff]  ;;  %v6728_v20 = vld [vmem:[#allocation54_spill] sm:$0xff] }
 0x27e   : > { %6715 = vst [vmem:[#allocation25_spill] sm:$0xff] %v5098_v28  ;;  %v1777_v9 = vmul.f32 %v6721_v14, %v4860_v26  ;;  %v3671_v19 = vld [vmem:[%s4050_s9 + $0x79] sm:$0xff]  ;;  %v1920_v5 = vadd.f32 %v1911_v1, %v4966_v13  ;;  %v924_v28 = vadd.f32 %v6723_v31, %v868_v40  ;;  %v973_v14 = vadd.f32 %v6727_v22, %v917_v0  ;;  %v6730_v26 = vld [vmem:[#allocation59_spill] sm:$0xff] }
 0x27f   : > { %v999_v43 = vmul.f32 %v3671_v19, %v992_v61  ;;  %v1010_v59 = vadd.f32 %v1001_v60, %v981_v54  ;;  %v1136_v61 = vmul.f32 %v3672_v17, %v5118_v46  ;;  %v1834_v19 = vadd.f32 %v4959_v29, %v1778_v33  ;;  %v6729_v13 = vld [vmem:[#allocation58_spill] sm:$0xff]  ;;  %v3673_v40 = vld [vmem:[%s4050_s9 + $0x72] sm:$0xff] }
 0x280   : > { %v1060_v44 = vadd.f32 %v6728_v20, %v1004_v35  ;;  %v977_v1 = vadd.f32 %v6729_v13, %v921_v58  ;;  %v1139_v50 = vmul.f32 %v3673_v40, %v5118_v46  ;;  %v1833_v53 = vadd.f32 %v4968_v42, %v1777_v9  ;;  %v6731_v60 = vld [vmem:[#allocation61_spill] sm:$0xff]  ;;  %v6732_v42 = vld [vmem:[#allocation62_spill] sm:$0xff] }
 0x281   : > { %v976_v24 = vadd.f32 %v6730_v26, %v920_v56  ;;  %v1828_v22 = vadd.f32 %v4864_v38, %v1772_v30  ;;  %v980_v35 = vadd.f32 %v6731_v60, %v924_v28  ;;  %v1003_v58 = vadd.f32 %v994_v10, %v974_v55  ;;  %v6733_v56 = vld [vmem:[#allocation133_spill] sm:$0xff]  ;;  %v6735_v28 = vld [vmem:[#allocation63_spill] sm:$0xff]  ;;  %v6736_v10 = vld [vmem:[#allocation136_spill] sm:$0xff] }
 0x282   : > { %v1827_v33 = vadd.f32 %v4870_v57, %v1771_v62  ;;  %v979_v9 = vadd.f32 %v6732_v42, %v923_v12  ;;  %v1002_v17 = vadd.f32 %v5081_v36, %v973_v14  ;;  %v1904_v30 = vmul.f32 %v6733_v56, %v4962_v45  ;;  %v6737_v12 = vld [vmem:[#allocation60_spill] sm:$0xff]  ;;  %v3674_v14 = vld [vmem:[%s4050_s9 + $0x8a] sm:$0x3] }
 0x283   : > { %v1958_v3 = vpop.permute.xlu2 %1957  ;;  %v1871_v31 = vpop.permute.xlu1 %1870  ;;  %v1884_v38 = vadd.f32 %v5029_v25, %v1828_v22  ;;  %v1116_v20 = vadd.f32 %v6735_v28, %v1060_v44  ;;  %v1903_v62 = vmul.f32 %v6736_v10, %v4962_v45  ;;  %v1066_v36 = vadd.f32 %v6737_v12, %v1010_v59  ;;  %v6739_v26 = vld [vmem:[#allocation64_spill] sm:$0xff]  ;;  %v6740_v59 = vld [vmem:[#allocation65_spill] sm:$0xff] }
 0x284   : > { %v5142_v0 = vadd.f32 %v1958_v3, %v1920_v5  ;;  %v5144_v54 = vadd.f32 %v1871_v31, %v1834_v19  ;;  %v1869_v29 = vpop.permute.xlu0 %1868  ;;  %v6734_v5 = vld [vmem:[#allocation57_spill] sm:$0xff]  ;;  %v1883_v57 = vadd.f32 %v5039_v8, %v1827_v33  ;;  %v1006_v55 = vadd.f32 %v997_v32, %v977_v1  ;;  %v3676_v3 = vld [vmem:[%s4050_s9 + $0x4a] sm:$0xff]  ;;  %v3678_v33 = vld [vmem:[%s4050_s9 + $0x62] sm:$0xff] }
 0x285   : > { %v5148_v23 = vadd.f32 %v1869_v29, %v1833_v53  ;;  %v1063_v19 = vadd.f32 %v6734_v5, %v1007_v16  ;;  %v1005_v25 = vadd.f32 %v996_v63, %v976_v24  ;;  %v1142_v13 = vmul.f32 %v3674_v14, %v5118_v46  ;;  %v6738_v16 = vld [vmem:[#allocation66_spill] sm:$0xff]  ;;  %v3675_v53 = vld [vmem:[%s4050_s9 + $0x52] sm:$0xff]  ;;  %v3677_v29 = vld [vmem:[%s4050_s9 + $0x6a] sm:$0xff] }
 0x286   : > { %v1009_v40 = vadd.f32 %v1000_v52, %v980_v35  ;;  %v1135_v8 = vmul.f32 %v3675_v53, %v5118_v46  ;;  %v1134_v31 = vmul.f32 %v3676_v3, %v5118_v46  ;;  %v1059_v32 = vadd.f32 %v6739_v26, %v1003_v58  ;;  %v6741_v5 = vld [vmem:[#allocation67_spill] sm:$0xff]  ;;  %v6742_v58 = vld [vmem:[#allocation68_spill] sm:$0xff] }
 0x287   : > { %v1119_v44 = vadd.f32 %v6738_v16, %v1063_v19  ;;  %v1058_v63 = vadd.f32 %v6740_v59, %v1002_v17  ;;  %v1008_v1 = vadd.f32 %v999_v43, %v979_v9  ;;  %v1913_v24 = vadd.f32 %v1904_v30, %v1884_v38  ;;  %v3679_v43 = vld [vmem:[%s4050_s9 + $0x82] sm:$0xff]  ;;  %v6743_v30 = vld [vmem:[#allocation69_spill] sm:$0xff] }
 0x288   : > { %v1145_v22 = vadd.f32 %v1136_v61, %v1116_v20  ;;  %v1138_v60 = vmul.f32 %v3677_v29, %v5118_v46  ;;  %v1137_v52 = vmul.f32 %v3678_v33, %v5118_v46  ;;  %v1912_v56 = vadd.f32 %v1903_v62, %v1883_v57  ;;  %v6744_v20 = vld [vmem:[#allocation73_spill] sm:$0xff]  ;;  %v6745_v57 = vld [vmem:[#allocation72_spill] sm:$0xff]  ;;  %v6748_v3 = vld [vmem:[#allocation139_spill] sm:$0xff] }
 0x289   : > { %v1062_v19 = vadd.f32 %v6741_v5, %v1006_v55  ;;  %v1061_v17 = vadd.f32 %v6742_v58, %v1005_v25  ;;  %v1141_v61 = vmul.f32 %v3679_v43, %v5118_v46  ;;  %v1122_v28 = vadd.f32 %v6743_v30, %v1066_v36  ;;  %v6746_v55 = vld [vmem:[#allocation74_spill] sm:$0xff]  ;;  %v6747_v25 = vld [vmem:[#allocation76_spill] sm:$0xff]  ;;  %v6749_v59 = vld [vmem:[#allocation75_spill] sm:$0xff] }
 0x28a   : > { %v1115_v10 = vadd.f32 %v6744_v20, %v1059_v32  ;;  %v1148_v12 = vadd.f32 %v1139_v50, %v1119_v44  ;;  %v1201_v62 = vadd.f32 %v6745_v57, %v1145_v22  ;;  %v1114_v16 = vadd.f32 %v6746_v55, %v1058_v63  ;;  %v6750_v29 = vld [vmem:[#allocation77_spill] sm:$0xff]  ;;  %v6751_v50 = vld [vmem:[#allocation142_spill] sm:$0xff]  ;;  %v6754_v58 = vld [vmem:[#allocation71_spill] sm:$0xff] }
 0x28b   : > { %v5180_v35 = vpop.permute.xlu2 %2001  ;;  %v1944_v42 = vpop.permute.xlu1 %1943  ;;  %v1118_v53 = vadd.f32 %v6747_v25, %v1062_v19  ;;  %v1907_v26 = vmul.f32 %v6748_v3, %v4962_v45  ;;  %v1117_v33 = vadd.f32 %v6750_v29, %v1061_v17  ;;  %v1906_v44 = vmul.f32 %v6751_v50, %v4962_v45  ;;  %v6752_v32 = vld [vmem:[#allocation70_spill] sm:$0xff]  ;;  %v6753_v5 = vld [vmem:[#allocation81_spill] sm:$0xff]  ;;  %v6755_v17 = vld [vmem:[#allocation84_spill] sm:$0xff] }
 0x28c   : > { %v5186_v9 = vadd.f32 %v1944_v42, %v1913_v24  ;;  %v1942_v38 = vpop.permute.xlu0 %1941  ;;  %v1204_v24 = vadd.f32 %v6749_v59, %v1148_v12  ;;  %v3680_v42 = vld [vmem:[%s4050_s9 + $0x7a] sm:$0xff]  ;;  %v1065_v22 = vadd.f32 %v6752_v32, %v1009_v40  ;;  %v5208_v63 = vstv %s5165_s1  ;;  %v6756_v12 = vld [vmem:[#allocation79_spill] sm:$0xff]  ;;  %v6757_v40 = vld [vmem:[#allocation80_spill] sm:$0xff]  ;;  %s3481_s1 = sld [smem:[#allocation9 + $0xa]] }
 0x28d   : > { %v5190_v14 = vadd.f32 %v1942_v38, %v1912_v56  ;;  %v1140_v36 = vmul.f32 %v3680_v42, %v5118_v46  ;;  %v5205_v56 = vstv %s5157_s19  ;;  %v1257_v19 = vadd.f32 %v6753_v5, %v1201_v62  ;;  %v6762_v32 = vld [vmem:[#allocation145_spill] sm:$0xff]  ;;  %v6763_v5 = vld [vmem:[#allocation83_spill] sm:$0xff]  ;;  %s3480_s19 = sld [smem:[#allocation9 + $0x8]] }
 0x28e   : > { %v1064_v43 = vadd.f32 %v6754_v58, %v1008_v1  ;;  %v1151_v38 = vadd.f32 %v1142_v13, %v1122_v28  ;;  %v1144_v30 = vadd.f32 %v1135_v8, %v1115_v10  ;;  %v1260_v20 = vadd.f32 %v6755_v17, %v1204_v24  ;;  %v6758_v8 = vld [vmem:[#allocation78_spill] sm:$0xff] }
 0x28f   : > { %v1121_v46 = vadd.f32 %v6756_v12, %v1065_v22  ;;  %v1143_v57 = vadd.f32 %v1134_v31, %v1114_v16  ;;  %v1147_v55 = vadd.f32 %v1138_v60, %v1118_v53  ;;  %v1916_v25 = vadd.f32 %v1907_v26, %v5100_v37  ;;  %v6759_v37 = vld [vmem:[#allocation82_spill] sm:$0xff] }
 0x290   : > { %v1120_v3 = vadd.f32 %v6757_v40, %v1064_v43  ;;  %v1146_v59 = vadd.f32 %v1137_v52, %v1117_v33  ;;  %v5217_v29 = vstv %s5178_s2  ;;  %v1915_v13 = vadd.f32 %v1906_v44, %v5106_v39  ;;  %v3681_v53 = vld [vmem:[%s4050_s9 + $0xa0] sm:$0xff]  ;;  %v6761_v33 = vld [vmem:[#allocation87_spill] sm:$0xff]  ;;  %s3483_s2 = sld [smem:[#allocation9 + $0xe]] }
 0x291   : > { %v1207_v1 = vadd.f32 %v6758_v8, %v1151_v38  ;;  %v1268_v28 = vmul.f32 %v5205_v56, %v1257_v19  ;;  %v1288_v31 = vmul.f32 %v5208_v63, %v1257_v19  ;;  %v1200_v16 = vadd.f32 %v6759_v37, %v1144_v30  ;;  %v6764_v43 = vld [vmem:[#allocation91_spill] sm:$0xff]  ;;  %v6765_v30 = vld [vmem:[#allocation148_spill] sm:$0xff] }
 0x292   : > { %v1271_v52 = vmul.f32 %v5205_v56, %v1260_v20  ;;  %v1318_v26 = vmul.f32 %v3681_v53, %v5217_v29  ;;  %v1291_v39 = vmul.f32 %v5208_v63, %v1260_v20  ;;  %v1150_v44 = vadd.f32 %v1141_v61, %v1121_v46  ;;  %v3682_v20 = vld [vmem:[%s4050_s9 + $0xb8] sm:$0xff]  ;;  %v3683_v46 = vld [vmem:[%s4050_s9 + $0xd0] sm:$0x3]  ;;  %v6770_v53 = vld [vmem:[#allocation94_spill] sm:$0xff] }
 0x293   : > { %v5219_v42 = vpop.permute.xlu2 %2007  ;;  %v1950_v62 = vpop.permute.xlu1 %1949  ;;  %v1263_v50 = vadd.f32 %v6761_v33, %v1207_v1  ;;  %v1910_v22 = vmul.f32 %v6762_v32, %v4962_v45  ;;  %v1199_v19 = vadd.f32 %v6763_v5, %v1143_v57  ;;  %v1149_v58 = vadd.f32 %v1140_v36, %v1120_v3  ;;  %v6766_v57 = vld [vmem:[#allocation85_spill] sm:$0xff]  ;;  %v6771_v33 = vld [vmem:[#allocation95_spill] sm:$0xff]  ;;  %v3685_v5 = vld [vmem:[%s4050_s9 + $0x90] sm:$0xff] }
 0x294   : > { %v5225_v10 = vadd.f32 %v1950_v62, %v1916_v25  ;;  %v1948_v60 = vpop.permute.xlu0 %1947  ;;  %v1256_v38 = vadd.f32 %v6764_v43, %v1200_v16  ;;  %v1909_v17 = vmul.f32 %v6765_v30, %v4962_v45  ;;  %v5242_v12 = vadd.f32 %v1268_v28, %v4973_v21  ;;  %v6767_v62 = vld [vmem:[#allocation86_spill] sm:$0xff]  ;;  %v6774_v30 = vld [vmem:[#allocation89_spill] sm:$0xff] }
 0x295   : > { %v5231_v24 = vadd.f32 %v1948_v60, %v1915_v13  ;;  %v5245_v25 = vadd.f32 %v1288_v31, %v4981_v7  ;;  %v1321_v61 = vmul.f32 %v3682_v20, %v5217_v29  ;;  %v1324_v40 = vmul.f32 %v3683_v46, %v5217_v29  ;;  %v6768_v13 = vld [vmem:[#allocation92_spill] sm:$0xff]  ;;  %v3684_v60 = vld [vmem:[%s4050_s9 + $0x98] sm:$0xff] }
 0x296   : > { %v5252_v36 = vadd.f32 %v1271_v52, %v4991_v48  ;;  %v1203_v3 = vadd.f32 %v6766_v57, %v1147_v55  ;;  %v1202_v45 = vadd.f32 %v6767_v62, %v1146_v59  ;;  %v1255_v21 = vadd.f32 %v6768_v13, %v1199_v19  ;;  %v6769_v48 = vld [vmem:[#allocation88_spill] sm:$0xff]  ;;  %v6775_v20 = vld [vmem:[#allocation97_spill] sm:$0xff]  ;;  %v6776_v57 = vld [vmem:[#allocation90_spill] sm:$0xff] }
 0x297   : > { %6760 = vst [vmem:[#allocation166_spill] sm:$0xff] %v5231_v24  ;;  %v5258_v8 = vadd.f32 %v1291_v39, %v4997_v47  ;;  %v1274_v7 = vmul.f32 %v5205_v56, %v1263_v50  ;;  %v1294_v1 = vmul.f32 %v5208_v63, %v1263_v50  ;;  %v1919_v28 = vadd.f32 %v1910_v22, %v5144_v54 }
 0x298   : > { %v1206_v31 = vadd.f32 %v6769_v48, %v1150_v44  ;;  %v1267_v55 = vmul.f32 %v5205_v56, %v1256_v38  ;;  %v5269_v59 = vmul.f32 %v3684_v60, %v5217_v29  ;;  %v1918_v16 = vadd.f32 %v1909_v17, %v5148_v23 }
 0x299   : > { %v1287_v52 = vmul.f32 %v5208_v63, %v1256_v38  ;;  %v1259_v39 = vadd.f32 %v6770_v53, %v1203_v3  ;;  %v1258_v54 = vadd.f32 %v6771_v33, %v1202_v45  ;;  %v1266_v32 = vmul.f32 %v5205_v56, %v1255_v21  ;;  %v3686_v45 = vld [vmem:[%s4050_s9 + $0xb0] sm:$0xff]  ;;  %v3689_v33 = vld [vmem:[%s4050_s9 + $0xa1] sm:$0xff] }
 0x29a   : > { %v1286_v22 = vmul.f32 %v5208_v63, %v1255_v21  ;;  %v1316_v19 = vmul.f32 %v3685_v5, %v5217_v29  ;;  %v5286_v23 = vadd.f32 %v1274_v7, %v5009_v27  ;;  %v5289_v38 = vadd.f32 %v1294_v1, %v5012_v49  ;;  %v3687_v21 = vld [vmem:[%s4050_s9 + $0xa8] sm:$0xff] }
 0x29b   : > { %v5271_v37 = vpop.permute.xlu2 %2013  ;;  %v1956_v47 = vpop.permute.xlu1 %1955  ;;  %v1205_v17 = vadd.f32 %v6774_v30, %v1149_v58  ;;  %v1262_v46 = vadd.f32 %v6775_v20, %v1206_v31  ;;  %v1374_v3 = vadd.f32 %v6776_v57, %v1318_v26  ;;  %v5295_v62 = vadd.f32 %v1267_v55, %v5025_v18  ;;  %v6778_v55 = vld [vmem:[#allocation98_spill] sm:$0xff] }
 0x29c   : > { %v5277_v50 = vadd.f32 %v1956_v47, %v1919_v28  ;;  %v1954_v44 = vpop.permute.xlu0 %1953  ;;  %v1320_v13 = vmul.f32 %v3686_v45, %v5217_v29  ;;  %v1319_v27 = vmul.f32 %v3687_v21, %v5217_v29  ;;  %v5302_v49 = vadd.f32 %v1287_v52, %v5032_v15  ;;  %v6777_v28 = vld [vmem:[#allocation93_spill] sm:$0xff]  ;;  %v3688_v47 = vld [vmem:[%s4050_s9 + $0xc8] sm:$0xff]  ;;  %v3690_v30 = vld [vmem:[%s4050_s9 + $0xc0] sm:$0xff] }
 0x29d   : > { %v5283_v43 = vadd.f32 %v1954_v44, %v1918_v16  ;;  %v1270_v58 = vmul.f32 %v5205_v56, %v1259_v39  ;;  %v1290_v7 = vmul.f32 %v5208_v63, %v1259_v39  ;;  %v1269_v26 = vmul.f32 %v5205_v56, %v1258_v54  ;;  %v6780_v39 = vld [vmem:[#allocation99_spill] sm:$0xff]  ;;  %v6781_v57 = vld [vmem:[#allocation102_spill] sm:$0xff] }
 0x29e   : > { %6772 = vst [vmem:[#allocation20_spill] sm:$0xff] %v5277_v50  ;;  %v5308_v18 = vadd.f32 %v1266_v32, %v5035_v34  ;;  %v5311_v1 = vadd.f32 %v1286_v22, %v5044_v41  ;;  %v1377_v48 = vadd.f32 %v6777_v28, %v1321_v61  ;;  %v1289_v31 = vmul.f32 %v5208_v63, %v1258_v54  ;;  %v6779_v34 = vld [vmem:[#allocation96_spill] sm:$0xff]  ;;  %v3691_v45 = vld [vmem:[%s4050_s9 + $0xb9] sm:$0xff]  ;;  %v6783_v28 = vld [vmem:[#allocation163_spill] sm:$0xff] }
 0x29f   : > { %6773 = vst [vmem:[#allocation26_spill] sm:$0xff] %v5283_v43  ;;  %v1273_v15 = vmul.f32 %v5205_v56, %v1262_v46  ;;  %v1261_v60 = vadd.f32 %v6778_v55, %v1205_v17  ;;  %v1323_v16 = vmul.f32 %v3688_v47, %v5217_v29  ;;  %v1447_v52 = vstv %s5262_s13  ;;  %v3692_v21 = vld [vmem:[%s4050_s9 + $0x99] sm:$0xff]  ;;  %v3694_v47 = vld [vmem:[%s4050_s9 + $0xd1] sm:$0x3]  ;;  %v6823_v50 = vld [vmem:[#allocation131_spill] sm:$0xff]  ;;  %s2293_s13 = sld [smem:[#allocation9]] }
 0x2a0   : > { %v1380_v53 = vadd.f32 %v6779_v34, %v1324_v40  ;;  %v1293_v41 = vmul.f32 %v5208_v63, %v1262_v46  ;;  %v1430_v61 = vadd.f32 %v6780_v39, %v1374_v3  ;;  %v1450_v54 = vmul.f32 %v3689_v33, %v1447_v52  ;;  %v6786_v39 = vld [vmem:[#allocation100_spill] sm:$0xff] }
 0x2a1   : > { %v5331_v22 = vadd.f32 %v1270_v58, %v5057_v11  ;;  %v5334_v5 = vadd.f32 %v1290_v7, %v5060_v51  ;;  %v5337_v40 = vadd.f32 %v1269_v26, %v5063_v6  ;;  %v1322_v17 = vmul.f32 %v3690_v30, %v5217_v29  ;;  %v3693_v7 = vld [vmem:[%s4050_s9 + $0x91] sm:$0xff] }
 0x2a2   : > { %v5344_v46 = vadd.f32 %v1289_v31, %v5070_v4  ;;  %v1433_v3 = vadd.f32 %v6781_v57, %v1377_v48  ;;  %v1453_v11 = vmul.f32 %v3691_v45, %v1447_v52  ;;  %v1449_v51 = vmul.f32 %v3692_v21, %v1447_v52  ;;  %v6785_v31 = vld [vmem:[#allocation105_spill] sm:$0xff]  ;;  %v3696_v57 = vld [vmem:[%s4050_s9 + $0xa9] sm:$0xff] }
 0x2a3   : > { %v5326_v44 = vpop.permute.xlu2 %2086  ;;  %v5328_v32 = vpop.permute.xlu1 %1999  ;;  %v5350_v6 = vadd.f32 %v1273_v15, %v5076_v2  ;;  %v1272_v58 = vmul.f32 %v5205_v56, %v1261_v60  ;;  %v1292_v29 = vmul.f32 %v5208_v63, %v1261_v60  ;;  %v1448_v26 = vmul.f32 %v3693_v7, %v1447_v52  ;;  %v6787_v2 = vld [vmem:[#allocation101_spill] sm:$0xff]  ;;  %v6788_v60 = vld [vmem:[#allocation103_spill] sm:$0xff]  ;;  %v6789_v21 = vld [vmem:[#allocation104_spill] sm:$0xff] }
 0x2a4   : > { %v5341_v20 = vpop.permute.xlu0 %1997  ;;  %v5356_v4 = vadd.f32 %v1293_v41, %v6783_v28  ;;  %v1436_v48 = vadd.f32 %v6785_v31, %v1380_v53  ;;  %v1459_v55 = vadd.f32 %v1450_v54, %v1430_v61  ;;  %v1456_v34 = vmul.f32 %v3694_v47, %v1447_v52  ;;  %v3695_v30 = vld [vmem:[%s4050_s9 + $0xb1] sm:$0xff]  ;;  %v6790_v7 = vld [vmem:[#allocation106_spill] sm:$0xff]  ;;  %v6791_v54 = vld [vmem:[#allocation107_spill] sm:$0xff] }
 0x2a5   : > { %6782 = vst [vmem:[#allocation160_spill] sm:$0xff] %v5350_v6  ;;  %v1373_v33 = vadd.f32 %v6786_v39, %v5269_v59  ;;  %v1372_v15 = vadd.f32 %v6787_v2, %v1316_v19  ;;  %v1452_v56 = vmul.f32 %v3695_v30, %v1447_v52  ;;  %v1451_v63 = vmul.f32 %v3696_v57, %v1447_v52  ;;  %v6792_v59 = vld [vmem:[#allocation110_spill] sm:$0xff]  ;;  %v6793_v19 = vld [vmem:[#allocation112_spill] sm:$0xff]  ;;  %v6794_v2 = vld [vmem:[#allocation109_spill] sm:$0xff] }
 0x2a6   : > { %6784 = vst [vmem:[#allocation170_spill] sm:$0xff] %v5356_v4  ;;  %v1376_v45 = vadd.f32 %v6788_v60, %v1320_v13  ;;  %v1375_v41 = vadd.f32 %v6789_v21, %v1319_v27  ;;  %v1379_v53 = vadd.f32 %v6790_v7, %v1323_v16  ;;  %v1462_v61 = vadd.f32 %v1453_v11, %v1433_v3  ;;  %v6795_v57 = vld [vmem:[#allocation115_spill] sm:$0xff]  ;;  %v6796_v27 = vld [vmem:[#allocation117_spill] sm:$0xff]  ;;  %v6797_v11 = vld [vmem:[#allocation120_spill] sm:$0xff] }
 0x2a7   : > { %v1378_v28 = vadd.f32 %v6791_v54, %v1322_v17  ;;  %v1429_v31 = vadd.f32 %v6792_v59, %v1373_v33  ;;  %v1428_v47 = vadd.f32 %v6793_v19, %v1372_v15  ;;  %v1588_v39 = vstv %s5320_s20  ;;  %v6798_v7 = vld [vmem:[#allocation122_spill] sm:$0xff]  ;;  %v3697_v54 = vld [vmem:[%s4050_s9 + $0xc9] sm:$0xff]  ;;  %s3484_s20 = sld [smem:[#allocation9 + $0x10]] }
 0x2a8   : > { %v1515_v30 = vadd.f32 %v6794_v2, %v1459_v55  ;;  %v1432_v13 = vadd.f32 %v6795_v57, %v1376_v45  ;;  %v1431_v60 = vadd.f32 %v6796_v27, %v1375_v41  ;;  %v1465_v21 = vadd.f32 %v1456_v34, %v1436_v48  ;;  %v3698_v59 = vld [vmem:[%s4050_s9 + $0xc1] sm:$0xff]  ;;  %v6800_v45 = vld [vmem:[#allocation164_spill] sm:$0xff] }
 0x2a9   : > { %v1435_v17 = vadd.f32 %v6797_v11, %v1379_v53  ;;  %v1434_v33 = vadd.f32 %v6798_v7, %v1378_v28  ;;  %v1455_v15 = vmul.f32 %v3697_v54, %v1447_v52  ;;  %v1454_v19 = vmul.f32 %v3698_v59, %v1447_v52  ;;  %v6802_v48 = vld [vmem:[#allocation23_spill] sm:$0xff]  ;;  %v6805_v11 = vld [vmem:[#allocation114_spill] sm:$0xff] }
 0x2aa   : > { %v5388_v2 = vadd.f32 %v1272_v58, %v6800_v45  ;;  %v5391_v34 = vadd.f32 %v1292_v29, %v6802_v48  ;;  %v6804_v41 = vld [vmem:[#allocation123_spill] sm:$0xff]  ;;  %v1518_v28 = vadd.f32 %v6805_v11, %v1462_v61  ;;  %v1458_v7 = vadd.f32 %v1449_v51, %v1429_v31  ;;  %v3700_v52 = vld [vmem:[%s4050_s9 + $0xba] sm:$0xff]  ;;  %v3701_v48 = vld [vmem:[%s4050_s9 + $0xd2] sm:$0x3] }
 0x2ab   : > { %v5377_v16 = vpop.permute.xlu2 %2092  ;;  %v5379_v3 = vpop.permute.xlu1 %2005  ;;  %v1571_v57 = vadd.f32 %v6804_v41, %v1515_v30  ;;  %v3699_v27 = vld [vmem:[%s4050_s9 + $0xa2] sm:$0xff]  ;;  %v1457_v54 = vadd.f32 %v1448_v26, %v1428_v47  ;;  %v1594_v59 = vmul.f32 %v3700_v52, %v1588_v39  ;;  %v1461_v45 = vadd.f32 %v1452_v56, %v1432_v13  ;;  %v3703_v26 = vld [vmem:[%s4050_s9 + $0x92] sm:$0xff] }
 0x2ac   : > { %v5385_v55 = vpop.permute.xlu0 %2003  ;;  %6801 = vst [vmem:[#allocation27_spill] sm:$0xff] %v5388_v2  ;;  %v1591_v53 = vmul.f32 %v3699_v27, %v1588_v39  ;;  %v6806_v4 = vld [vmem:[#allocation119_spill] sm:$0xff]  ;;  %v1460_v29 = vadd.f32 %v1451_v63, %v1431_v60  ;;  %v1597_v30 = vmul.f32 %v3701_v48, %v1588_v39  ;;  %v1464_v41 = vadd.f32 %v1455_v15, %v1435_v17  ;;  %v3702_v27 = vld [vmem:[%s4050_s9 + $0x9a] sm:$0xff]  ;;  %v6807_v47 = vld [vmem:[#allocation124_spill] sm:$0xff] }
 0x2ad   : > { %6799 = vst [vmem:[#allocation21_spill] sm:$0xff] %v5385_v55  ;;  %v1521_v58 = vadd.f32 %v6806_v4, %v1465_v21  ;;  %v1463_v61 = vadd.f32 %v1454_v19, %v1434_v33  ;;  %v1590_v51 = vmul.f32 %v3702_v27, %v1588_v39  ;;  %v1589_v31 = vmul.f32 %v3703_v26, %v1588_v39  ;;  %v6808_v52 = vld [vmem:[#allocation126_spill] sm:$0xff]  ;;  %v6809_v56 = vld [vmem:[#allocation125_spill] sm:$0xff]  ;;  %v6810_v13 = vld [vmem:[#allocation127_spill] sm:$0xff] }
 0x2ae   : > { %6803 = vst [vmem:[#allocation24_spill] sm:$0xff] %v5391_v34  ;;  %v1514_v11 = vadd.f32 %v6807_v47, %v1458_v7  ;;  %v1574_v34 = vadd.f32 %v6808_v52, %v1518_v28  ;;  %v1600_v2 = vadd.f32 %v1591_v53, %v1571_v57  ;;  %v5408_v4 = vstv %s5368_s23  ;;  %v3704_v21 = vld [vmem:[%s4050_s9 + $0xb2] sm:$0xff]  ;;  %v3705_v33 = vld [vmem:[%s4050_s9 + $0xaa] sm:$0xff]  ;;  %v6813_v28 = vld [vmem:[#allocation134_spill] sm:$0xff]  ;;  %s3488_s23 = sld [smem:[#allocation9 + $0x3]] }
 0x2af   : > { %v1513_v63 = vadd.f32 %v6809_v56, %v1457_v54  ;;  %v1517_v60 = vadd.f32 %v6810_v13, %v1461_v45  ;;  %v1593_v17 = vmul.f32 %v3704_v21, %v1588_v39  ;;  %v1592_v15 = vmul.f32 %v3705_v33, %v1588_v39  ;;  %v6811_v19 = vld [vmem:[#allocation128_spill] sm:$0xff]  ;;  %v6812_v7 = vld [vmem:[#allocation129_spill] sm:$0xff]  ;;  %v6814_v53 = vld [vmem:[#allocation135_spill] sm:$0xff] }
 0x2b0   : > { %v1516_v48 = vadd.f32 %v6811_v19, %v1460_v29  ;;  %v1577_v27 = vadd.f32 %v6812_v7, %v1521_v58  ;;  %v1656_v57 = vadd.f32 %v6813_v28, %v1600_v2  ;;  %v1570_v26 = vadd.f32 %v6814_v53, %v1514_v11  ;;  %v3706_v45 = vld [vmem:[%s4050_s9 + $0xca] sm:$0xff]  ;;  %v3707_v56 = vld [vmem:[%s4050_s9 + $0xc2] sm:$0xff]  ;;  %v6819_v11 = vld [vmem:[#allocation137_spill] sm:$0xff] }
 0x2b1   : > { %v1596_v52 = vmul.f32 %v3706_v45, %v1588_v39  ;;  %v1595_v13 = vmul.f32 %v3707_v56, %v1588_v39  ;;  %v6816_v21 = vld [vmem:[#allocation22_spill] sm:$0xff]  ;;  %v6817_v58 = vld [vmem:[#allocation159_spill] sm:$0xff]  ;;  %v1569_v19 = vadd.f32 %v6819_v11, %v1513_v63  ;;  %v1603_v7 = vadd.f32 %v1594_v59, %v1574_v34  ;;  %v6820_v28 = vld [vmem:[#allocation141_spill] sm:$0xff] }
 0x2b2   : > { %v2026_v29 = vadd.f32 %v5180_v35, %v6816_v21  ;;  %v2046_v2 = vmul.f32 %v6817_v58, %v5408_v4  ;;  %v1573_v53 = vadd.f32 %v6820_v28, %v1517_v60  ;;  %v6821_v6 = vld [vmem:[#allocation150_spill] sm:$0xff]  ;;  %v1519_v55 = vadd.f32 %v6823_v50, %v1463_v61  ;;  %v6824_v39 = vld [vmem:[#allocation143_spill] sm:$0xff]  ;;  %v6825_v35 = vld [vmem:[#allocation140_spill] sm:$0xff] }
 0x2b3   : > { %v5420_v47 = vpop.permute.xlu2 %2098  ;;  %v5422_v54 = vpop.permute.xlu1 %2011  ;;  %v1712_v43 = vadd.f32 %v6821_v6, %v1656_v57  ;;  %v1572_v56 = vadd.f32 %v6824_v39, %v1516_v48  ;;  %v5441_v24 = vstv %s5397_s15  ;;  %v1659_v21 = vadd.f32 %v6825_v35, %v1603_v7  ;;  %v6826_v6 = vld [vmem:[#allocation147_spill] sm:$0xff]  ;;  %v6828_v57 = vld [vmem:[#allocation153_spill] sm:$0xff]  ;;  %s3479_s15 = sld [smem:[#allocation9 + $0x6]] }
 0x2b4   : > { %6815 = vst [vmem:[#allocation30_spill] sm:$0xff] %v5422_v54  ;;  %v5432_v33 = vpop.permute.xlu0 %2009  ;;  %v6822_v54 = vld [vmem:[#allocation130_spill] sm:$0xff]  ;;  %v1606_v58 = vadd.f32 %v1597_v30, %v1577_v27  ;;  %v1599_v34 = vadd.f32 %v1590_v51, %v1570_v26  ;;  %v2055_v61 = vadd.f32 %v2046_v2, %v2026_v29  ;;  %v354_v63 = vlaneseq  ;;  %v6830_v28 = vld [vmem:[#allocation25_spill] sm:$0xff] }
 0x2b5   : > { %6818 = vst [vmem:[#allocation28_spill] sm:$0xff] %v5432_v33  ;;  %v1520_v45 = vadd.f32 %v6822_v54, %v1464_v41  ;;  %v5447_v33 = vstv %s5401_s18  ;;  %v6827_v41 = vld [vmem:[#allocation149_spill] sm:$0xff]  ;;  %v1723_v60 = vmul.f32 %v5441_v24, %v1712_v43  ;;  %v1598_v48 = vadd.f32 %v1589_v31, %v1569_v19  ;;  %v6829_v27 = vld [vmem:[#allocation146_spill] sm:$0xff]  ;;  %s3489_s18 = sld [smem:[#allocation9 + $0x5]] }
 0x2b6   : > { %v1575_v50 = vadd.f32 %v6827_v41, %v1519_v55  ;;  %v1715_v54 = vadd.f32 %v6828_v57, %v1659_v21  ;;  %v1602_v30 = vadd.f32 %v1593_v17, %v1573_v53  ;;  %v1662_v11 = vadd.f32 %v6829_v27, %v1606_v58  ;;  %v3708_v39 = vld [vmem:[%s4050_s9 + $0x102] sm:$0xff]  ;;  %v6832_v41 = vld [vmem:[#allocation156_spill] sm:$0xff] }
 0x2b7   : > { %v1576_v59 = vadd.f32 %v6826_v6, %v1520_v45  ;;  %v1743_v51 = vmul.f32 %v5447_v33, %v1712_v43  ;;  %v1601_v26 = vadd.f32 %v1592_v15, %v1572_v56  ;;  %v2111_v7 = vadd.f32 %v5326_v44, %v2055_v61  ;;  %v6831_v56 = vld [vmem:[#allocation151_spill] sm:$0xff] }
 0x2b8   : > { %v2029_v45 = vadd.f32 %v5219_v42, %v6830_v28  ;;  %v2049_v55 = vmul.f32 %v3708_v39, %v5408_v4  ;;  %v5463_v29 = vstv %s5414_s21  ;;  %v5466_v2 = vstv %s5424_s22  ;;  %s3491_s21 = sld [smem:[#allocation9 + $0x9]] }
 0x2b9   : > { %v1605_v17 = vadd.f32 %v1596_v52, %v1576_v59  ;;  %v1604_v43 = vadd.f32 %v1595_v13, %v1575_v50  ;;  %v5470_v15 = vand.u32 127, %v354_v63  ;;  %v1732_v42 = vadd.f32 %v1723_v60, %v5242_v12  ;;  %v6833_v59 = vld [vmem:[#allocation152_spill] sm:$0xff]  ;;  %s3482_s22 = sld [smem:[#allocation9 + $0xc]] }
 0x2ba   : > { %v1655_v35 = vadd.f32 %v6831_v56, %v1599_v34  ;;  %v1726_v21 = vmul.f32 %v5441_v24, %v1715_v54  ;;  %v1746_v58 = vmul.f32 %v5447_v33, %v1715_v54  ;;  %v1752_v6 = vadd.f32 %v1743_v51, %v5245_v25  ;;  %v3709_v56 = vld [vmem:[%s4050_s9 + $0x11a] sm:$0x3] }
 0x2bb   : > { %v2143_v31 = vpop.permute.xlu2 %2142  ;;  %v5468_v19 = vpop.permute.xlu1 %2084  ;;  %v1718_v61 = vadd.f32 %v6832_v41, %v1662_v11  ;;  %v1654_v50 = vadd.f32 %v6833_v59, %v1598_v48  ;;  %v2058_v57 = vadd.f32 %v2049_v55, %v2029_v45  ;;  %v5484_v27 = vstv %s5443_s29  ;;  %v6834_v11 = vld [vmem:[#allocation154_spill] sm:$0xff]  ;;  %v6839_v41 = vld [vmem:[#allocation157_spill] sm:$0xff]  ;;  %s3492_s29 = sld [smem:[#allocation9 + $0xb]] }
 0x2bc   : > { %v2167_v44 = vadd.f32 %v2143_v31, %v2111_v7  ;;  %v5472_v53 = vpop.permute.xlu0 %2082  ;;  %v5487_v12 = vstv %s5449_s8  ;;  %vm393_vm0 = vcmp.eq.s32.totalorder %v5470_v15, 0  ;;  %vm403_vm1 = vcmp.eq.s32.totalorder %v5470_v15, 65  ;;  %v6835_v7 = vld [vmem:[#allocation155_spill] sm:$0xff]  ;;  %v6841_v59 = vld [vmem:[#allocation165_spill] sm:$0xff]  ;;  %s3494_s8 = sld [smem:[#allocation9 + $0xf]] }
 0x2bd   : > { %v1735_v60 = vadd.f32 %v1726_v21, %v5252_v36  ;;  %v1755_v54 = vadd.f32 %v1746_v58, %v5258_v8  ;;  %v1658_v51 = vadd.f32 %v6834_v11, %v1602_v30  ;;  %v1657_v48 = vadd.f32 %v6835_v7, %v1601_v26  ;;  %vm5507_vm2 = vmor %vm393_vm0, %vm403_vm1 }
 0x2be   : > { %v2178_v52 = vmul.f32 %v5463_v29, %v2167_v44  ;;  %v2198_v13 = vmul.f32 %v5466_v2, %v2167_v44  ;;  %v1729_v28 = vmul.f32 %v5441_v24, %v1718_v61  ;;  %v2114_v45 = vadd.f32 %v5377_v16, %v2058_v57  ;;  %v6836_v44 = vld [vmem:[#allocation161_spill] sm:$0xff] }
 0x2bf   : > { %v1749_v31 = vmul.f32 %v5447_v33, %v1718_v61  ;;  %v2052_v36 = vmul.f32 %v3709_v56, %v5408_v4  ;;  %v2032_v26 = vadd.f32 %v5271_v37, %v5142_v0  ;;  %v5520_v61 = vadd.f32 %v6839_v41, %v1605_v17 }
 0x2c0   : > { %v2187_v34 = vadd.f32 %v2178_v52, %v1732_v42  ;;  %v2207_v25 = vadd.f32 %v2198_v13, %v1752_v6  ;;  %v1711_v42 = vadd.f32 %v6836_v44, %v1655_v35  ;;  %v6840_v52 = vld [vmem:[#allocation162_spill] sm:$0xff]  ;;  %v1714_v57 = vadd.f32 %v6841_v59, %v1658_v51  ;;  %v6843_v51 = vld [vmem:[#allocation167_spill] sm:$0xff] }
 0x2c1   : > { %v1710_v13 = vadd.f32 %v6840_v52, %v1654_v50  ;;  %v1738_v7 = vadd.f32 %v1729_v28, %v5286_v23  ;;  %v1758_v17 = vadd.f32 %v1749_v31, %v5289_v38  ;;  %v5560_v59 = vstv %s5517_s16  ;;  %s3487_s16 = sld [smem:[#allocation9 + $0x1]] }
 0x2c2   : > { %v2218_v39 = vadd.f32 %v5484_v27, %v2187_v34  ;;  %v2258_v55 = vadd.f32 %v5487_v12, %v2207_v25  ;;  %v5524_v34 = vshrl.u32 %v354_v63, 7  ;;  %v1713_v63 = vadd.f32 %v6843_v51, %v1657_v48 }
 0x2c3   : > { %v2149_v16 = vpop.permute.xlu2 %2148  ;;  %v5511_v30 = vpop.permute.xlu1 %2090  ;;  %v1721_v23 = vmul.f32 %v5441_v24, %v1710_v13  ;;  %v1741_v38 = vmul.f32 %v5447_v33, %v1710_v13  ;;  %v1725_v48 = vmul.f32 %v5441_v24, %v1714_v57 }
 0x2c4   : > { %v2227_v21 = vmax.f32 %v2218_v39, 0.0  ;;  %v2267_v35 = vmax.f32 %v2258_v55, 0.0  ;;  %v2170_v58 = vadd.f32 %v2149_v16, %v2114_v45  ;;  %v5515_v6 = vpop.permute.xlu0 %2088  ;;  %v6842_v45 = vld [vmem:[#allocation158_spill] sm:$0xff]  ;;  %v1722_v39 = vmul.f32 %v5441_v24, %v1711_v42 }
 0x2c5   : > { %v5535_v50 = vadd.f32 %v6842_v45, %v1604_v43  ;;  %v2061_v55 = vadd.f32 %v2052_v36, %v2032_v26  ;;  %v1742_v16 = vmul.f32 %v5447_v33, %v1711_v42  ;;  %v363_v43 = vadd.s32 64, %v5524_v34  ;;  %v3710_v26 = vld [vmem:[%s4050_s9 + $0xe2] sm:$0xff] }
 0x2c6   : > { %v2236_v25 = vsel %vm5507_vm2, 0.0, %v2227_v21  ;;  %v2276_v0 = vsel %vm5507_vm2, 0.0, %v2267_v35  ;;  %v2181_v37 = vmul.f32 %v5463_v29, %v2170_v58  ;;  %v2201_v11 = vmul.f32 %v5466_v2, %v2170_v58 }
 0x2c7   : > { %2246 = vst.msk [vmem:[#allocation2 + $0x10] sm:$0xff] %vm2243_vm3, %v2236_v25  ;;  %v2117_v28 = vadd.f32 %v5420_v47, %v2061_v55  ;;  %v2025_v42 = vadd.f32 %v5328_v32, %v5186_v9  ;;  %v2045_v21 = vmul.f32 %v3710_v26, %v5408_v4  ;;  %v2024_v25 = vadd.f32 %v5341_v20, %v5190_v14 }
 0x2c8   : > { %2286 = vst.msk [vmem:[#allocation2 + $0x58] sm:$0xff] %vm2243_vm3, %v2276_v0  ;;  %v2190_v44 = vadd.f32 %v2181_v37, %v1735_v60  ;;  %v2210_v56 = vadd.f32 %v2201_v11, %v1755_v54  ;;  %v1745_v60 = vmul.f32 %v5447_v33, %v1714_v57  ;;  %v1724_v54 = vmul.f32 %v5441_v24, %v1713_v63  ;;  %v3711_v0 = vld [vmem:[%s4050_s9 + $0xda] sm:$0xff] }
 0x2c9   : > { %v1744_v57 = vmul.f32 %v5447_v33, %v1713_v63  ;;  %v2044_v9 = vmul.f32 %v3711_v0, %v5408_v4  ;;  %vm383_vm4 = vcmp.eq.s32.totalorder %v363_v43, 65  ;;  %v1731_v63 = vadd.f32 %v1722_v39, %v5295_v62  ;;  %v6857_v43 = vld [vmem:[#allocation170_spill] sm:$0xff] }
 0x2ca   : > { %v2221_v31 = vadd.f32 %v5484_v27, %v2190_v44  ;;  %v2261_v36 = vadd.f32 %v5487_v12, %v2210_v56  ;;  %v1751_v14 = vadd.f32 %v1742_v16, %v5302_v49  ;;  %v1730_v20 = vadd.f32 %v1721_v23, %v5308_v18  ;;  %vm5585_vm5 = vmor %vm383_vm4, %vm393_vm0 }
 0x2cb   : > { %v2155_v35 = vpop.permute.xlu2 %2154  ;;  %v5555_v58 = vpop.permute.xlu1 %2096  ;;  %v1750_v44 = vadd.f32 %v1741_v38, %v5311_v1  ;;  %v2054_v56 = vadd.f32 %v2045_v21, %v2025_v42  ;;  %v5590_v18 = vadd.f32 %v1725_v48, %v5331_v22  ;;  %v5593_v39 = vadd.f32 %v1745_v60, %v5334_v5  ;;  %vm412_vm6 = vmor %vm5585_vm5, %vm403_vm1  ;;  %v6848_v42 = vld [vmem:[#allocation21_spill] sm:$0xff] }
 0x2cc   : > { %v2230_v41 = vmax.f32 %v2221_v31, 0.0  ;;  %v2270_v47 = vmax.f32 %v2261_v36, 0.0  ;;  %v2173_v52 = vadd.f32 %v2155_v35, %v2117_v28  ;;  %v5557_v13 = vpop.permute.xlu0 %2094  ;;  %v5596_v1 = vadd.f32 %v1724_v54, %v5337_v40  ;;  %v3712_v28 = vld [vmem:[%s4050_s9 + $0xfa] sm:$0xff] }
 0x2cd   : > { %v2053_v16 = vadd.f32 %v2044_v9, %v2024_v25  ;;  %v5600_v23 = vadd.f32 %v1744_v57, %v5344_v46  ;;  %v2110_v38 = vadd.f32 %v5468_v19, %v2054_v56  ;;  %v2028_v40 = vadd.f32 %v5379_v3, %v5225_v10  ;;  %v3713_v10 = vld [vmem:[%s4050_s9 + $0xf2] sm:$0xff] }
 0x2ce   : > { %v2239_v32 = vsel %vm5507_vm2, 0.0, %v2230_v41  ;;  %v2279_v37 = vsel %vm5507_vm2, 0.0, %v2270_v47  ;;  %v2184_v11 = vmul.f32 %v5463_v29, %v2173_v52  ;;  %v2204_v45 = vmul.f32 %v5466_v2, %v2173_v52  ;;  %v5573_v51 = vld [vmem:[#allocation2 + $0x10] sm:$0xff]  ;;  %v6849_v57 = vld [vmem:[#allocation173_spill] sm:$0xff] }
 0x2cf   : > { %2249 = vst.msk [vmem:[#allocation2 + $0x28] sm:$0xff] %vm2243_vm3, %v2239_v32  ;;  %v2315_v55 = vmul.f32 %v5560_v59, %v5573_v51  ;;  %v2109_v48 = vadd.f32 %v5472_v53, %v2053_v16  ;;  %v2048_v31 = vmul.f32 %v3712_v28, %v5408_v4  ;;  %v2047_v3 = vmul.f32 %v3713_v10, %v5408_v4 }
 0x2d0   : > { %2289 = vst.msk [vmem:[#allocation2 + $0x70] sm:$0xff] %vm2243_vm3, %v2279_v37  ;;  %v2193_v62 = vadd.f32 %v2184_v11, %v1738_v7  ;;  %v2213_v49 = vadd.f32 %v2204_v45, %v1758_v17  ;;  %v6846_v17 = vld [vmem:[#allocation171_spill] sm:$0xff]  ;;  %vm366_vm8 = vcmp.eq.s32.totalorder %v5524_v34, 0  ;;  %v1716_v25 = vadd.f32 %v6849_v57, %v5535_v50 }
 0x2d1   : > { %2333 = vrot.lane.b32.xlu2 %v2315_v55, %s3892_s14  ;;  %v1717_v5 = vadd.f32 %v6846_v17, %v5520_v61  ;;  %v6847_v61 = vld [vmem:[#allocation166_spill] sm:$0xff]  ;;  %v2057_v11 = vadd.f32 %v2048_v31, %v2028_v40  ;;  %vm5639_vm9 = vmor %vm366_vm8, %vm393_vm0  ;;  %v3715_v34 = vld [vmem:[%s4050_s9 + $0x10a] sm:$0xff] }
 0x2d2   : > { %v2224_v7 = vadd.f32 %v5484_v27, %v2193_v62  ;;  %v2264_v22 = vadd.f32 %v5487_v12, %v2213_v49  ;;  %v2027_v26 = vadd.f32 %v6848_v42, %v6847_v61  ;;  %v2050_v17 = vmul.f32 %v3715_v34, %v5408_v4  ;;  %v6852_v40 = vld [vmem:[#allocation20_spill] sm:$0xff]  ;;  %vm404_vm10 = vmor %vm5639_vm9, %vm403_vm1 }
 0x2d3   : > { %v2141_v46 = vpop.permute.xlu1 %2140  ;;  %v1728_v37 = vmul.f32 %v5441_v24, %v1717_v5  ;;  %v1748_v50 = vmul.f32 %v5447_v33, %v1717_v5  ;;  %v2113_v16 = vadd.f32 %v5511_v30, %v2057_v11 }
 0x2d4   : > { %v2233_v19 = vmax.f32 %v2224_v7, 0.0  ;;  %v2273_v36 = vmax.f32 %v2264_v22, 0.0  ;;  %v2166_v60 = vadd.f32 %v2141_v46, %v2110_v38  ;;  %v2139_v54 = vpop.permute.xlu0 %2138  ;;  %v2056_v56 = vadd.f32 %v2047_v3, %v2027_v26  ;;  %v3714_v38 = vld [vmem:[%s4050_s9 + $0x112] sm:$0xff]  ;;  %s5675_s9 = sld [smem:[#allocation9 + $0x4]] }
 0x2d5   : > { %v2165_v53 = vadd.f32 %v2139_v54, %v2109_v48  ;;  %v6853_v48 = vld [vmem:[#allocation30_spill] sm:$0xff] }
 0x2d6   : > { %v2242_v21 = vsel %vm412_vm6, 0.0, %v2233_v19  ;;  %v2282_v35 = vsel %vm412_vm6, 0.0, %v2273_v36  ;;  %v2177_v41 = vmul.f32 %v5463_v29, %v2166_v60  ;;  %v2197_v47 = vmul.f32 %v5466_v2, %v2166_v60  ;;  %v5623_v52 = vld [vmem:[#allocation2 + $0x28] sm:$0xff]  ;;  %v6854_v19 = vld [vmem:[#allocation26_spill] sm:$0xff]  ;;  %v6855_v36 = vld [vmem:[#allocation28_spill] sm:$0xff] }
 0x2d7   : > { %2253 = vst.msk [vmem:[#allocation2 + $0x40] sm:$0x3] %vm2252_vm7, %v2242_v21  ;;  %v2176_v0 = vmul.f32 %v5463_v29, %v2165_v53  ;;  %v2196_v9 = vmul.f32 %v5466_v2, %v2165_v53  ;;  %v2318_v32 = vmul.f32 %v5560_v59, %v5623_v52  ;;  %v2112_v22 = vadd.f32 %v5515_v6, %v2056_v56 }
 0x2d8   : > { %2292 = vst.msk [vmem:[#allocation2 + $0x88] sm:$0x3] %vm2252_vm7, %v2282_v35  ;;  %v2186_v45 = vadd.f32 %v2177_v41, %v1731_v63  ;;  %v2206_v55 = vadd.f32 %v2197_v47, %v1751_v14  ;;  %v2051_v63 = vmul.f32 %v3714_v38, %v5408_v4  ;;  %v2031_v30 = vadd.f32 %v6853_v48, %v6852_v40 }
 0x2d9   : > { %v2185_v62 = vadd.f32 %v2176_v0, %v1730_v20  ;;  %v2205_v49 = vadd.f32 %v2196_v9, %v1750_v44  ;;  %2339 = vrot.lane.b32.xlu2 %v2318_v32, %s3892_s14  ;;  %v2030_v4 = vadd.f32 %v6855_v36, %v6854_v19  ;;  %v1727_v41 = vmul.f32 %v5441_v24, %v1716_v25 }
 0x2da   : > { %v2217_v14 = vadd.f32 %v5484_v27, %v2186_v45  ;;  %v2257_v7 = vadd.f32 %v5487_v12, %v2206_v55  ;;  %v2060_v47 = vadd.f32 %v2051_v63, %v2031_v30  ;;  %v1747_v9 = vmul.f32 %v5447_v33, %v1716_v25  ;;  %v6856_v55 = vld [vmem:[#allocation160_spill] sm:$0xff] }
 0x2db   : > { %v2216_v5 = vadd.f32 %v5484_v27, %v2185_v62  ;;  %v2256_v20 = vadd.f32 %v5487_v12, %v2205_v49  ;;  %v2147_v44 = vpop.permute.xlu1 %2146  ;;  %v2059_v32 = vadd.f32 %v2050_v17, %v2030_v4  ;;  %v1737_v24 = vadd.f32 %v1728_v37, %v6856_v55 }
 0x2dc   : > { %v2226_v28 = vmax.f32 %v2217_v14, 0.0  ;;  %v2266_v31 = vmax.f32 %v2257_v7, 0.0  ;;  %v2169_v46 = vadd.f32 %v2147_v44, %v2113_v16  ;;  %v2145_v6 = vpop.permute.xlu0 %2144  ;;  %v2116_v56 = vadd.f32 %v5555_v58, %v2060_v47  ;;  %v6859_v14 = vld [vmem:[#allocation24_spill] sm:$0xff] }
 0x2dd   : > { %v2225_v60 = vmax.f32 %v2216_v5, 0.0  ;;  %v2265_v54 = vmax.f32 %v2256_v20, 0.0  ;;  %v2168_v61 = vadd.f32 %v2145_v6, %v2112_v22  ;;  %v1757_v62 = vadd.f32 %v1748_v50, %v6857_v43 }
 0x2de   : > { %v2235_v42 = vsel %vm5507_vm2, 0.0, %v2226_v28  ;;  %v2275_v26 = vsel %vm5507_vm2, 0.0, %v2266_v31  ;;  %v2180_v10 = vmul.f32 %v5463_v29, %v2169_v46  ;;  %v2200_v15 = vmul.f32 %v5466_v2, %v2169_v46 }
 0x2df   : > { %2245 = vst.msk [vmem:[#allocation2 + $0x8] sm:$0xff] %vm2243_vm3, %v2235_v42  ;;  %v2234_v3 = vsel %vm404_vm10, 0.0, %v2225_v60  ;;  %v2274_v53 = vsel %vm404_vm10, 0.0, %v2265_v54  ;;  %v2179_v21 = vmul.f32 %v5463_v29, %v2168_v61  ;;  %v2199_v35 = vmul.f32 %v5466_v2, %v2168_v61 }
 0x2e0   : > { %2285 = vst.msk [vmem:[#allocation2 + $0x50] sm:$0xff] %vm2243_vm3, %v2275_v26  ;;  %v2189_v57 = vadd.f32 %v2180_v10, %v5590_v18  ;;  %v2209_v0 = vadd.f32 %v2200_v15, %v5593_v39  ;;  %v2115_v33 = vadd.f32 %v5557_v13, %v2059_v32  ;;  %v1756_v7 = vadd.f32 %v1747_v9, %v6859_v14 }
 0x2e1   : > { %2244 = vst.msk [vmem:[#allocation2] sm:$0xff] %vm2243_vm3, %v2234_v3  ;;  %v2188_v11 = vadd.f32 %v2179_v21, %v5596_v1  ;;  %v2208_v45 = vadd.f32 %v2199_v35, %v5600_v23  ;;  %v6858_v23 = vld [vmem:[#allocation27_spill] sm:$0xff]  ;;  %v5713_v36 = vstv %s5675_s9  ;;  %v2488_v14 = vstv %s3481_s1  ;;  %s3495_s9 = sld [smem:[#allocation9 + $0x11]] }
 0x2e2   : > { %2284 = vst.msk [vmem:[#allocation2 + $0x48] sm:$0xff] %vm2243_vm3, %v2274_v53  ;;  %v2220_v18 = vadd.f32 %v5484_v27, %v2189_v57  ;;  %v2260_v39 = vadd.f32 %v5487_v12, %v2209_v0  ;;  %v1736_v16 = vadd.f32 %v1727_v41, %v6858_v23  ;;  %s3485_s1 = sld [smem:[#allocation11 + $0x1]] }
 0x2e3   : > { %v2219_v25 = vadd.f32 %v5484_v27, %v2188_v11  ;;  %v2259_v1 = vadd.f32 %v5487_v12, %v2208_v45  ;;  %v2153_v49 = vpop.permute.xlu1 %2152 }
 0x2e4   : > { %v2229_v37 = vmax.f32 %v2220_v18, 0.0  ;;  %v2269_v38 = vmax.f32 %v2260_v39, 0.0  ;;  %v2172_v58 = vadd.f32 %v2153_v49, %v2116_v56  ;;  %v2151_v63 = vpop.permute.xlu0 %2150  ;;  %v2438_v56 = vstv %s3480_s19  ;;  %s3490_s19 = sld [smem:[#allocation9 + $0x7]] }
 0x2e5   : > { %v2228_v22 = vmax.f32 %v2219_v25, 0.0  ;;  %v2268_v34 = vmax.f32 %v2259_v1, 0.0  ;;  %v2171_v17 = vadd.f32 %v2151_v63, %v2115_v33  ;;  %v2365_v18 = vmul.f32 %v5713_v36, %v5573_v51 }
 0x2e6   : > { %v2238_v13 = vsel %vm5507_vm2, 0.0, %v2229_v37  ;;  %v2278_v50 = vsel %vm5507_vm2, 0.0, %v2269_v38  ;;  %v2183_v5 = vmul.f32 %v5463_v29, %v2172_v58  ;;  %v2203_v20 = vmul.f32 %v5466_v2, %v2172_v58  ;;  %v5698_v44 = vld [vmem:[#allocation2 + $0x8] sm:$0xff] }
 0x2e7   : > { %2248 = vst.msk [vmem:[#allocation2 + $0x20] sm:$0xff] %vm2243_vm3, %v2238_v13  ;;  %v2237_v40 = vsel %vm5507_vm2, 0.0, %v2228_v22  ;;  %v2277_v48 = vsel %vm5507_vm2, 0.0, %v2268_v34  ;;  %v2182_v30 = vmul.f32 %v5463_v29, %v2171_v17  ;;  %v2202_v28 = vmul.f32 %v5466_v2, %v2171_v17 }
 0x2e8   : > { %2288 = vst.msk [vmem:[#allocation2 + $0x68] sm:$0xff] %vm2243_vm3, %v2278_v50  ;;  %v2192_v31 = vadd.f32 %v2183_v5, %v1737_v24  ;;  %v2212_v46 = vadd.f32 %v2203_v20, %v1757_v62  ;;  %v2314_v6 = vmul.f32 %v5560_v59, %v5698_v44  ;;  %v5710_v19 = vld [vmem:[#allocation2] sm:$0xff]  ;;  %v5766_v24 = vld [vmem:[#allocation2 + $0x9] sm:$0xff]  ;;  %v2364_v43 = vmul.f32 %v5713_v36, %v5698_v44 }
 0x2e9   : > { %2247 = vst.msk [vmem:[#allocation2 + $0x18] sm:$0xff] %vm2243_vm3, %v2237_v40  ;;  %v2191_v4 = vadd.f32 %v2182_v30, %v1736_v16  ;;  %v2211_v60 = vadd.f32 %v2202_v28, %v1756_v7  ;;  %v2363_v29 = vmul.f32 %v5713_v36, %v5710_v19  ;;  %v2313_v2 = vmul.f32 %v5560_v59, %v5710_v19  ;;  %v5786_v1 = vld [vmem:[#allocation2 + $0x1] sm:$0xff] }
 0x2ea   : > { %2287 = vst.msk [vmem:[#allocation2 + $0x60] sm:$0xff] %vm2243_vm3, %v2277_v48  ;;  %v2223_v54 = vadd.f32 %v5484_v27, %v2192_v31  ;;  %v2263_v61 = vadd.f32 %v5487_v12, %v2212_v46  ;;  %2331 = vrot.lane.b32.xlu1 %v2314_v6, %s3892_s14  ;;  %v2440_v39 = vmul.f32 %v2438_v56, %v5766_v24  ;;  %v5817_v20 = vld [vmem:[#allocation2 + $0x2] sm:$0xff]  ;;  %v2564_v40 = vstv %s3483_s2  ;;  %s3486_s2 = sld [smem:[#allocation11 + $0x2]] }
 0x2eb   : > { %v2222_v42 = vadd.f32 %v5484_v27, %v2191_v4  ;;  %v2262_v26 = vadd.f32 %v5487_v12, %v2211_v60  ;;  %2379 = vrot.lane.b32.xlu2 %v2363_v29, %s3893_s17  ;;  %2329 = vrot.lane.b32.xlu0 %v2313_v2, %s3892_s14  ;;  %v2368_v62 = vmul.f32 %v5713_v36, %v5623_v52  ;;  %v5819_v48 = vstv %s2293_s13  ;;  %s3496_s13 = sld [smem:[#allocation11 + $0x3]] }
 0x2ec   : > { %v2232_v10 = vmax.f32 %v2223_v54, 0.0  ;;  %v2272_v15 = vmax.f32 %v2263_v61, 0.0  ;;  %v2439_v23 = vmul.f32 %v2438_v56, %v5786_v1  ;;  %v2490_v30 = vmul.f32 %v2488_v14, %v5766_v24 }
 0x2ed   : > { %v2231_v3 = vmax.f32 %v2222_v42, 0.0  ;;  %v2271_v53 = vmax.f32 %v2262_v26, 0.0  ;;  %v2565_v28 = vmul.f32 %v2564_v40, %v5817_v20  ;;  %v2489_v31 = vmul.f32 %v2488_v14, %v5786_v1 }
 0x2ee   : > { %v2241_v21 = vsel %vm5507_vm2, 0.0, %v2232_v10  ;;  %v2281_v35 = vsel %vm5507_vm2, 0.0, %v2272_v15  ;;  %v5732_v41 = vld [vmem:[#allocation2 + $0x20] sm:$0xff]  ;;  %v2305_v46 = vmul.f32 %v5819_v48, %v5573_v51  ;;  %v2308_v51 = vmul.f32 %v5819_v48, %v5623_v52 }
 0x2ef   : > { %2251 = vst.msk [vmem:[#allocation2 + $0x38] sm:$0xff] %vm2243_vm3, %v2241_v21  ;;  %v2240_v27 = vsel %vm5507_vm2, 0.0, %v2231_v3  ;;  %v2280_v12 = vsel %vm5507_vm2, 0.0, %v2271_v53  ;;  %v2317_v47 = vmul.f32 %v5560_v59, %v5732_v41  ;;  %v2367_v25 = vmul.f32 %v5713_v36, %v5732_v41  ;;  %v5853_v3 = vld [vmem:[#allocation2 + $0xa] sm:$0xff] }
 0x2f0   : > { %2291 = vst.msk [vmem:[#allocation2 + $0x80] sm:$0xff] %vm2243_vm3, %v2281_v35  ;;  %v5742_v57 = vld [vmem:[#allocation2 + $0x18] sm:$0xff]  ;;  %v2614_v53 = vstv %s3484_s20  ;;  %s3497_s20 = sld [smem:[#allocation11 + $0x4]] }
 0x2f1   : > { %2250 = vst.msk [vmem:[#allocation2 + $0x30] sm:$0xff] %vm2243_vm3, %v2240_v27  ;;  %v2366_v0 = vmul.f32 %v5713_v36, %v5742_v57  ;;  %v2316_v9 = vmul.f32 %v5560_v59, %v5742_v57  ;;  %v5797_v38 = vld [vmem:[#allocation2 + $0x19] sm:$0xff]  ;;  %v5799_v58 = vld [vmem:[#allocation2 + $0x11] sm:$0xff]  ;;  %v2616_v35 = vmul.f32 %v2614_v53, %v5853_v3  ;;  %v2566_v27 = vmul.f32 %v2564_v40, %v5853_v3 }
 0x2f2   : > { %2290 = vst.msk [vmem:[#allocation2 + $0x78] sm:$0xff] %vm2243_vm3, %v2280_v12  ;;  %2337 = vrot.lane.b32.xlu1 %v2317_v47, %s3892_s14  ;;  %v2442_v63 = vmul.f32 %v2438_v56, %v5797_v38  ;;  %v2491_v7 = vmul.f32 %v2488_v14, %v5799_v58  ;;  %v2441_v22 = vmul.f32 %v2438_v56, %v5799_v58  ;;  %v5831_v4 = vld [vmem:[#allocation2 + $0x1a] sm:$0xff]  ;;  %v5851_v52 = vld [vmem:[#allocation2 + $0x12] sm:$0xff] }
 0x2f3   : > { %2385 = vrot.lane.b32.xlu2 %v2366_v0, %s3893_s17  ;;  %2335 = vrot.lane.b32.xlu0 %v2316_v9, %s3892_s14  ;;  %v2568_v29 = vmul.f32 %v2564_v40, %v5831_v4  ;;  %v2492_v2 = vmul.f32 %v2488_v14, %v5797_v38  ;;  %v2567_v21 = vmul.f32 %v2564_v40, %v5851_v52  ;;  %v5863_v0 = vld [vmem:[#allocation2 + $0x22] sm:$0xff] }
 0x2f6   : > { %v5753_v8 = vld [vmem:[#allocation2 + $0x38] sm:$0xff] }
 0x2f7   : > { %v2320_v32 = vmul.f32 %v5560_v59, %v5753_v8  ;;  %v5788_v49 = vld [vmem:[#allocation2 + $0x39] sm:$0xff]  ;;  %v2370_v37 = vmul.f32 %v5713_v36, %v5753_v8 }
 0x2f8   : > { %v5757_v11 = vld [vmem:[#allocation2 + $0x30] sm:$0xff]  ;;  %v2446_v16 = vmul.f32 %v2438_v56, %v5788_v49  ;;  %v2496_v26 = vmul.f32 %v2488_v14, %v5788_v49 }
 0x2f9   : > { %v2369_v45 = vmul.f32 %v5713_v36, %v5757_v11  ;;  %v2319_v55 = vmul.f32 %v5560_v59, %v5757_v11  ;;  %v5776_v59 = vld [vmem:[#allocation2 + $0x21] sm:$0xff]  ;;  %v5807_v34 = vld [vmem:[#allocation2 + $0x31] sm:$0xff]  ;;  %v5809_v17 = vld [vmem:[#allocation2 + $0x29] sm:$0xff] }
 0x2fa   : > { %2343 = vrot.lane.b32.xlu1 %v2320_v32, %s3892_s14  ;;  %v2443_v33 = vmul.f32 %v2438_v56, %v5776_v59  ;;  %v2445_v13 = vmul.f32 %v2438_v56, %v5807_v34  ;;  %v2494_v50 = vmul.f32 %v2488_v14, %v5809_v17  ;;  %v2444_v5 = vmul.f32 %v2438_v56, %v5809_v17  ;;  %v5843_v42 = vld [vmem:[#allocation2 + $0x32] sm:$0xff]  ;;  %v5861_v47 = vld [vmem:[#allocation2 + $0x2a] sm:$0xff]  ;;  %v5871_v56 = vld [vmem:[#allocation2 + $0x3a] sm:$0xff] }
 0x2fb   : > { %2391 = vrot.lane.b32.xlu2 %v2369_v45, %s3893_s17  ;;  %2341 = vrot.lane.b32.xlu0 %v2319_v55, %s3892_s14  ;;  %v2493_v60 = vmul.f32 %v2488_v14, %v5776_v59  ;;  %v2571_v10 = vmul.f32 %v2564_v40, %v5843_v42  ;;  %v2495_v15 = vmul.f32 %v2488_v14, %v5807_v34 }
 0x2fc   : > { %v2570_v9 = vmul.f32 %v2564_v40, %v5861_v47  ;;  %v2619_v32 = vmul.f32 %v2614_v53, %v5863_v0  ;;  %v2569_v45 = vmul.f32 %v2564_v40, %v5863_v0 }
 0x302   : > { %2383 = vrot.lane.b32.xlu1 %v2365_v18, %s3893_s17  ;;  %v2615_v18 = vmul.f32 %v2614_v53, %v5817_v20 }
 0x303   : > { %2457 = vrot.lane.b32.xlu2 %v2440_v39, %s3892_s14  ;;  %2381 = vrot.lane.b32.xlu0 %v2364_v43, %s3893_s17  ;;  %v2622_v39 = vmul.f32 %v2614_v53, %v5871_v56  ;;  %v2572_v43 = vmul.f32 %v2564_v40, %v5871_v56 }
 0x30a   : > { %2389 = vrot.lane.b32.xlu1 %v2368_v62, %s3893_s17 }
 0x30b   : > { %2463 = vrot.lane.b32.xlu2 %v2443_v33, %s3892_s14  ;;  %2387 = vrot.lane.b32.xlu0 %v2367_v25, %s3893_s17  ;;  %v5879_v33 = vld [vmem:[#allocation2 + $0x58] sm:$0xff]  ;;  %v5881_v25 = vstv %s3488_s23  ;;  %s3498_s23 = sld [smem:[#allocation11 + $0x5]] }
 0x312   : > { %2455 = vrot.lane.b32.xlu1 %v2439_v23, %s3892_s14  ;;  %v2618_v23 = vmul.f32 %v2614_v53, %v5831_v4 }
 0x313   : > { %2469 = vrot.lane.b32.xlu2 %v2446_v16, %s3892_s14  ;;  %2393 = vrot.lane.b32.xlu0 %v2370_v37, %s3893_s17  ;;  %v2715_v16 = vmul.f32 %v5881_v25, %v5879_v33  ;;  %v2617_v37 = vmul.f32 %v2614_v53, %v5851_v52 }
 0x31a   : > { %2461 = vrot.lane.b32.xlu1 %v2442_v63, %s3892_s14  ;;  %v2304_v63 = vmul.f32 %v5819_v48, %v5698_v44 }
 0x31b   : > { %2509 = vrot.lane.b32.xlu2 %v2491_v7, %s3893_s17  ;;  %2459 = vrot.lane.b32.xlu0 %v2441_v22, %s3892_s14  ;;  %v2303_v7 = vmul.f32 %v5819_v48, %v5710_v19  ;;  %v2620_v19 = vmul.f32 %v2614_v53, %v5861_v47 }
 0x322   : > { %2467 = vrot.lane.b32.xlu1 %v2445_v13, %s3892_s14 }
 0x323   : > { %2515 = vrot.lane.b32.xlu2 %v2494_v50, %s3893_s17  ;;  %2465 = vrot.lane.b32.xlu0 %v2444_v5, %s3892_s14  ;;  %v5896_v5 = vstv %s3479_s15  ;;  %s3117_s15 = sld [smem:[#allocation12]] }
 0x324   : > { %v2421_v44 = vmul.f32 %v5896_v5, %v5786_v1  ;;  %v2306_v1 = vmul.f32 %v5819_v48, %v5742_v57 }
 0x32a   : > { %2507 = vrot.lane.b32.xlu1 %v2490_v30, %s3893_s17  ;;  %v5898_v30 = vld [vmem:[#allocation2 + $0x70] sm:$0xff] }
 0x32b   : > { %2581 = vrot.lane.b32.xlu2 %v2565_v28, %s3892_s14  ;;  %2505 = vrot.lane.b32.xlu0 %v2489_v31, %s3893_s17  ;;  %v2334_v6 = vpop.permute.xlu2 %2333  ;;  %v2621_v31 = vmul.f32 %v2614_v53, %v5843_v42 }
 0x32c   : > { %v5829_v36 = vadd.f32 %v2334_v6, %v2305_v46  ;;  %v2718_v46 = vmul.f32 %v5881_v25, %v5898_v30 }
 0x332   : > { %2513 = vrot.lane.b32.xlu1 %v2493_v60, %s3893_s17  ;;  %v2307_v60 = vmul.f32 %v5819_v48, %v5732_v41  ;;  %v2424_v41 = vmul.f32 %v5896_v5, %v5797_v38  ;;  %v2309_v38 = vmul.f32 %v5819_v48, %v5757_v11 }
 0x333   : > { %2587 = vrot.lane.b32.xlu2 %v2568_v29, %s3892_s14  ;;  %2511 = vrot.lane.b32.xlu0 %v2492_v2, %s3893_s17  ;;  %v2340_v54 = vpop.permute.xlu2 %2339 }
 0x334   : > { %v5841_v61 = vadd.f32 %v2340_v54, %v2308_v51 }
 0x33a   : > { %2519 = vrot.lane.b32.xlu1 %v2496_v26, %s3893_s17  ;;  %v5917_v26 = vld [vmem:[#allocation2 + $0x50] sm:$0xff] }
 0x33b   : > { %2593 = vrot.lane.b32.xlu2 %v2571_v10, %s3892_s14  ;;  %2517 = vrot.lane.b32.xlu0 %v2495_v15, %s3893_s17  ;;  %v5919_v15 = vld [vmem:[#allocation2 + $0x48] sm:$0xff] }
 0x342   : > { %2585 = vrot.lane.b32.xlu1 %v2567_v21, %s3892_s14  ;;  %v2714_v21 = vmul.f32 %v5881_v25, %v5917_v26 }
 0x343   : > { %2633 = vrot.lane.b32.xlu2 %v2616_v35, %s3893_s17  ;;  %2583 = vrot.lane.b32.xlu0 %v2566_v27, %s3892_s14  ;;  %v5923_v35 = vstv %s3489_s18  ;;  %v2713_v27 = vmul.f32 %v5881_v25, %v5919_v15  ;;  %s3499_s18 = sld [smem:[#allocation12 + $0x1]] }
 0x344   : > { %v2763_v57 = vmul.f32 %v5923_v35, %v5919_v15 }
 0x345   : > { %v2380_v12 = vpop.permute.xlu2 %2379 }
 0x34a   : > { %2591 = vrot.lane.b32.xlu1 %v2570_v9, %s3892_s14  ;;  %v2310_v9 = vmul.f32 %v5819_v48, %v5753_v8  ;;  %v2427_v8 = vmul.f32 %v5896_v5, %v5807_v34  ;;  %v5960_v34 = vld [vmem:[#allocation2 + $0x80] sm:$0xff] }
 0x34b   : > { %2639 = vrot.lane.b32.xlu2 %v2619_v32, %s3893_s17  ;;  %2589 = vrot.lane.b32.xlu0 %v2569_v45, %s3892_s14 }
 0x34d   : > { %v2386_v55 = vpop.permute.xlu2 %2385 }
 0x352   : > { %2631 = vrot.lane.b32.xlu1 %v2615_v18, %s3893_s17 }
 0x353   : > { %2645 = vrot.lane.b32.xlu2 %v2622_v39, %s3893_s17  ;;  %2595 = vrot.lane.b32.xlu0 %v2572_v43, %s3892_s14  ;;  %v5942_v39 = vld [vmem:[#allocation2 + $0x68] sm:$0xff] }
 0x355   : > { %v2392_v62 = vpop.permute.xlu2 %2391 }
 0x35a   : > { %2637 = vrot.lane.b32.xlu1 %v2618_v23, %s3893_s17  ;;  %v5944_v23 = vld [vmem:[#allocation2 + $0x60] sm:$0xff] }
 0x35b   : > { %2733 = vrot.lane.b32.xlu2 %v2715_v16, %s3892_s14  ;;  %2635 = vrot.lane.b32.xlu0 %v2617_v37, %s3893_s17  ;;  %v2717_v37 = vmul.f32 %v5881_v25, %v5942_v39  ;;  %v2716_v11 = vmul.f32 %v5881_v25, %v5944_v23 }
 0x35c   : > { %v2332_v14 = vpop.permute.xlu1 %2331 }
 0x35d   : > { %v2354_v22 = vadd.f32 %v2332_v14, %v2304_v63  ;;  %v5894_v13 = vpop.permute.xlu2 %2457  ;;  %v2330_v50 = vpop.permute.xlu0 %2329  ;;  %v2766_v63 = vmul.f32 %v5923_v35, %v5944_v23 }
 0x35e   : > { %v2353_v40 = vadd.f32 %v2330_v50, %v2303_v7 }
 0x360   : > { %v2403_v28 = vadd.f32 %v2380_v12, %v2353_v40  ;;  %v2423_v40 = vmul.f32 %v5896_v5, %v5799_v58 }
 0x362   : > { %2643 = vrot.lane.b32.xlu1 %v2621_v31, %s3893_s17  ;;  %v5907_v6 = vadd.f32 %v2421_v44, %v2403_v28  ;;  %v2422_v28 = vmul.f32 %v5896_v5, %v5766_v24  ;;  %v5966_v44 = vld [vmem:[#allocation2 + $0x78] sm:$0xff] }
 0x363   : > { %2739 = vrot.lane.b32.xlu2 %v2718_v46, %s3892_s14  ;;  %2641 = vrot.lane.b32.xlu0 %v2620_v19, %s3893_s17 }
 0x364   : > { %v2338_v29 = vpop.permute.xlu1 %2337 }
 0x365   : > { %v2357_v2 = vadd.f32 %v2338_v29, %v2307_v60  ;;  %v5915_v51 = vpop.permute.xlu2 %2463  ;;  %v2336_v54 = vpop.permute.xlu0 %2335  ;;  %v2720_v60 = vmul.f32 %v5881_v25, %v5960_v34  ;;  %v2719_v29 = vmul.f32 %v5881_v25, %v5966_v44  ;;  %v2425_v25 = vmul.f32 %v5896_v5, %v5776_v59 }
 0x366   : > { %v2356_v10 = vadd.f32 %v2336_v54, %v2306_v1 }
 0x368   : > { %v2406_v53 = vadd.f32 %v2386_v55, %v2356_v10  ;;  %v2426_v10 = vmul.f32 %v5896_v5, %v5809_v17 }
 0x36a   : > { %2731 = vrot.lane.b32.xlu1 %v2714_v21, %s3892_s14  ;;  %v5932_v12 = vadd.f32 %v2424_v41, %v2406_v53  ;;  %v5985_v21 = vld [vmem:[#allocation2 + $0x51] sm:$0xff] }
 0x36b   : > { %2779 = vrot.lane.b32.xlu2 %v2763_v57, %s3893_s17  ;;  %2729 = vrot.lane.b32.xlu0 %v2713_v27, %s3892_s14  ;;  %v2765_v27 = vmul.f32 %v5923_v35, %v5879_v33 }
 0x36c   : > { %v2344_v32 = vpop.permute.xlu1 %2343 }
 0x36d   : > { %v2360_v45 = vadd.f32 %v2344_v32, %v2310_v9  ;;  %v5940_v55 = vpop.permute.xlu2 %2469  ;;  %v2342_v18 = vpop.permute.xlu0 %2341  ;;  %v2764_v9 = vmul.f32 %v5923_v35, %v5917_v26 }
 0x36e   : > { %v2359_v43 = vadd.f32 %v2342_v18, %v2309_v38  ;;  %v2428_v18 = vmul.f32 %v5896_v5, %v5788_v49 }
 0x370   : > { %v2409_v16 = vadd.f32 %v2392_v62, %v2359_v43 }
 0x372   : > { %2737 = vrot.lane.b32.xlu1 %v2717_v37, %s3892_s14  ;;  %v5955_v48 = vadd.f32 %v2427_v8, %v2409_v16  ;;  %v6006_v16 = vld [vmem:[#allocation2 + $0x69] sm:$0xff] }
 0x373   : > { %2785 = vrot.lane.b32.xlu2 %v2766_v63, %s3893_s17  ;;  %2735 = vrot.lane.b32.xlu0 %v2716_v11, %s3892_s14 }
 0x374   : > { %v2384_v62 = vpop.permute.xlu1 %2383 }
 0x375   : > { %v2405_v14 = vadd.f32 %v2384_v62, %v5829_v36  ;;  %v2510_v7 = vpop.permute.xlu2 %2509  ;;  %v2382_v50 = vpop.permute.xlu0 %2381  ;;  %v2769_v36 = vmul.f32 %v5923_v35, %v5966_v44  ;;  %v6023_v62 = vld [vmem:[#allocation2 + $0x49] sm:$0xff] }
 0x376   : > { %v2404_v31 = vadd.f32 %v2382_v50, %v2354_v22  ;;  %v6025_v50 = vld [vmem:[#allocation2 + $0x81] sm:$0xff] }
 0x377   : > { %v2431_v46 = vadd.f32 %v2423_v40, %v2405_v14  ;;  %v6027_v40 = vstv %s3482_s22  ;;  %s346_s22 = sand.u32 1, %s3876_s25  }
 0x378   : > { %v2430_v19 = vadd.f32 %v2422_v28, %v2404_v31  ;;  %v2549_v31 = vmul.f32 %v6027_v40, %v5851_v52 }
 0x37a   : > { %2743 = vrot.lane.b32.xlu1 %v2720_v60, %s3892_s14  ;;  %v5976_v58 = vadd.f32 %v5894_v13, %v2430_v19  ;;  %v5987_v13 = vstv %s3491_s21  ;;  %v2770_v19 = vmul.f32 %v5923_v35, %v5960_v34  ;;  %s3508_s21 = sld [smem:[#allocation12 + $0x2]] }
 0x37b   : > { %2791 = vrot.lane.b32.xlu2 %v2769_v36, %s3893_s17  ;;  %2741 = vrot.lane.b32.xlu0 %v2719_v29, %s3892_s14  ;;  %v2843_v8 = vmul.f32 %v5987_v13, %v6006_v16  ;;  %v6045_v29 = vld [vmem:[#allocation2 + $0x61] sm:$0xff] }
 0x37c   : > { %v2390_v24 = vpop.permute.xlu1 %2389 }
 0x37d   : > { %v2408_v22 = vadd.f32 %v2390_v24, %v5841_v61  ;;  %v2516_v1 = vpop.permute.xlu2 %2515  ;;  %v2388_v54 = vpop.permute.xlu0 %2387  ;;  %v2840_v61 = vmul.f32 %v5987_v13, %v5985_v21 }
 0x37e   : > { %v2407_v53 = vadd.f32 %v2388_v54, %v2357_v2  ;;  %v2842_v54 = vmul.f32 %v5987_v13, %v6045_v29 }
 0x37f   : > { %v2434_v41 = vadd.f32 %v2426_v10, %v2408_v22  ;;  %v6047_v22 = vld [vmem:[#allocation2 + $0x59] sm:$0xff]  ;;  %v6051_v10 = vstv %s3492_s29  ;;  %s3520_s29 = smul.u32 192, %s346_s22 }
 0x380   : > { %v2433_v57 = vadd.f32 %v2425_v25, %v2407_v53  ;;  %v2552_v25 = vmul.f32 %v6027_v40, %v5861_v47  ;;  %v2841_v53 = vmul.f32 %v5987_v13, %v6047_v22 }
 0x382   : > { %2783 = vrot.lane.b32.xlu1 %v2765_v27, %s3893_s17  ;;  %v5997_v59 = vadd.f32 %v5915_v51, %v2433_v57  ;;  %v2768_v51 = vmul.f32 %v5923_v35, %v5898_v30 }
 0x383   : > { %2857 = vrot.lane.b32.xlu2 %v2840_v61, %s3892_s14  ;;  %2781 = vrot.lane.b32.xlu0 %v2764_v9, %s3893_s17  ;;  %v6067_v61 = vld [vmem:[#allocation2 + $0x79] sm:$0xff]  ;;  %v2548_v9 = vmul.f32 %v6027_v40, %v5853_v3 }
 0x384   : > { %v2456_v17 = vpop.permute.xlu1 %2455 }
 0x385   : > { %v2479_v2 = vadd.f32 %v2456_v17, %v5907_v6  ;;  %v6002_v32 = vpop.permute.xlu2 %2581  ;;  %v2394_v38 = vpop.permute.xlu0 %2393  ;;  %v2767_v6 = vmul.f32 %v5923_v35, %v5942_v39  ;;  %v2547_v17 = vmul.f32 %v6027_v40, %v5817_v20 }
 0x386   : > { %v2410_v43 = vadd.f32 %v2394_v38, %v2360_v45 }
 0x388   : > { %v2436_v37 = vadd.f32 %v2428_v18, %v2410_v43  ;;  %v6073_v18 = vld [vmem:[#allocation2 + $0x71] sm:$0xff] }
 0x38a   : > { %2789 = vrot.lane.b32.xlu1 %v2768_v51, %s3893_s17  ;;  %v6016_v63 = vadd.f32 %v5940_v55, %v2436_v37  ;;  %v2839_v55 = vmul.f32 %v5987_v13, %v6023_v62  ;;  %v2894_v51 = vmul.f32 %v6051_v10, %v6073_v18 }
 0x38b   : > { %2863 = vrot.lane.b32.xlu2 %v2843_v8, %s3892_s14  ;;  %2787 = vrot.lane.b32.xlu0 %v2767_v6, %s3893_s17  ;;  %v2844_v8 = vmul.f32 %v5987_v13, %v6073_v18 }
 0x38c   : > { %v2462_v49 = vpop.permute.xlu1 %2461 }
 0x38d   : > { %v2482_v5 = vadd.f32 %v2462_v49, %v5932_v12  ;;  %v6021_v45 = vpop.permute.xlu2 %2587  ;;  %v2460_v11 = vpop.permute.xlu0 %2459  ;;  %v2846_v12 = vmul.f32 %v5987_v13, %v6025_v50 }
 0x38e   : > { %v2481_v14 = vadd.f32 %v2460_v11, %v2431_v46  ;;  %v2551_v11 = vmul.f32 %v6027_v40, %v5863_v0 }
 0x390   : > { %v2531_v28 = vadd.f32 %v2510_v7, %v2481_v14 }
 0x392   : > { %2855 = vrot.lane.b32.xlu1 %v2839_v55, %s3892_s14  ;;  %v6038_v46 = vadd.f32 %v2549_v31, %v2531_v28  ;;  %v6092_v28 = vld [vmem:[#allocation2 + $0x4a] sm:$0xff] }
 0x393   : > { %2869 = vrot.lane.b32.xlu2 %v2846_v12, %s3892_s14  ;;  %2793 = vrot.lane.b32.xlu0 %v2770_v19, %s3893_s17  ;;  %v2890_v12 = vmul.f32 %v6051_v10, %v5985_v21  ;;  %v2889_v19 = vmul.f32 %v6051_v10, %v6023_v62 }
 0x394   : > { %v2468_v7 = vpop.permute.xlu1 %2467 }
 0x395   : > { %v2485_v60 = vadd.f32 %v2468_v7, %v5955_v48  ;;  %v6043_v36 = vpop.permute.xlu2 %2593  ;;  %v2466_v52 = vpop.permute.xlu0 %2465  ;;  %v2891_v48 = vmul.f32 %v6051_v10, %v6047_v22 }
 0x396   : > { %v2484_v24 = vadd.f32 %v2466_v52, %v2434_v41 }
 0x398   : > { %v2534_v35 = vadd.f32 %v2516_v1, %v2484_v24  ;;  %v2554_v24 = vmul.f32 %v6027_v40, %v5871_v56 }
 0x39a   : > { %2861 = vrot.lane.b32.xlu1 %v2842_v54, %s3892_s14  ;;  %v6060_v41 = vadd.f32 %v2552_v25, %v2534_v35  ;;  %v2553_v35 = vmul.f32 %v6027_v40, %v5843_v42  ;;  %v6113_v25 = vld [vmem:[#allocation2 + $0x62] sm:$0xff] }
 0x39b   : > { %2909 = vrot.lane.b32.xlu2 %v2891_v48, %s3893_s17  ;;  %2859 = vrot.lane.b32.xlu0 %v2841_v53, %s3892_s14  ;;  %v2893_v53 = vmul.f32 %v6051_v10, %v6006_v16 }
 0x39c   : > { %v2508_v1 = vpop.permute.xlu1 %2507 }
 0x39d   : > { %v2530_v57 = vadd.f32 %v2508_v1, %v5976_v58  ;;  %v6065_v27 = vpop.permute.xlu2 %2633  ;;  %v2506_v47 = vpop.permute.xlu0 %2505  ;;  %v2845_v58 = vmul.f32 %v5987_v13, %v6067_v61  ;;  %v2550_v13 = vmul.f32 %v6027_v40, %v5831_v4 }
 0x39e   : > { %v2529_v38 = vadd.f32 %v2506_v47, %v2479_v2 }
 0x39f   : > { %v2556_v43 = vadd.f32 %v2548_v9, %v2530_v57  ;;  %v6121_v57 = vstv %s3487_s16  ;;  %s3522_s16 = smul.u32 192, %s3957_s28 }
 0x3a0   : > { %v2555_v37 = vadd.f32 %v2547_v17, %v2529_v38  ;;  %v2705_v40 = vmul.f32 %v6121_v57, %v5879_v33  ;;  %v2895_v33 = vmul.f32 %v6051_v10, %v6067_v61 }
 0x3a2   : > { %2867 = vrot.lane.b32.xlu1 %v2845_v58, %s3892_s14  ;;  %v6083_v3 = vadd.f32 %v6002_v32, %v2555_v37  ;;  %v6094_v32 = vstv %s3494_s8  ;;  %v6134_v37 = vld [vmem:[#allocation2 + $0x7a] sm:$0xff]  ;;  %v2896_v58 = vmul.f32 %v6051_v10, %v6025_v50  ;;  %s6307_s8 = scalar_lea.vmem [#allocation14], %s3520_s29 }
 0x3a3   : > { %2915 = vrot.lane.b32.xlu2 %v2894_v51, %s3893_s17  ;;  %2865 = vrot.lane.b32.xlu0 %v2844_v8, %s3892_s14  ;;  %v2968_v1 = vmul.f32 %v6094_v32, %v6113_v25  ;;  %v2971_v51 = vmul.f32 %v6094_v32, %v6134_v37 }
 0x3a4   : > { %v2514_v20 = vpop.permute.xlu1 %2513 }
 0x3a5   : > { %v2533_v2 = vadd.f32 %v2514_v20, %v5997_v59  ;;  %v2640_v6 = vpop.permute.xlu2 %2639  ;;  %v2512_v49 = vpop.permute.xlu0 %2511  ;;  %v2965_v59 = vmul.f32 %v6094_v32, %v6092_v28 }
 0x3a6   : > { %v2532_v14 = vadd.f32 %v2512_v49, %v2482_v5 }
 0x3a7   : > { %v2559_v55 = vadd.f32 %v2551_v11, %v2533_v2  ;;  %v6151_v2 = vld [vmem:[#allocation2 + $0x5a] sm:$0xff] }
 0x3a8   : > { %v2558_v31 = vadd.f32 %v2550_v13, %v2532_v14  ;;  %v3014_v13 = vstv %s3495_s9 }
 0x3aa   : > { %2907 = vrot.lane.b32.xlu1 %v2890_v12, %s3893_s17  ;;  %v6104_v4 = vadd.f32 %v6021_v45, %v2558_v31  ;;  %v2967_v31 = vmul.f32 %v6094_v32, %v6151_v2 }
 0x3ab   : > { %2981 = vrot.lane.b32.xlu2 %v2965_v59, %s3892_s14  ;;  %2905 = vrot.lane.b32.xlu0 %v2889_v19, %s3893_s17  ;;  %v6170_v19 = vld [vmem:[#allocation2 + $0x72] sm:$0xff] }
 0x3ac   : > { %v2520_v0 = vpop.permute.xlu1 %2519 }
 0x3ad   : > { %v2536_v5 = vadd.f32 %v2520_v0, %v6016_v63  ;;  %v2646_v7 = vpop.permute.xlu2 %2645  ;;  %v2518_v52 = vpop.permute.xlu0 %2517  ;;  %v2892_v63 = vmul.f32 %v6051_v10, %v6045_v29  ;;  %v6155_v10 = vld [vmem:[#allocation2 + $0x52] sm:$0xff] }
 0x3ae   : > { %v2535_v54 = vadd.f32 %v2518_v52, %v2485_v60  ;;  %v3016_v12 = vmul.f32 %v3014_v13, %v6155_v10 }
 0x3af   : > { %v2562_v45 = vadd.f32 %v2554_v24, %v2536_v5  ;;  %v6172_v5 = vld [vmem:[#allocation2 + $0x6a] sm:$0xff]  ;;  %v2970_v24 = vmul.f32 %v6094_v32, %v6170_v19 }
 0x3b0   : > { %v2561_v48 = vadd.f32 %v2553_v35, %v2535_v54  ;;  %v3019_v35 = vmul.f32 %v3014_v13, %v6172_v5  ;;  %v2969_v54 = vmul.f32 %v6094_v32, %v6172_v5 }
 0x3b2   : > { %2913 = vrot.lane.b32.xlu1 %v2893_v53, %s3893_s17  ;;  %v6125_v42 = vadd.f32 %v6043_v36, %v2561_v48  ;;  %v6189_v53 = vld [vmem:[#allocation2 + $0x82] sm:$0xff] }
 0x3b3   : > { %2987 = vrot.lane.b32.xlu2 %v2968_v1, %s3892_s14  ;;  %2911 = vrot.lane.b32.xlu0 %v2892_v63, %s3893_s17  ;;  %v3015_v63 = vmul.f32 %v3014_v13, %v6092_v28 }
 0x3b4   : > { %v2586_v56 = vpop.permute.xlu1 %2585 }
 0x3b5   : > { %v2607_v60 = vadd.f32 %v2586_v56, %v6038_v46  ;;  %v2734_v47 = vpop.permute.xlu2 %2733  ;;  %v2584_v9 = vpop.permute.xlu0 %2583  ;;  %v3022_v56 = vmul.f32 %v3014_v13, %v6189_v53 }
 0x3b6   : > { %v6132_v17 = vadd.f32 %v2734_v47, %v2705_v40  ;;  %v2606_v38 = vadd.f32 %v2584_v9, %v2556_v43  ;;  %v2972_v40 = vmul.f32 %v6094_v32, %v6189_v53 }
 0x3b8   : > { %v6137_v36 = vadd.f32 %v6065_v27, %v2606_v38  ;;  %v2708_v27 = vmul.f32 %v6121_v57, %v5898_v30  ;;  %v2966_v30 = vmul.f32 %v6094_v32, %v6155_v10  ;;  %v3018_v38 = vmul.f32 %v3014_v13, %v6113_v25 }
 0x3b9   : > { %v2704_v32 = vmul.f32 %v6121_v57, %v5917_v26  ;;  %v2707_v26 = vmul.f32 %v6121_v57, %v5942_v39 }
 0x3ba   : > { %2919 = vrot.lane.b32.xlu1 %v2896_v58, %s3893_s17 }
 0x3bb   : > { %2993 = vrot.lane.b32.xlu2 %v2971_v51, %s3892_s14  ;;  %2917 = vrot.lane.b32.xlu0 %v2895_v33, %s3893_s17  ;;  %v3017_v51 = vmul.f32 %v3014_v13, %v6151_v2 }
 0x3bc   : > { %v2592_v46 = vpop.permute.xlu1 %2591 }
 0x3bd   : > { %v2610_v43 = vadd.f32 %v2592_v46, %v6060_v41  ;;  %v2740_v8 = vpop.permute.xlu2 %2739  ;;  %v2590_v20 = vpop.permute.xlu0 %2589 }
 0x3be   : > { %v6153_v49 = vadd.f32 %v2740_v8, %v2708_v27  ;;  %v2609_v11 = vadd.f32 %v2590_v20, %v2559_v55  ;;  %v2820_v8 = vstv %s3490_s19  ;;  %s3210_s19 = scalar_lea.hbm %s6485_s7, %s3522_s16 }
 0x3c0   : > { %v6157_v14 = vadd.f32 %v2640_v6, %v2609_v11  ;;  %v3021_v11 = vmul.f32 %v3014_v13, %v6134_v37 }
 0x3c2   : > { %2985 = vrot.lane.b32.xlu1 %v2967_v31, %s3892_s14  ;;  %v3020_v31 = vmul.f32 %v3014_v13, %v6170_v19  ;;  %v2824_v13 = vmul.f32 %v2820_v8, %v6045_v29 }
 0x3c3   : > { %3033 = vrot.lane.b32.xlu2 %v3016_v12, %s3893_s17  ;;  %2983 = vrot.lane.b32.xlu0 %v2966_v30, %s3892_s14  ;;  %v2821_v12 = vmul.f32 %v2820_v8, %v6023_v62  ;;  %v2710_v62 = vmul.f32 %v6121_v57, %v5960_v34  ;;  %v2823_v34 = vmul.f32 %v2820_v8, %v6047_v22 }
 0x3c4   : > { %v2632_v41 = vpop.permute.xlu1 %2631 }
 0x3c5   : > { %v6168_v55 = vadd.f32 %v2632_v41, %v6083_v3  ;;  %v2780_v6 = vpop.permute.xlu2 %2779  ;;  %v2596_v59 = vpop.permute.xlu0 %2595  ;;  %v2706_v41 = vmul.f32 %v6121_v57, %v5944_v23 }
 0x3c6   : > { %v2612_v0 = vadd.f32 %v2596_v59, %v2562_v45 }
 0x3c8   : > { %v6174_v52 = vadd.f32 %v2646_v7, %v2612_v0 }
 0x3ca   : > { %2991 = vrot.lane.b32.xlu1 %v2970_v24, %s3892_s14 }
 0x3cb   : > { %3039 = vrot.lane.b32.xlu2 %v3019_v35, %s3893_s17  ;;  %2989 = vrot.lane.b32.xlu0 %v2969_v54, %s3892_s14 }
 0x3cc   : > { %v2638_v3 = vpop.permute.xlu1 %2637 }
 0x3cd   : > { %v6185_v45 = vadd.f32 %v2638_v3, %v6104_v4  ;;  %v2636_v7 = vpop.permute.xlu0 %2635  ;;  %v2786_v1 = vpop.permute.xlu2 %2785  ;;  %v2709_v3 = vmul.f32 %v6121_v57, %v5966_v44 }
 0x3ce   : > { %v6187_v48 = vadd.f32 %v2636_v7, %v2607_v60 }
 0x3d2   : > { %3031 = vrot.lane.b32.xlu1 %v3015_v63, %s3893_s17 }
 0x3d3   : > { %3045 = vrot.lane.b32.xlu2 %v3022_v56, %s3893_s17  ;;  %2995 = vrot.lane.b32.xlu0 %v2972_v40, %s3892_s14  ;;  %s3493_s14 = sld [smem:[#allocation9 + $0xd]] }
 0x3d4   : > { %v2644_v4 = vpop.permute.xlu1 %2643 }
 0x3d5   : > { %v6199_v60 = vadd.f32 %v2644_v4, %v6125_v42  ;;  %v2642_v47 = vpop.permute.xlu0 %2641  ;;  %v2792_v58 = vpop.permute.xlu2 %2791  ;;  %v2703_v42 = vmul.f32 %v6121_v57, %v5919_v15  ;;  %v2827_v4 = vmul.f32 %v2820_v8, %v6067_v61  ;;  %v2826_v61 = vmul.f32 %v2820_v8, %v6073_v18 }
 0x3d6   : > { %v6201_v9 = vadd.f32 %v2642_v47, %v2610_v43 }
 0x3da   : > { %3037 = vrot.lane.b32.xlu1 %v3018_v38, %s3893_s17 }
 0x3db   : > { %3035 = vrot.lane.b32.xlu0 %v3017_v51, %s3893_s17  ;;  %v2822_v51 = vmul.f32 %v2820_v8, %v5985_v21  ;;  %v2828_v21 = vmul.f32 %v2820_v8, %v6025_v50 }
 0x3dc   : > { %v2732_v33 = vpop.permute.xlu1 %2731 }
 0x3dd   : > { %v2754_v46 = vadd.f32 %v2732_v33, %v2704_v32  ;;  %v2730_v27 = vpop.permute.xlu0 %2729  ;;  %v2858_v30 = vpop.permute.xlu2 %2857 }
 0x3de   : > { %v2753_v43 = vadd.f32 %v2730_v27, %v2703_v42 }
 0x3e0   : > { %v2803_v20 = vadd.f32 %v2780_v6, %v2753_v43  ;;  %v2825_v43 = vmul.f32 %v2820_v8, %v6006_v16 }
 0x3e2   : > { %3043 = vrot.lane.b32.xlu1 %v3021_v11, %s3893_s17  ;;  %v2829_v59 = vadd.f32 %v2821_v12, %v2803_v20 }
 0x3e3   : > { %3041 = vrot.lane.b32.xlu0 %v3020_v31, %s3893_s17  ;;  %s2663_s17 = sld [smem:[#allocation11]] }
 0x3e4   : > { %v2738_v15 = vpop.permute.xlu1 %2737 }
 0x3e5   : > { %v2757_v6 = vadd.f32 %v2738_v15, %v2707_v26  ;;  %v2736_v0 = vpop.permute.xlu0 %2735  ;;  %v2864_v39 = vpop.permute.xlu2 %2863 }
 0x3e6   : > { %v2756_v24 = vadd.f32 %v2736_v0, %v2706_v41 }
 0x3e8   : > { %v2806_v35 = vadd.f32 %v2786_v1, %v2756_v24 }
 0x3ea   : > { %v2832_v7 = vadd.f32 %v2824_v13, %v2806_v35  ;;  %v2946_v35 = vstv %s3493_s14  ;;  %s3211_s14 = sshll.u32 %s6307_s8, 4  ;;  %s3212_s14 = int_to_ptr.vmem [resolvable:$true] %s3211_s14 }
 0x3eb   : > { %v2949_v18 = vmul.f32 %v2946_v35, %v6151_v2 }
 0x3ec   : > { %v2744_v54 = vpop.permute.xlu1 %2743 }
 0x3ed   : > { %v2760_v63 = vadd.f32 %v2744_v54, %v2710_v62  ;;  %v2742_v56 = vpop.permute.xlu0 %2741  ;;  %v2870_v44 = vpop.permute.xlu2 %2869 }
 0x3ee   : > { %v2759_v40 = vadd.f32 %v2742_v56, %v2709_v3  ;;  %v2952_v56 = vmul.f32 %v2946_v35, %v6170_v19  ;;  %v2951_v19 = vmul.f32 %v2946_v35, %v6172_v5  ;;  %v2953_v5 = vmul.f32 %v2946_v35, %v6134_v37 }
 0x3ef   : > { %v6266_v37 = vstv %s3485_s1  ;;  %s3199_s1 = scalar_lea.sflag [#allocation4], %s346_s22 }
 0x3f0   : > { %v2809_v23 = vadd.f32 %v2792_v58, %v2759_v40 }
 0x3f2   : > { %v6226_v38 = vadd.f32 %v2827_v4, %v2809_v23  ;;  %v2948_v4 = vmul.f32 %v2946_v35, %v6155_v10 }
 0x3f4   : > { %v2784_v47 = vpop.permute.xlu1 %2783 }
 0x3f5   : > { %v2805_v29 = vadd.f32 %v2784_v47, %v6132_v17  ;;  %v2782_v1 = vpop.permute.xlu0 %2781  ;;  %v2910_v31 = vpop.permute.xlu2 %2909  ;;  %v2947_v47 = vmul.f32 %v2946_v35, %v6092_v28 }
 0x3f6   : > { %v2804_v32 = vadd.f32 %v2782_v1, %v2754_v46 }
 0x3f7   : > { %v2831_v57 = vadd.f32 %v2823_v34, %v2805_v29 }
 0x3f8   : > { %v2830_v33 = vadd.f32 %v2822_v51, %v2804_v32 }
 0x3fa   : > { %v2880_v50 = vadd.f32 %v2858_v30, %v2830_v33 }
 0x3fc   : > { %v2790_v42 = vpop.permute.xlu1 %2789 }
 0x3fd   : > { %v2808_v27 = vadd.f32 %v2790_v42, %v6153_v49  ;;  %v2788_v58 = vpop.permute.xlu0 %2787  ;;  %v2916_v15 = vpop.permute.xlu2 %2915  ;;  %v2950_v42 = vmul.f32 %v2946_v35, %v6113_v25  ;;  %v2954_v25 = vmul.f32 %v2946_v35, %v6189_v53  ;;  %v6270_v53 = vstv %s3496_s13 }
 0x3fe   : > { %v2807_v20 = vadd.f32 %v2788_v58, %v2757_v6 }
 0x3ff   : > { %v2834_v11 = vadd.f32 %v2826_v61, %v2808_v27 }
 0x400   : > { %v2833_v17 = vadd.f32 %v2825_v43, %v2807_v20 }
 0x402   : > { %v2883_v32 = vadd.f32 %v2864_v39, %v2833_v17 }
 0x404   : > { %v2856_v12 = vpop.permute.xlu1 %2855 }
 0x405   : > { %v2794_v22 = vpop.permute.xlu0 %2793  ;;  %v6238_v13 = vpop.permute.xlu2 %2981  ;;  %v2879_v8 = vadd.f32 %v2856_v12, %v2829_v59 }
 0x406   : > { %v2810_v46 = vadd.f32 %v2794_v22, %v2760_v63  ;;  %v6264_v22 = vstv %s2663_s17  ;;  %s3213_s17 = sshll.u32 %s3210_s19, 4  ;;  %s3214_s17 = int_to_ptr.hbm [resolvable:$true] %s3213_s17 }
 0x408   : > { %v2836_v26 = vadd.f32 %v2828_v21, %v2810_v46  ;;  %v6268_v46 = vstv %s3486_s2  ;;  %s3820_s2 = sshra.s32 %s3214_s17, 4  ;;  %s3821_s2 = int_to_ptr.hbm [resolvable:$true] %s3820_s2 }
 0x409   : > { %s3822_s13 = scalar_lea.hbm %s3821_s2, 192  ;;  %p3827_p3 = scmp.lt.s32.totalorder %s3821_s2, %s6485_s7 }
 0x40a   : > { %v2886_v61 = vadd.f32 %v2870_v44, %v2836_v26  ;;  %v6272_v26 = vstv %s3497_s20  ;;  %p3823_p0 = scmp.ne.s32.totalorder %s3821_s2, %s3822_s13 }
 0x40c   : > { %v2862_v41 = vpop.permute.xlu1 %2861  ;;  %p3824_p1 = pnand %p3823_p0, %p3974_p5 }
 0x40d   : > { %v2860_v0 = vpop.permute.xlu0 %2859  ;;  %v6245_v1 = vpop.permute.xlu2 %2987  ;;  %v2882_v30 = vadd.f32 %v2862_v41, %v2832_v7 }
 0x40e   : > { %v2881_v49 = vadd.f32 %v2860_v0, %v2831_v57  ;;  %v2666_v0 = vmul.f32 %v6264_v22, %v6137_v36  ;;  %p3825_p2 = pneg %p3824_p1 }
 0x410   : > { %v2931_v24 = vadd.f32 %v2910_v31, %v2881_v49  ;;  %v2676_v49 = vmul.f32 %v6266_v37, %v6137_v36 }
 0x412   : > { %v6236_v6 = vadd.f32 %v2949_v18, %v2931_v24  ;;  %v2686_v24 = vmul.f32 %v6268_v46, %v6137_v36 }
 0x414   : > { %v2868_v16 = vpop.permute.xlu1 %2867 }
 0x415   : > { %v2866_v62 = vpop.permute.xlu0 %2865  ;;  %v6253_v58 = vpop.permute.xlu2 %2993  ;;  %v2885_v39 = vadd.f32 %v2868_v16, %v6226_v38 }
 0x416   : > { %v2884_v54 = vadd.f32 %v2866_v62, %v2834_v11  ;;  %v6286_v62 = vstv %s3117_s15  ;;  %s3826_s15 = scalar_lea.hbm %s6485_s7, 384 }
 0x417   : > { %p3828_p4 = scmp.lt.s32.totalorder %s3826_s15, %s3822_s13 }
 0x418   : > { %v2934_v3 = vadd.f32 %v2916_v15, %v2884_v54  ;;  %v6274_v15 = vstv %s3498_s23  ;;  %v6288_v54 = vstv %s3499_s18 }
 0x419   : > { %p3829_p7 = por %p3828_p4, %p3827_p3 }
 0x41a   : > { %v6243_v29 = vadd.f32 %v2952_v56, %v2934_v3  ;;  %v6290_v3 = vstv %s3508_s21 }
 0x41b   : > { %p3830_p8 = pnand %p3829_p7, %p3825_p2 }
 0x41c   : > { %v2908_v63 = vpop.permute.xlu1 %2907 }
 0x41d   : > { %v2930_v40 = vadd.f32 %v2908_v63, %v2880_v50  ;;  %v2906_v23 = vpop.permute.xlu0 %2905  ;;  %v3034_v44 = vpop.permute.xlu2 %3033 }
 0x41e   : > { %v2929_v2 = vadd.f32 %v2906_v23, %v2879_v8 }
 0x41f   : > { %v2956_v34 = vadd.f32 %v2948_v4, %v2930_v40 }
 0x420   : > { %v6247_v51 = vadd.f32 %v2947_v47, %v2929_v2 }
 0x424   : > { %v2914_v59 = vpop.permute.xlu1 %2913 }
 0x425   : > { %v2933_v57 = vadd.f32 %v2914_v59, %v2883_v32  ;;  %v2912_v33 = vpop.permute.xlu0 %2911  ;;  %v3040_v36 = vpop.permute.xlu2 %3039 }
 0x426   : > { %v2932_v10 = vadd.f32 %v2912_v33, %v2882_v30  ;;  %v2679_v33 = vmul.f32 %v6266_v37, %v6157_v14 }
 0x427   : > { %v2959_v27 = vadd.f32 %v2951_v19, %v2933_v57  ;;  %v2669_v57 = vmul.f32 %v6264_v22, %v6157_v14  ;;  %v2689_v19 = vmul.f32 %v6268_v46, %v6157_v14  ;;  %v2685_v14 = vmul.f32 %v6268_v46, %v6168_v55 }
 0x428   : > { %v6251_v28 = vadd.f32 %v2950_v42, %v2932_v10  ;;  %v2665_v42 = vmul.f32 %v6264_v22, %v6168_v55 }
 0x42c   : > { %v2920_v7 = vpop.permute.xlu1 %2919 }
 0x42d   : > { %v2936_v43 = vadd.f32 %v2920_v7, %v2886_v61  ;;  %v2918_v20 = vpop.permute.xlu0 %2917  ;;  %v2672_v7 = vmul.f32 %v6264_v22, %v6174_v52 }
 0x42e   : > { %v2935_v11 = vadd.f32 %v2918_v20, %v2885_v39  ;;  %v2675_v39 = vmul.f32 %v6266_v37, %v6168_v55  ;;  %v2682_v20 = vmul.f32 %v6266_v37, %v6174_v52  ;;  %v2692_v55 = vmul.f32 %v6268_v46, %v6174_v52 }
 0x42f   : > { %v6260_v31 = vadd.f32 %v2954_v25, %v2936_v43  ;;  %v3005_v43 = vadd.f32 %v6238_v13, %v6247_v51  ;;  %v2688_v52 = vmul.f32 %v6268_v46, %v6185_v45 }
 0x430   : > { %v6258_v17 = vadd.f32 %v2953_v5, %v2935_v11 }
 0x434   : > { %v6262_v38 = vpop.permute.xlu1 %2985 }
 0x435   : > { %v2984_v12 = vpop.permute.xlu0 %2983 }
 0x436   : > { %v3006_v21 = vadd.f32 %v2984_v12, %v2956_v34  ;;  %v2668_v12 = vmul.f32 %v6264_v22, %v6185_v45 }
 0x438   : > { %v3056_v41 = vadd.f32 %v3034_v44, %v3006_v21  ;;  %v2678_v21 = vmul.f32 %v6266_v37, %v6185_v45  ;;  %v2677_v45 = vmul.f32 %v6266_v37, %v6187_v48 }
 0x43a   : > { %v3066_v35 = vmul.f32 %v6270_v53, %v3056_v41  ;;  %v3084_v18 = vmul.f32 %v6272_v26, %v3056_v41  ;;  %v3102_v16 = vmul.f32 %v6274_v15, %v3056_v41 }
 0x43c   : > { %v3074_v50 = vadd.f32 %v3066_v35, %v2666_v0  ;;  %v3092_v8 = vadd.f32 %v3084_v18, %v2676_v49  ;;  %v3110_v63 = vadd.f32 %v3102_v16, %v2686_v24  ;;  %v6294_v56 = vpop.permute.xlu1 %2991  ;;  %v3046_v35 = vpop.permute.xlu2 %3045 }
 0x43d   : > { %v2990_v40 = vpop.permute.xlu0 %2989 }
 0x43e   : > { %v3120_v23 = vadd.f32 %v6286_v62, %v3074_v50  ;;  %v3147_v4 = vadd.f32 %v6288_v54, %v3092_v8  ;;  %v3174_v47 = vadd.f32 %v6290_v3, %v3110_v63  ;;  %v3009_v2 = vadd.f32 %v2990_v40, %v2959_v27 }
 0x440   : > { %v3128_v34 = vmax.f32 %v3120_v23, 0.0  ;;  %v3155_v32 = vmax.f32 %v3147_v4, 0.0  ;;  %v3182_v30 = vmax.f32 %v3174_v47, 0.0  ;;  %v3059_v59 = vadd.f32 %v3040_v36, %v3009_v2 }
 0x441   : > { %v2667_v23 = vmul.f32 %v6264_v22, %v6187_v48 }
 0x442   : > { %3137 = vst.msk [vmem:[%s6307_s8 + $0x8] sm:$0xff] %vm3135_vm11, %v3128_v34  ;;  %v3069_v10 = vmul.f32 %v6270_v53, %v3059_v59  ;;  %v3087_v27 = vmul.f32 %v6272_v26, %v3059_v59  ;;  %v3105_v61 = vmul.f32 %v6274_v15, %v3059_v59 }
 0x443   : > { %3501 = vst.msk [vmem:[%s6307_s8 + $0x48] sm:$0xff] %vm3135_vm11, %v3155_v32 }
 0x444   : > { %3510 = vst.msk [vmem:[%s6307_s8 + $0x88] sm:$0xff] %vm3135_vm11, %v3182_v30  ;;  %v3077_v5 = vadd.f32 %v3069_v10, %v2669_v57  ;;  %v3095_v11 = vadd.f32 %v3087_v27, %v2679_v33  ;;  %v3113_v25 = vadd.f32 %v3105_v61, %v2689_v19  ;;  %v3032_v44 = vpop.permute.xlu1 %3031  ;;  %v3008_v33 = vadd.f32 %v6245_v1, %v6251_v28 }
 0x445   : > { %v3055_v41 = vadd.f32 %v3032_v44, %v3005_v43  ;;  %v2996_v13 = vpop.permute.xlu0 %2995  ;;  %v3007_v19 = vadd.f32 %v6262_v38, %v6236_v6  ;;  %v2687_v38 = vmul.f32 %v6268_v46, %v6187_v48 }
 0x446   : > { %v3123_v51 = vadd.f32 %v6286_v62, %v3077_v5  ;;  %v3150_v0 = vadd.f32 %v6288_v54, %v3095_v11  ;;  %v3177_v49 = vadd.f32 %v6290_v3, %v3113_v25  ;;  %v3012_v24 = vadd.f32 %v2996_v13, %v6260_v31 }
 0x447   : > { %v3065_v18 = vmul.f32 %v6270_v53, %v3055_v41  ;;  %v3083_v16 = vmul.f32 %v6272_v26, %v3055_v41  ;;  %v3101_v50 = vmul.f32 %v6274_v15, %v3055_v41 }
 0x448   : > { %v3131_v8 = vmax.f32 %v3123_v51, 0.0  ;;  %v3158_v63 = vmax.f32 %v3150_v0, 0.0  ;;  %v3185_v36 = vmax.f32 %v3177_v49, 0.0  ;;  %v3062_v40 = vadd.f32 %v3046_v35, %v3012_v24 }
 0x449   : > { %v3073_v31 = vadd.f32 %v3065_v18, %v2665_v42  ;;  %v3091_v4 = vadd.f32 %v3083_v16, %v2675_v39  ;;  %v3109_v47 = vadd.f32 %v3101_v50, %v2685_v14  ;;  %v2671_v35 = vmul.f32 %v6264_v22, %v6199_v60 }
 0x44a   : > { %3140 = vst.msk [vmem:[%s6307_s8 + $0x20] sm:$0xff] %vm3135_vm11, %v3131_v8  ;;  %v3072_v2 = vmul.f32 %v6270_v53, %v3062_v40  ;;  %v3090_v34 = vmul.f32 %v6272_v26, %v3062_v40  ;;  %v3108_v32 = vmul.f32 %v6274_v15, %v3062_v40  ;;  %v2681_v18 = vmul.f32 %v6266_v37, %v6199_v60 }
 0x44b   : > { %3504 = vst.msk [vmem:[%s6307_s8 + $0x60] sm:$0xff] %vm3135_vm11, %v3158_v63  ;;  %v3119_v30 = vadd.f32 %v6286_v62, %v3073_v31  ;;  %v3146_v59 = vadd.f32 %v6288_v54, %v3091_v4  ;;  %v3173_v57 = vadd.f32 %v6290_v3, %v3109_v47  ;;  %v3010_v63 = vadd.f32 %v6294_v56, %v6243_v29 }
 0x44c   : > { %3513 = vst.msk [vmem:[%s6307_s8 + $0xa0] sm:$0xff] %vm3135_vm11, %v3185_v36  ;;  %v3080_v42 = vadd.f32 %v3072_v2, %v2672_v7  ;;  %v3098_v10 = vadd.f32 %v3090_v34, %v2682_v20  ;;  %v3116_v27 = vadd.f32 %v3108_v32, %v2692_v55  ;;  %v3038_v61 = vpop.permute.xlu1 %3037  ;;  %v3011_v31 = vadd.f32 %v6253_v58, %v6258_v17 }
 0x44d   : > { %v3127_v39 = vmax.f32 %v3119_v30, 0.0  ;;  %v3154_v14 = vmax.f32 %v3146_v59, 0.0  ;;  %v3181_v43 = vmax.f32 %v3173_v57, 0.0  ;;  %v3058_v5 = vadd.f32 %v3038_v61, %v3008_v33  ;;  %v3036_v11 = vpop.permute.xlu0 %3035 }
 0x44e   : > { %v3126_v25 = vadd.f32 %v6286_v62, %v3080_v42  ;;  %v3153_v1 = vadd.f32 %v6288_v54, %v3098_v10  ;;  %v3180_v6 = vadd.f32 %v6290_v3, %v3116_v27  ;;  %v3057_v28 = vadd.f32 %v3036_v11, %v3007_v19 }
 0x44f   : > { %3136 = vst.msk [vmem:[%s6307_s8] sm:$0xff] %vm3135_vm11, %v3127_v39  ;;  %v3068_v7 = vmul.f32 %v6270_v53, %v3058_v5  ;;  %v3086_v20 = vmul.f32 %v6272_v26, %v3058_v5  ;;  %v3104_v44 = vmul.f32 %v6274_v15, %v3058_v5  ;;  %v2691_v59 = vmul.f32 %v6268_v46, %v6199_v60 }
 0x450   : > { %3500 = vst.msk [vmem:[%s6307_s8 + $0x40] sm:$0xff] %vm3135_vm11, %v3154_v14  ;;  %v3134_v55 = vmax.f32 %v3126_v25, 0.0  ;;  %v3161_v41 = vmax.f32 %v3153_v1, 0.0  ;;  %v3188_v13 = vmax.f32 %v3180_v6, 0.0  ;;  %v3067_v51 = vmul.f32 %v6270_v53, %v3057_v28 }
 0x451   : > { %3509 = vst.msk [vmem:[%s6307_s8 + $0x80] sm:$0xff] %vm3135_vm11, %v3181_v43  ;;  %v3076_v48 = vadd.f32 %v3068_v7, %v2668_v12  ;;  %v3094_v0 = vadd.f32 %v3086_v20, %v2678_v21  ;;  %v3112_v49 = vadd.f32 %v3104_v44, %v2688_v52  ;;  %v3085_v24 = vmul.f32 %v6272_v26, %v3057_v28 }
 0x452   : > { %3143 = vst.msk [vmem:[%s6307_s8 + $0x38] sm:$0xff] %vm3135_vm11, %v3134_v55  ;;  %v3075_v16 = vadd.f32 %v3067_v51, %v2667_v23  ;;  %v3103_v50 = vmul.f32 %v6274_v15, %v3057_v28  ;;  %v2670_v58 = vmul.f32 %v6264_v22, %v6201_v9  ;;  %v2680_v17 = vmul.f32 %v6266_v37, %v6201_v9 }
 0x453   : > { %3507 = vst.msk [vmem:[%s6307_s8 + $0x78] sm:$0xff] %vm3135_vm11, %v3161_v41  ;;  %v3122_v8 = vadd.f32 %v6286_v62, %v3076_v48  ;;  %v3149_v12 = vadd.f32 %v6288_v54, %v3094_v0  ;;  %v3176_v21 = vadd.f32 %v6290_v3, %v3112_v49  ;;  %v3093_v52 = vadd.f32 %v3085_v24, %v2677_v45 }
 0x454   : > { %3516 = vst.msk [vmem:[%s6307_s8 + $0xb8] sm:$0xff] %vm3135_vm11, %v3188_v13  ;;  %v3111_v36 = vadd.f32 %v3103_v50, %v2687_v38  ;;  %v3121_v40 = vadd.f32 %v6286_v62, %v3075_v16  ;;  %v3044_v23 = vpop.permute.xlu1 %3043  ;;  %v2690_v22 = vmul.f32 %v6268_v46, %v6201_v9 }
 0x455   : > { %v3130_v4 = vmax.f32 %v3122_v8, 0.0  ;;  %v3157_v47 = vmax.f32 %v3149_v12, 0.0  ;;  %v3184_v2 = vmax.f32 %v3176_v21, 0.0  ;;  %v3148_v34 = vadd.f32 %v6288_v54, %v3093_v52  ;;  %v3042_v45 = vpop.permute.xlu0 %3041 }
 0x456   : > { %v3129_v32 = vmax.f32 %v3121_v40, 0.0  ;;  %v3175_v29 = vadd.f32 %v6290_v3, %v3111_v36  ;;  %v3061_v56 = vadd.f32 %v3044_v23, %v3011_v31  ;;  %v3060_v30 = vadd.f32 %v3042_v45, %v3010_v63 }
 0x457   : > { %3139 = vst.msk [vmem:[%s6307_s8 + $0x18] sm:$0xff] %vm3135_vm11, %v3130_v4  ;;  %v3156_v57 = vmax.f32 %v3148_v34, 0.0 }
 0x458   : > { %3503 = vst.msk [vmem:[%s6307_s8 + $0x58] sm:$0xff] %vm3135_vm11, %v3157_v47  ;;  %v3183_v33 = vmax.f32 %v3175_v29, 0.0  ;;  %v3071_v19 = vmul.f32 %v6270_v53, %v3061_v56  ;;  %v3089_v42 = vmul.f32 %v6272_v26, %v3061_v56  ;;  %v3107_v60 = vmul.f32 %v6274_v15, %v3061_v56 }
 0x459   : > { %3512 = vst.msk [vmem:[%s6307_s8 + $0x98] sm:$0xff] %vm3135_vm11, %v3184_v2  ;;  %v3070_v37 = vmul.f32 %v6270_v53, %v3060_v30  ;;  %v3088_v10 = vmul.f32 %v6272_v26, %v3060_v30  ;;  %v3106_v27 = vmul.f32 %v6274_v15, %v3060_v30 }
 0x45a   : > { %3138 = vst.msk [vmem:[%s6307_s8 + $0x10] sm:$0xff] %vm3135_vm11, %v3129_v32  ;;  %v3079_v61 = vadd.f32 %v3071_v19, %v2671_v35  ;;  %v3097_v39 = vadd.f32 %v3089_v42, %v2681_v18  ;;  %v3115_v14 = vadd.f32 %v3107_v60, %v2691_v59 }
 0x45b   : > { %3502 = vst.msk [vmem:[%s6307_s8 + $0x50] sm:$0xff] %vm3135_vm11, %v3156_v57  ;;  %v3078_v43 = vadd.f32 %v3070_v37, %v2670_v58  ;;  %v3096_v9 = vadd.f32 %v3088_v10, %v2680_v17  ;;  %v3114_v46 = vadd.f32 %v3106_v27, %v2690_v22 }
 0x45c   : > { %3511 = vst.msk [vmem:[%s6307_s8 + $0x90] sm:$0xff] %vm3135_vm11, %v3183_v33  ;;  %v3125_v53 = vadd.f32 %v6286_v62, %v3079_v61  ;;  %v3152_v26 = vadd.f32 %v6288_v54, %v3097_v39  ;;  %v3179_v15 = vadd.f32 %v6290_v3, %v3115_v14 }
 0x45d   : > { %v3124_v5 = vadd.f32 %v6286_v62, %v3078_v43  ;;  %v3151_v11 = vadd.f32 %v6288_v54, %v3096_v9  ;;  %v3178_v25 = vadd.f32 %v6290_v3, %v3114_v46 }
 0x45e   : > { %v3133_v1 = vmax.f32 %v3125_v53, 0.0  ;;  %v3160_v6 = vmax.f32 %v3152_v26, 0.0  ;;  %v3187_v28 = vmax.f32 %v3179_v15, 0.0 }
 0x45f   : > { %v3132_v38 = vmax.f32 %v3124_v5, 0.0  ;;  %v3159_v62 = vmax.f32 %v3151_v11, 0.0  ;;  %v3186_v54 = vmax.f32 %v3178_v25, 0.0 }
 0x460   : > { %3142 = vst.msk [vmem:[%s6307_s8 + $0x30] sm:$0xff] %vm3135_vm11, %v3133_v1 }
 0x461   : > { %3506 = vst.msk [vmem:[%s6307_s8 + $0x70] sm:$0xff] %vm3135_vm11, %v3160_v6 }
 0x462   : > { %3515 = vst.msk [vmem:[%s6307_s8 + $0xb0] sm:$0xff] %vm3135_vm11, %v3187_v28 }
 0x463   : > { %3141 = vst.msk [vmem:[%s6307_s8 + $0x28] sm:$0xff] %vm3135_vm11, %v3132_v38 }
 0x464   : > { %3505 = vst.msk [vmem:[%s6307_s8 + $0x68] sm:$0xff] %vm3135_vm11, %v3159_v62 }
 0x465   : > { %3514 = vst.msk [vmem:[%s6307_s8 + $0xa8] sm:$0xff] %vm3135_vm11, %v3186_v54 }
 0x466   : > { %3833 = shalt.err (!%p3830_p8)
}
 0x467   : > { %s3894_s22 = smov 128   ;;  %s3895_s29 = smov 8  }
 0x468   : > { %3547 = dma.vmem_to_hbm [thread:$0]  (%p3974_p5), %s3212_s14, 3072, %s3214_s17, %s3199_s1, %s3894_s22, %s3894_s22, %s3895_s29  }
 0x469 PF: > { %p3584_p9 = scmp.ge.s32.totalorder %s3884_s27, 2  ;;  %s3228_s8 = sand.u32 1, %s3872_s24  }
 0x46a   : > { %s3229_s16 = scalar_lea.sflag [#allocation4], %s3228_s8 }
 0x46b   : > { %p3569_p10 = pnand %p3584_p9, %p3978_p6 }
 0x46d   : > { %p3570_p11 = pneg %p3569_p10 }
 0x46f   : > { %3867 = dma.done.wait (%p3570_p11), %s3229_s16, 3072  }
 0x470   : > { %3869 = vsyncadd (%p3570_p11), %s3229_s16, 4294964224  ;;  %p21_p12 = scmp.ge.s32.totalorder %s3961_s30, 4   ;;  %s6860_s24 = smov %s3876_s25 }
 0x471   : > { %s6861_s25 = smov %s3880_s26  ;;  %s6862_s26 = smov %s3972_s10 }
 0x472   : > { %s6863_s27 = smov %s3961_s30  ;;  %23 = sbr.rel (!%p21_p12) target bundleno = 10 (0xa), region = 114 }
 0x477   :  { %3235 = vsyncpa [#allocation4], 1 }
 0x478   :  { %3237 = vsyncpa [#allocation4 + $0x1], 1 }
 0x479   :  { %3238 = vsyncpa [#allocation5], 1 }
 0x47a   :  { %3240 = vsyncpa [#allocation5 + $0x1], 1 }
 0x47b   :  { %3241 = vsyncpa [#allocation7], 1 }
 0x47c   :  { %3242 = vsyncpa [#allocation10], 1 }
 0x47d   :  { %3243 = vsyncpa [#allocation13], 1 }

</bundles_post_ra>
